<compile_context>
chip_gen: v7x
topology: tpu7x:2x2x1
jax: 0.10.0
libtpu: 0.0.40
codegen_flags: <defaults>
</compile_context>

<pallas_src>
import functools

import jax
import jax.numpy as jnp
from jax.experimental import pallas as pl
from jax.experimental.pallas import tpu as pltpu


# ---------------------------------------------------------------------------
# In-kernel helpers (VPU + EUP only -> lowers on all TPU generations)
# ---------------------------------------------------------------------------
_SQRT_2_OVER_PI = 0.7978845608028654


def _gelu_tanh(u):
    # tanh-approximate GELU (1 EUP tanh + ~6 VALU ops per element).
    return 0.5 * u * (1.0 + jnp.tanh(_SQRT_2_OVER_PI * (u + 0.044715 * u * u * u)))


def _layernorm(z, gamma_2d, beta_2d, eps):
    mu = jnp.mean(z, axis=-1, keepdims=True)
    zc = z - mu
    var = jnp.mean(zc * zc, axis=-1, keepdims=True)
    return zc * jax.lax.rsqrt(var + eps) * gamma_2d + beta_2d


# ---------------------------------------------------------------------------
# Fused DeBlock kernel (one batch element per grid step)
# ---------------------------------------------------------------------------
def _deblock_kernel(x_ref, g1_ref, b1_ref, wq_ref, wk_ref, wv_ref,
                    wo_ref, bo_ref, g2_ref, b2_ref,
                    w1_ref, c1_ref, w2_ref, c2_ref, o_ref,
                    attn_scr,
                    *, num_heads, eps, compute_dtype):
    f32 = jnp.float32
    x = x_ref[0].astype(f32)                    # (N, C) upcast in-kernel
    N, C = x.shape
    hd = C // num_heads

    # ---- LayerNorm 1 ----
    xn = _layernorm(x, g1_ref[...], b1_ref[...], eps)
    xb = xn.astype(compute_dtype)

    # ---- Multi-head attention.  Per-head weights are pre-split along the
    #      leading axis (free ref indexing), Wq is pre-scaled by hd**-0.5.
    #      Each head's context goes into the bf16 scratch at its lane offset;
    #      the output projection is then one full-K matmul below. ----
    for h in range(num_heads):                                  # static unroll
        q_h = jnp.dot(xb, wq_ref[h], preferred_element_type=f32)   # (N, hd)
        k_h = jnp.dot(xb, wk_ref[h], preferred_element_type=f32)
        v_h = jnp.dot(xb, wv_ref[h], preferred_element_type=f32)
        # scores = (q_h * scale) @ k_h^T  (scale already folded into Wq)
        s = jax.lax.dot_general(q_h.astype(compute_dtype),
                                k_h.astype(compute_dtype),
                                (((1,), (1,)), ((), ())),
                                preferred_element_type=f32)         # (N, N)
        s = s - jnp.max(s, axis=-1, keepdims=True)
        e = jnp.exp(s)
        denom = jnp.sum(e, axis=-1, keepdims=True)                  # >= 1
        p = e * pl.reciprocal(denom, approx=True)                   # softmax
        o_h = jnp.dot(p.astype(compute_dtype), v_h.astype(compute_dtype),
                      preferred_element_type=f32)                   # (N, hd)
        attn_scr[:, h * hd:(h + 1) * hd] = o_h.astype(compute_dtype)

    # Single full-K output projection over the concatenated heads.
    attn_out = jnp.dot(attn_scr[...], wo_ref[...], preferred_element_type=f32)
    x1 = x + attn_out + bo_ref[...]                                 # residual 1

    # ---- LayerNorm 2 + MLP (fc1 -> GELU -> fc2 -> GELU) ----
    xn2 = _layernorm(x1, g2_ref[...], b2_ref[...], eps)
    h1 = jnp.dot(xn2.astype(compute_dtype), w1_ref[...],
                 preferred_element_type=f32) + c1_ref[...]
    h1 = _gelu_tanh(h1)
    m = jnp.dot(h1.astype(compute_dtype), w2_ref[...],
                preferred_element_type=f32) + c2_ref[...]
    m = _gelu_tanh(m)

    o_ref[0] = (x1 + m).astype(o_ref.dtype)                         # residual 2


# ---------------------------------------------------------------------------
# Weight preparation (do this ONCE per model, reuse across forward calls)
# ---------------------------------------------------------------------------
def prepare_deblock_params(ln1_g, ln1_b, qkv_w, proj_w, proj_b,
                           ln2_g, ln2_b, fc1_w, fc1_b, fc2_w, fc2_b,
                           *, num_heads, eps=1e-5, compute_dtype=jnp.bfloat16):
    C = proj_w.shape[0]
    assert C % num_heads == 0, "dim must be divisible by num_heads"
    hd = C // num_heads
    Hd = fc1_w.shape[0]
    f32 = jnp.float32
    scale = float(hd) ** -0.5

    def split_heads(w, pre_scale=1.0):
        # w: PyTorch (out=C, in=C) layout; y = x @ w.T -> transpose to (in, out)
        wt = jnp.transpose(w.astype(f32)) * pre_scale            # (C_in, C_out)
        return wt.reshape(C, num_heads, hd).transpose(1, 0, 2).astype(compute_dtype)

    return dict(
        num_heads=num_heads, eps=float(eps), compute_dtype=compute_dtype,
        g1=ln1_g.reshape(1, C).astype(f32),
        b1=ln1_b.reshape(1, C).astype(f32),
        wq=split_heads(qkv_w[0 * C:1 * C], pre_scale=scale),     # (nh, C, hd)
        wk=split_heads(qkv_w[1 * C:2 * C]),
        wv=split_heads(qkv_w[2 * C:3 * C]),
        wo=jnp.transpose(proj_w.astype(f32)).astype(compute_dtype),   # (C, C)
        bo=proj_b.reshape(1, C).astype(f32),
        g2=ln2_g.reshape(1, C).astype(f32),
        b2=ln2_b.reshape(1, C).astype(f32),
        w1=jnp.transpose(fc1_w.astype(f32)).astype(compute_dtype),    # (C, Hd)
        c1=fc1_b.reshape(1, Hd).astype(f32),
        w2=jnp.transpose(fc2_w.astype(f32)).astype(compute_dtype),    # (Hd, C)
        c2=fc2_b.reshape(1, C).astype(f32),
    )


# ---------------------------------------------------------------------------
# pallas_call wrapper
# ---------------------------------------------------------------------------
def deblock_apply(x, params):
    """x: (B, N, C).  Returns (B, N, C) in x.dtype (eval-mode forward)."""
    B, N, C = x.shape
    num_heads = params["num_heads"]
    hd = C // num_heads
    Hd = params["w1"].shape[1]
    compute_dtype = params["compute_dtype"]
    eps = params["eps"]

    args = (x, params["g1"], params["b1"], params["wq"], params["wk"],
            params["wv"], params["wo"], params["bo"], params["g2"],
            params["b2"], params["w1"], params["c1"], params["w2"],
            params["c2"])

    # Advisory cost estimate so XLA schedules around the custom call sensibly.
    flops_per_b = (3 * 2 * N * C * C          # qkv
                   + 4 * N * N * C            # qk^T + attn@v over all heads
                   + 2 * N * C * C            # output projection
                   + 4 * N * C * Hd)          # fc1 + fc2
    weight_bytes = 2 * (3 * params["wq"].size + params["wo"].size
                        + params["w1"].size + params["w2"].size)   # bf16
    cost = pl.CostEstimate(
        flops=B * flops_per_b,
        transcendentals=B * (num_heads * N * N + N * Hd + N * C),
        bytes_accessed=2 * x.size * x.dtype.itemsize + weight_bytes,
    )

    kernel = functools.partial(_deblock_kernel, num_heads=num_heads, eps=eps,
                               compute_dtype=compute_dtype)

    small_bytes = 4 * (6 * C + Hd) * 2                     # LN params + biases
    act_bytes = 2 * 2 * N * C * x.dtype.itemsize           # in+out, dbl-buffered
    inter_bytes = 4 * N * (6 * C + Hd + N) + 2 * N * C     # f32 temps + scratch

    def build_and_call(single_buffer_weights):
        spec_kwargs = {}
        if single_buffer_weights:
            # Grid-constant operands: one VMEM buffer is enough.
            spec_kwargs = dict(pipeline_mode=pl.Buffered(1))

        def cspec2(shape):
            return pl.BlockSpec(shape, lambda b: (0, 0), **spec_kwargs)

        def cspec3(shape):
            return pl.BlockSpec(shape, lambda b: (0, 0, 0), **spec_kwargs)

        wf = 1 if single_buffer_weights else 2
        vmem_need = wf * weight_bytes + small_bytes + act_bytes + inter_bytes
        vmem_limit = int(min(max(int(vmem_need * 1.5) + (8 << 20), 32 << 20),
                             100 << 20))
        try:  # clamp to this chip's physical VMEM (v7x: 64 MiB per TC)
            cap = getattr(pltpu.get_tpu_info(), "vmem_capacity_bytes", None)
            if cap:
                vmem_limit = int(min(vmem_limit, int(cap * 0.85)))
        except Exception:
            pass

        in_specs = [
            pl.BlockSpec((1, N, C), lambda b: (b, 0, 0)),       # x
            cspec2((1, C)), cspec2((1, C)),                     # ln1 gamma/beta
            cspec3((num_heads, C, hd)),                         # Wq (pre-scaled)
            cspec3((num_heads, C, hd)),                         # Wk
            cspec3((num_heads, C, hd)),                         # Wv
            cspec2((C, C)),                                     # Wo
            cspec2((1, C)),                                     # proj bias
            cspec2((1, C)), cspec2((1, C)),                     # ln2 gamma/beta
            cspec2((C, Hd)), cspec2((1, Hd)),                   # fc1 W / b
            cspec2((Hd, C)), cspec2((1, C)),                    # fc2 W / b
        ]
        return pl.pallas_call(
            kernel,
            out_shape=jax.ShapeDtypeStruct((B, N, C), x.dtype),
            grid_spec=pltpu.PrefetchScalarGridSpec(
                num_scalar_prefetch=0,
                grid=(B,),
                in_specs=in_specs,
                out_specs=pl.BlockSpec((1, N, C), lambda b: (b, 0, 0)),
                scratch_shapes=[pltpu.VMEM((N, C), compute_dtype)],
            ),
            compiler_params=pltpu.CompilerParams(
                dimension_semantics=("parallel",),
                vmem_limit_bytes=vmem_limit),
            cost_estimate=cost,
        )(*args)

    try:
        return build_and_call(True)
    except Exception:
        # pipeline_mode=pl.Buffered(1) unsupported on this jax/Mosaic version;
        # fall back to default double-buffered weight specs.
        return build_and_call(False)


def deblock_forward(x, ln1_g, ln1_b, qkv_w, proj_w, proj_b,
                    ln2_g, ln2_b, fc1_w, fc1_b, fc2_w, fc2_b,
                    *, num_heads, eps=1e-5, compute_dtype=jnp.bfloat16):
    """One-shot convenience wrapper (prep + apply). Prefer caching the params."""
    params = prepare_deblock_params(
        ln1_g, ln1_b, qkv_w, proj_w, proj_b, ln2_g, ln2_b,
        fc1_w, fc1_b, fc2_w, fc2_b,
        num_heads=num_heads, eps=eps, compute_dtype=compute_dtype)
    return deblock_apply(x, params)


# ---------------------------------------------------------------------------
# Pure-JAX (f32) reference of the PyTorch eval-mode forward, for checking.
# ---------------------------------------------------------------------------
def _deblock_reference(x, ln1_g, ln1_b, qkv_w, proj_w, proj_b,
                       ln2_g, ln2_b, fc1_w, fc1_b, fc2_w, fc2_b,
                       *, num_heads, eps=1e-5):
    B, N, C = x.shape
    hd = C // num_heads

    def ln(z, g, b):
        mu = jnp.mean(z, -1, keepdims=True)
        var = jnp.mean((z - mu) ** 2, -1, keepdims=True)
        return (z - mu) / jnp.sqrt(var + eps) * g + b

    def gelu(u):
        return 0.5 * u * (1.0 + jax.scipy.special.erf(u / jnp.sqrt(2.0)))

    xn = ln(x, ln1_g, ln1_b)
    qkv = jnp.einsum('bnc,dc->bnd', xn, qkv_w)
    qkv = qkv.reshape(B, N, 3, num_heads, hd).transpose(2, 0, 3, 1, 4)
    q, k, v = qkv[0], qkv[1], qkv[2]                        # (B, nh, N, hd)
    attn = (q @ jnp.swapaxes(k, -2, -1)) * (hd ** -0.5)
    attn = jax.nn.softmax(attn, axis=-1)
    o = jnp.swapaxes(attn @ v, 1, 2).reshape(B, N, C)
    o = jnp.einsum('bnc,dc->bnd', o, proj_w) + proj_b
    x1 = x + o
    xn2 = ln(x1, ln2_g, ln2_b)
    h = gelu(jnp.einsum('bnc,hc->bnh', xn2, fc1_w) + fc1_b)
    m = gelu(jnp.einsum('bnh,ch->bnc', h, fc2_w) + fc2_b)
    return x1 + m


if __name__ == "__main__":
    # Small shapes consistent with the module: B=2 sequences of N=16 tokens,
    # dim=32, num_heads=8 (head_dim=4), mlp_ratio=4 -> hidden=128.
    B, N, dim = 2, 16, 32
    num_heads = 8
    hidden = int(dim * 4.0)

    key = jax.random.PRNGKey(0)
    ks = jax.random.split(key, 12)

    x = jax.random.normal(ks[0], (B, N, dim), dtype=jnp.float32)

    ln1_g = jnp.ones((dim,), jnp.float32) + 0.05 * jax.random.normal(ks[1], (dim,))
    ln1_b = 0.05 * jax.random.normal(ks[2], (dim,))
    qkv_w = 0.1 * jax.random.normal(ks[3], (3 * dim, dim))       # qkv_bias=False
    proj_w = 0.1 * jax.random.normal(ks[4], (dim, dim))
    proj_b = 0.05 * jax.random.normal(ks[5], (dim,))
    ln2_g = jnp.ones((dim,), jnp.float32) + 0.05 * jax.random.normal(ks[6], (dim,))
    ln2_b = 0.05 * jax.random.normal(ks[7], (dim,))
    fc1_w = 0.1 * jax.random.normal(ks[8], (hidden, dim))
    fc1_b = 1e-3 * jax.random.normal(ks[9], (hidden,))
    fc2_w = 0.1 * jax.random.normal(ks[10], (dim, hidden))
    fc2_b = 1e-3 * jax.random.normal(ks[11], (dim,))

    # Prepare weights once (hoisted out of the per-call path), then apply.
    params = prepare_deblock_params(
        ln1_g, ln1_b, qkv_w, proj_w, proj_b, ln2_g, ln2_b,
        fc1_w, fc1_b, fc2_w, fc2_b, num_heads=num_heads)
    out = deblock_apply(x, params)
    out = jax.block_until_ready(out)

    assert out.shape == (B, N, dim), out.shape
    assert bool(jnp.all(jnp.isfinite(out)))

    ref = _deblock_reference(x, ln1_g, ln1_b, qkv_w, proj_w, proj_b,
                             ln2_g, ln2_b, fc1_w, fc1_b, fc2_w, fc2_b,
                             num_heads=num_heads)
    max_err = float(jnp.max(jnp.abs(out - ref)))
    assert max_err < 7.5e-2, f"max abs error vs f32 reference: {max_err}"
    print("KERNEL_OK")
</pallas_src>

<mosaic_0001>
module attributes {stable_mosaic.version = 11 : i64} {
  func.func @_deblock_kernel(%arg0: i32, %arg1: memref<1x16x32xf32, #tpu.memory_space<vmem>>, %arg2: memref<1x32xf32, #tpu.memory_space<vmem>>, %arg3: memref<1x32xf32, #tpu.memory_space<vmem>>, %arg4: memref<8x32x4xbf16, #tpu.memory_space<vmem>>, %arg5: memref<8x32x4xbf16, #tpu.memory_space<vmem>>, %arg6: memref<8x32x4xbf16, #tpu.memory_space<vmem>>, %arg7: memref<32x32xbf16, #tpu.memory_space<vmem>>, %arg8: memref<1x32xf32, #tpu.memory_space<vmem>>, %arg9: memref<1x32xf32, #tpu.memory_space<vmem>>, %arg10: memref<1x32xf32, #tpu.memory_space<vmem>>, %arg11: memref<32x128xbf16, #tpu.memory_space<vmem>>, %arg12: memref<1x128xf32, #tpu.memory_space<vmem>>, %arg13: memref<128x32xbf16, #tpu.memory_space<vmem>>, %arg14: memref<1x32xf32, #tpu.memory_space<vmem>>, %arg15: memref<1x16x32xf32, #tpu.memory_space<vmem>>, %arg16: memref<16x32xbf16, #tpu.memory_space<vmem>>) attributes {dimension_semantics = [#tpu.dimension_semantics<parallel>], iteration_bounds = array<i64: 2>, scalar_prefetch = 0 : i64, scratch_operands = 1 : i64, tpu.core_type = #tpu.core_type<tc>, window_params = [{transform_indices = @transform_0, window_bounds = array<i64: 1, 16, 32>}, {pipeline_mode = #tpu.pipeline_mode<synchronous>, transform_indices = @transform_1, window_bounds = array<i64: 1, 32>}, {pipeline_mode = #tpu.pipeline_mode<synchronous>, transform_indices = @transform_2, window_bounds = array<i64: 1, 32>}, {pipeline_mode = #tpu.pipeline_mode<synchronous>, transform_indices = @transform_3, window_bounds = array<i64: 8, 32, 4>}, {pipeline_mode = #tpu.pipeline_mode<synchronous>, transform_indices = @transform_4, window_bounds = array<i64: 8, 32, 4>}, {pipeline_mode = #tpu.pipeline_mode<synchronous>, transform_indices = @transform_5, window_bounds = array<i64: 8, 32, 4>}, {pipeline_mode = #tpu.pipeline_mode<synchronous>, transform_indices = @transform_6, window_bounds = array<i64: 32, 32>}, {pipeline_mode = #tpu.pipeline_mode<synchronous>, transform_indices = @transform_7, window_bounds = array<i64: 1, 32>}, {pipeline_mode = #tpu.pipeline_mode<synchronous>, transform_indices = @transform_8, window_bounds = array<i64: 1, 32>}, {pipeline_mode = #tpu.pipeline_mode<synchronous>, transform_indices = @transform_9, window_bounds = array<i64: 1, 32>}, {pipeline_mode = #tpu.pipeline_mode<synchronous>, transform_indices = @transform_10, window_bounds = array<i64: 32, 128>}, {pipeline_mode = #tpu.pipeline_mode<synchronous>, transform_indices = @transform_11, window_bounds = array<i64: 1, 128>}, {pipeline_mode = #tpu.pipeline_mode<synchronous>, transform_indices = @transform_12, window_bounds = array<i64: 128, 32>}, {pipeline_mode = #tpu.pipeline_mode<synchronous>, transform_indices = @transform_13, window_bounds = array<i64: 1, 32>}, {transform_indices = @transform_14, window_bounds = array<i64: 1, 16, 32>}]} {
    %c0 = arith.constant 0 : index
    %c0_0 = arith.constant 0 : index
    %c0_1 = arith.constant 0 : index
    %0 = vector.load %arg1[%c0, %c0_0, %c0_1] : memref<1x16x32xf32, #tpu.memory_space<vmem>>, vector<1x16x32xf32>
    %1 = vector.shape_cast %0 : vector<1x16x32xf32> to vector<16x32xf32>
    %c0_2 = arith.constant 0 : index
    %c0_3 = arith.constant 0 : index
    %2 = vector.load %arg2[%c0_2, %c0_3] : memref<1x32xf32, #tpu.memory_space<vmem>>, vector<1x32xf32>
    %c0_4 = arith.constant 0 : index
    %c0_5 = arith.constant 0 : index
    %3 = vector.load %arg3[%c0_4, %c0_5] : memref<1x32xf32, #tpu.memory_space<vmem>>, vector<1x32xf32>
    %cst = arith.constant dense<0.000000e+00> : vector<16xf32>
    %4 = vector.multi_reduction <add>, %1, %cst [1] : vector<16x32xf32> to vector<16xf32>
    %5 = vector.shape_cast %4 : vector<16xf32> to vector<16x1xf32>
    %cst_6 = arith.constant 3.200000e+01 : f32
    %6 = vector.broadcast %cst_6 : f32 to vector<16x1xf32>
    %7 = arith.divf %5, %6 : vector<16x1xf32>
    %8 = vector.broadcast %7 : vector<16x1xf32> to vector<16x32xf32>
    %9 = arith.subf %1, %8 : vector<16x32xf32>
    %10 = arith.mulf %9, %9 : vector<16x32xf32>
    %cst_7 = arith.constant dense<0.000000e+00> : vector<16xf32>
    %11 = vector.multi_reduction <add>, %10, %cst_7 [1] : vector<16x32xf32> to vector<16xf32>
    %12 = vector.shape_cast %11 : vector<16xf32> to vector<16x1xf32>
    %cst_8 = arith.constant 3.200000e+01 : f32
    %13 = vector.broadcast %cst_8 : f32 to vector<16x1xf32>
    %14 = arith.divf %12, %13 : vector<16x1xf32>
    %cst_9 = arith.constant 9.99999974E-6 : f32
    %15 = vector.broadcast %cst_9 : f32 to vector<16x1xf32>
    %16 = arith.addf %14, %15 : vector<16x1xf32>
    %17 = math.rsqrt %16 : vector<16x1xf32>
    %18 = vector.broadcast %17 : vector<16x1xf32> to vector<16x32xf32>
    %19 = arith.mulf %9, %18 : vector<16x32xf32>
    %20 = vector.broadcast %2 : vector<1x32xf32> to vector<16x32xf32>
    %21 = arith.mulf %19, %20 : vector<16x32xf32>
    %22 = vector.broadcast %3 : vector<1x32xf32> to vector<16x32xf32>
    %23 = arith.addf %21, %22 : vector<16x32xf32>
    %24 = arith.truncf %23 : vector<16x32xf32> to vector<16x32xbf16>
    %c0_10 = arith.constant 0 : index
    %c0_11 = arith.constant 0 : index
    %c0_12 = arith.constant 0 : index
    %25 = vector.load %arg4[%c0_10, %c0_11, %c0_12] : memref<8x32x4xbf16, #tpu.memory_space<vmem>>, vector<1x32x4xbf16>
    %26 = vector.shape_cast %25 : vector<1x32x4xbf16> to vector<32x4xbf16>
    %cst_13 = arith.constant dense<0.000000e+00> : vector<16x4xf32>
    %27 = tpu.matmul %24, %26, %cst_13 {dimension_numbers = #tpu.dot_dimension_numbers<[1], [0], [0], [1], [0, 0, 1, 1], [], []>} : vector<16x32xbf16>, vector<32x4xbf16>, vector<16x4xf32> -> vector<16x4xf32>
    %c0_14 = arith.constant 0 : index
    %c0_15 = arith.constant 0 : index
    %c0_16 = arith.constant 0 : index
    %28 = vector.load %arg5[%c0_14, %c0_15, %c0_16] : memref<8x32x4xbf16, #tpu.memory_space<vmem>>, vector<1x32x4xbf16>
    %29 = vector.shape_cast %28 : vector<1x32x4xbf16> to vector<32x4xbf16>
    %cst_17 = arith.constant dense<0.000000e+00> : vector<16x4xf32>
    %30 = tpu.matmul %24, %29, %cst_17 {dimension_numbers = #tpu.dot_dimension_numbers<[1], [0], [0], [1], [0, 0, 1, 1], [], []>} : vector<16x32xbf16>, vector<32x4xbf16>, vector<16x4xf32> -> vector<16x4xf32>
    %c0_18 = arith.constant 0 : index
    %c0_19 = arith.constant 0 : index
    %c0_20 = arith.constant 0 : index
    %31 = vector.load %arg6[%c0_18, %c0_19, %c0_20] : memref<8x32x4xbf16, #tpu.memory_space<vmem>>, vector<1x32x4xbf16>
    %32 = vector.shape_cast %31 : vector<1x32x4xbf16> to vector<32x4xbf16>
    %cst_21 = arith.constant dense<0.000000e+00> : vector<16x4xf32>
    %33 = tpu.matmul %24, %32, %cst_21 {dimension_numbers = #tpu.dot_dimension_numbers<[1], [0], [0], [1], [0, 0, 1, 1], [], []>} : vector<16x32xbf16>, vector<32x4xbf16>, vector<16x4xf32> -> vector<16x4xf32>
    %34 = arith.truncf %27 : vector<16x4xf32> to vector<16x4xbf16>
    %35 = arith.truncf %30 : vector<16x4xf32> to vector<16x4xbf16>
    %cst_22 = arith.constant dense<0.000000e+00> : vector<16x16xf32>
    %36 = tpu.matmul %34, %35, %cst_22 {dimension_numbers = #tpu.dot_dimension_numbers<[1], [1], [0], [0], [0, 0, 1, 0], [], []>} : vector<16x4xbf16>, vector<16x4xbf16>, vector<16x16xf32> -> vector<16x16xf32>
    %cst_23 = arith.constant dense<0xFF800000> : vector<16xf32>
    %37 = vector.multi_reduction <maximumf>, %36, %cst_23 [1] : vector<16x16xf32> to vector<16xf32>
    %38 = vector.shape_cast %37 : vector<16xf32> to vector<16x1xf32>
    %39 = vector.broadcast %38 : vector<16x1xf32> to vector<16x16xf32>
    %40 = arith.subf %36, %39 : vector<16x16xf32>
    %41 = math.exp %40 : vector<16x16xf32>
    %cst_24 = arith.constant dense<0.000000e+00> : vector<16xf32>
    %42 = vector.multi_reduction <add>, %41, %cst_24 [1] : vector<16x16xf32> to vector<16xf32>
    %43 = vector.shape_cast %42 : vector<16xf32> to vector<16x1xf32>
    %44 = tpu.reciprocal %43 {approx = true} : vector<16x1xf32> -> vector<16x1xf32>
    %45 = vector.broadcast %44 : vector<16x1xf32> to vector<16x16xf32>
    %46 = arith.mulf %41, %45 : vector<16x16xf32>
    %47 = arith.truncf %46 : vector<16x16xf32> to vector<16x16xbf16>
    %48 = arith.truncf %33 : vector<16x4xf32> to vector<16x4xbf16>
    %cst_25 = arith.constant dense<0.000000e+00> : vector<16x4xf32>
    %49 = tpu.matmul %47, %48, %cst_25 {dimension_numbers = #tpu.dot_dimension_numbers<[1], [0], [0], [1], [0, 0, 1, 1], [], []>} : vector<16x16xbf16>, vector<16x4xbf16>, vector<16x4xf32> -> vector<16x4xf32>
    %50 = arith.truncf %49 : vector<16x4xf32> to vector<16x4xbf16>
    %c0_26 = arith.constant 0 : index
    %c0_27 = arith.constant 0 : index
    %51 = vector.load %arg16[%c0_26, %c0_27] : memref<16x32xbf16, #tpu.memory_space<vmem>>, vector<16x4xbf16>
    tpu.vector_store %arg16[%c0_26, %c0_27], %50 {strides = array<i32>} : memref<16x32xbf16, #tpu.memory_space<vmem>>, vector<16x4xbf16>,
    %c1 = arith.constant 1 : index
    %c0_28 = arith.constant 0 : index
    %c0_29 = arith.constant 0 : index
    %52 = vector.load %arg4[%c1, %c0_28, %c0_29] : memref<8x32x4xbf16, #tpu.memory_space<vmem>>, vector<1x32x4xbf16>
    %53 = vector.shape_cast %52 : vector<1x32x4xbf16> to vector<32x4xbf16>
    %cst_30 = arith.constant dense<0.000000e+00> : vector<16x4xf32>
    %54 = tpu.matmul %24, %53, %cst_30 {dimension_numbers = #tpu.dot_dimension_numbers<[1], [0], [0], [1], [0, 0, 1, 1], [], []>} : vector<16x32xbf16>, vector<32x4xbf16>, vector<16x4xf32> -> vector<16x4xf32>
    %c1_31 = arith.constant 1 : index
    %c0_32 = arith.constant 0 : index
    %c0_33 = arith.constant 0 : index
    %55 = vector.load %arg5[%c1_31, %c0_32, %c0_33] : memref<8x32x4xbf16, #tpu.memory_space<vmem>>, vector<1x32x4xbf16>
    %56 = vector.shape_cast %55 : vector<1x32x4xbf16> to vector<32x4xbf16>
    %cst_34 = arith.constant dense<0.000000e+00> : vector<16x4xf32>
    %57 = tpu.matmul %24, %56, %cst_34 {dimension_numbers = #tpu.dot_dimension_numbers<[1], [0], [0], [1], [0, 0, 1, 1], [], []>} : vector<16x32xbf16>, vector<32x4xbf16>, vector<16x4xf32> -> vector<16x4xf32>
    %c1_35 = arith.constant 1 : index
    %c0_36 = arith.constant 0 : index
    %c0_37 = arith.constant 0 : index
    %58 = vector.load %arg6[%c1_35, %c0_36, %c0_37] : memref<8x32x4xbf16, #tpu.memory_space<vmem>>, vector<1x32x4xbf16>
    %59 = vector.shape_cast %58 : vector<1x32x4xbf16> to vector<32x4xbf16>
    %cst_38 = arith.constant dense<0.000000e+00> : vector<16x4xf32>
    %60 = tpu.matmul %24, %59, %cst_38 {dimension_numbers = #tpu.dot_dimension_numbers<[1], [0], [0], [1], [0, 0, 1, 1], [], []>} : vector<16x32xbf16>, vector<32x4xbf16>, vector<16x4xf32> -> vector<16x4xf32>
    %61 = arith.truncf %54 : vector<16x4xf32> to vector<16x4xbf16>
    %62 = arith.truncf %57 : vector<16x4xf32> to vector<16x4xbf16>
    %cst_39 = arith.constant dense<0.000000e+00> : vector<16x16xf32>
    %63 = tpu.matmul %61, %62, %cst_39 {dimension_numbers = #tpu.dot_dimension_numbers<[1], [1], [0], [0], [0, 0, 1, 0], [], []>} : vector<16x4xbf16>, vector<16x4xbf16>, vector<16x16xf32> -> vector<16x16xf32>
    %cst_40 = arith.constant dense<0xFF800000> : vector<16xf32>
    %64 = vector.multi_reduction <maximumf>, %63, %cst_40 [1] : vector<16x16xf32> to vector<16xf32>
    %65 = vector.shape_cast %64 : vector<16xf32> to vector<16x1xf32>
    %66 = vector.broadcast %65 : vector<16x1xf32> to vector<16x16xf32>
    %67 = arith.subf %63, %66 : vector<16x16xf32>
    %68 = math.exp %67 : vector<16x16xf32>
    %cst_41 = arith.constant dense<0.000000e+00> : vector<16xf32>
    %69 = vector.multi_reduction <add>, %68, %cst_41 [1] : vector<16x16xf32> to vector<16xf32>
    %70 = vector.shape_cast %69 : vector<16xf32> to vector<16x1xf32>
    %71 = tpu.reciprocal %70 {approx = true} : vector<16x1xf32> -> vector<16x1xf32>
    %72 = vector.broadcast %71 : vector<16x1xf32> to vector<16x16xf32>
    %73 = arith.mulf %68, %72 : vector<16x16xf32>
    %74 = arith.truncf %73 : vector<16x16xf32> to vector<16x16xbf16>
    %75 = arith.truncf %60 : vector<16x4xf32> to vector<16x4xbf16>
    %cst_42 = arith.constant dense<0.000000e+00> : vector<16x4xf32>
    %76 = tpu.matmul %74, %75, %cst_42 {dimension_numbers = #tpu.dot_dimension_numbers<[1], [0], [0], [1], [0, 0, 1, 1], [], []>} : vector<16x16xbf16>, vector<16x4xbf16>, vector<16x4xf32> -> vector<16x4xf32>
    %77 = arith.truncf %76 : vector<16x4xf32> to vector<16x4xbf16>
    %c0_43 = arith.constant 0 : index
    %c4 = arith.constant 4 : index
    %78 = vector.load %arg16[%c0_43, %c4] : memref<16x32xbf16, #tpu.memory_space<vmem>>, vector<16x4xbf16>
    tpu.vector_store %arg16[%c0_43, %c4], %77 {strides = array<i32>} : memref<16x32xbf16, #tpu.memory_space<vmem>>, vector<16x4xbf16>,
    %c2 = arith.constant 2 : index
    %c0_44 = arith.constant 0 : index
    %c0_45 = arith.constant 0 : index
    %79 = vector.load %arg4[%c2, %c0_44, %c0_45] : memref<8x32x4xbf16, #tpu.memory_space<vmem>>, vector<1x32x4xbf16>
    %80 = vector.shape_cast %79 : vector<1x32x4xbf16> to vector<32x4xbf16>
    %cst_46 = arith.constant dense<0.000000e+00> : vector<16x4xf32>
    %81 = tpu.matmul %24, %80, %cst_46 {dimension_numbers = #tpu.dot_dimension_numbers<[1], [0], [0], [1], [0, 0, 1, 1], [], []>} : vector<16x32xbf16>, vector<32x4xbf16>, vector<16x4xf32> -> vector<16x4xf32>
    %c2_47 = arith.constant 2 : index
    %c0_48 = arith.constant 0 : index
    %c0_49 = arith.constant 0 : index
    %82 = vector.load %arg5[%c2_47, %c0_48, %c0_49] : memref<8x32x4xbf16, #tpu.memory_space<vmem>>, vector<1x32x4xbf16>
    %83 = vector.shape_cast %82 : vector<1x32x4xbf16> to vector<32x4xbf16>
    %cst_50 = arith.constant dense<0.000000e+00> : vector<16x4xf32>
    %84 = tpu.matmul %24, %83, %cst_50 {dimension_numbers = #tpu.dot_dimension_numbers<[1], [0], [0], [1], [0, 0, 1, 1], [], []>} : vector<16x32xbf16>, vector<32x4xbf16>, vector<16x4xf32> -> vector<16x4xf32>
    %c2_51 = arith.constant 2 : index
    %c0_52 = arith.constant 0 : index
    %c0_53 = arith.constant 0 : index
    %85 = vector.load %arg6[%c2_51, %c0_52, %c0_53] : memref<8x32x4xbf16, #tpu.memory_space<vmem>>, vector<1x32x4xbf16>
    %86 = vector.shape_cast %85 : vector<1x32x4xbf16> to vector<32x4xbf16>
    %cst_54 = arith.constant dense<0.000000e+00> : vector<16x4xf32>
    %87 = tpu.matmul %24, %86, %cst_54 {dimension_numbers = #tpu.dot_dimension_numbers<[1], [0], [0], [1], [0, 0, 1, 1], [], []>} : vector<16x32xbf16>, vector<32x4xbf16>, vector<16x4xf32> -> vector<16x4xf32>
    %88 = arith.truncf %81 : vector<16x4xf32> to vector<16x4xbf16>
    %89 = arith.truncf %84 : vector<16x4xf32> to vector<16x4xbf16>
    %cst_55 = arith.constant dense<0.000000e+00> : vector<16x16xf32>
    %90 = tpu.matmul %88, %89, %cst_55 {dimension_numbers = #tpu.dot_dimension_numbers<[1], [1], [0], [0], [0, 0, 1, 0], [], []>} : vector<16x4xbf16>, vector<16x4xbf16>, vector<16x16xf32> -> vector<16x16xf32>
    %cst_56 = arith.constant dense<0xFF800000> : vector<16xf32>
    %91 = vector.multi_reduction <maximumf>, %90, %cst_56 [1] : vector<16x16xf32> to vector<16xf32>
    %92 = vector.shape_cast %91 : vector<16xf32> to vector<16x1xf32>
    %93 = vector.broadcast %92 : vector<16x1xf32> to vector<16x16xf32>
    %94 = arith.subf %90, %93 : vector<16x16xf32>
    %95 = math.exp %94 : vector<16x16xf32>
    %cst_57 = arith.constant dense<0.000000e+00> : vector<16xf32>
    %96 = vector.multi_reduction <add>, %95, %cst_57 [1] : vector<16x16xf32> to vector<16xf32>
    %97 = vector.shape_cast %96 : vector<16xf32> to vector<16x1xf32>
    %98 = tpu.reciprocal %97 {approx = true} : vector<16x1xf32> -> vector<16x1xf32>
    %99 = vector.broadcast %98 : vector<16x1xf32> to vector<16x16xf32>
    %100 = arith.mulf %95, %99 : vector<16x16xf32>
    %101 = arith.truncf %100 : vector<16x16xf32> to vector<16x16xbf16>
    %102 = arith.truncf %87 : vector<16x4xf32> to vector<16x4xbf16>
    %cst_58 = arith.constant dense<0.000000e+00> : vector<16x4xf32>
    %103 = tpu.matmul %101, %102, %cst_58 {dimension_numbers = #tpu.dot_dimension_numbers<[1], [0], [0], [1], [0, 0, 1, 1], [], []>} : vector<16x16xbf16>, vector<16x4xbf16>, vector<16x4xf32> -> vector<16x4xf32>
    %104 = arith.truncf %103 : vector<16x4xf32> to vector<16x4xbf16>
    %c0_59 = arith.constant 0 : index
    %c8 = arith.constant 8 : index
    %105 = vector.load %arg16[%c0_59, %c8] : memref<16x32xbf16, #tpu.memory_space<vmem>>, vector<16x4xbf16>
    tpu.vector_store %arg16[%c0_59, %c8], %104 {strides = array<i32>} : memref<16x32xbf16, #tpu.memory_space<vmem>>, vector<16x4xbf16>,
    %c3 = arith.constant 3 : index
    %c0_60 = arith.constant 0 : index
    %c0_61 = arith.constant 0 : index
    %106 = vector.load %arg4[%c3, %c0_60, %c0_61] : memref<8x32x4xbf16, #tpu.memory_space<vmem>>, vector<1x32x4xbf16>
    %107 = vector.shape_cast %106 : vector<1x32x4xbf16> to vector<32x4xbf16>
    %cst_62 = arith.constant dense<0.000000e+00> : vector<16x4xf32>
    %108 = tpu.matmul %24, %107, %cst_62 {dimension_numbers = #tpu.dot_dimension_numbers<[1], [0], [0], [1], [0, 0, 1, 1], [], []>} : vector<16x32xbf16>, vector<32x4xbf16>, vector<16x4xf32> -> vector<16x4xf32>
    %c3_63 = arith.constant 3 : index
    %c0_64 = arith.constant 0 : index
    %c0_65 = arith.constant 0 : index
    %109 = vector.load %arg5[%c3_63, %c0_64, %c0_65] : memref<8x32x4xbf16, #tpu.memory_space<vmem>>, vector<1x32x4xbf16>
    %110 = vector.shape_cast %109 : vector<1x32x4xbf16> to vector<32x4xbf16>
    %cst_66 = arith.constant dense<0.000000e+00> : vector<16x4xf32>
    %111 = tpu.matmul %24, %110, %cst_66 {dimension_numbers = #tpu.dot_dimension_numbers<[1], [0], [0], [1], [0, 0, 1, 1], [], []>} : vector<16x32xbf16>, vector<32x4xbf16>, vector<16x4xf32> -> vector<16x4xf32>
    %c3_67 = arith.constant 3 : index
    %c0_68 = arith.constant 0 : index
    %c0_69 = arith.constant 0 : index
    %112 = vector.load %arg6[%c3_67, %c0_68, %c0_69] : memref<8x32x4xbf16, #tpu.memory_space<vmem>>, vector<1x32x4xbf16>
    %113 = vector.shape_cast %112 : vector<1x32x4xbf16> to vector<32x4xbf16>
    %cst_70 = arith.constant dense<0.000000e+00> : vector<16x4xf32>
    %114 = tpu.matmul %24, %113, %cst_70 {dimension_numbers = #tpu.dot_dimension_numbers<[1], [0], [0], [1], [0, 0, 1, 1], [], []>} : vector<16x32xbf16>, vector<32x4xbf16>, vector<16x4xf32> -> vector<16x4xf32>
    %115 = arith.truncf %108 : vector<16x4xf32> to vector<16x4xbf16>
    %116 = arith.truncf %111 : vector<16x4xf32> to vector<16x4xbf16>
    %cst_71 = arith.constant dense<0.000000e+00> : vector<16x16xf32>
    %117 = tpu.matmul %115, %116, %cst_71 {dimension_numbers = #tpu.dot_dimension_numbers<[1], [1], [0], [0], [0, 0, 1, 0], [], []>} : vector<16x4xbf16>, vector<16x4xbf16>, vector<16x16xf32> -> vector<16x16xf32>
    %cst_72 = arith.constant dense<0xFF800000> : vector<16xf32>
    %118 = vector.multi_reduction <maximumf>, %117, %cst_72 [1] : vector<16x16xf32> to vector<16xf32>
    %119 = vector.shape_cast %118 : vector<16xf32> to vector<16x1xf32>
    %120 = vector.broadcast %119 : vector<16x1xf32> to vector<16x16xf32>
    %121 = arith.subf %117, %120 : vector<16x16xf32>
    %122 = math.exp %121 : vector<16x16xf32>
    %cst_73 = arith.constant dense<0.000000e+00> : vector<16xf32>
    %123 = vector.multi_reduction <add>, %122, %cst_73 [1] : vector<16x16xf32> to vector<16xf32>
    %124 = vector.shape_cast %123 : vector<16xf32> to vector<16x1xf32>
    %125 = tpu.reciprocal %124 {approx = true} : vector<16x1xf32> -> vector<16x1xf32>
    %126 = vector.broadcast %125 : vector<16x1xf32> to vector<16x16xf32>
    %127 = arith.mulf %122, %126 : vector<16x16xf32>
    %128 = arith.truncf %127 : vector<16x16xf32> to vector<16x16xbf16>
    %129 = arith.truncf %114 : vector<16x4xf32> to vector<16x4xbf16>
    %cst_74 = arith.constant dense<0.000000e+00> : vector<16x4xf32>
    %130 = tpu.matmul %128, %129, %cst_74 {dimension_numbers = #tpu.dot_dimension_numbers<[1], [0], [0], [1], [0, 0, 1, 1], [], []>} : vector<16x16xbf16>, vector<16x4xbf16>, vector<16x4xf32> -> vector<16x4xf32>
    %131 = arith.truncf %130 : vector<16x4xf32> to vector<16x4xbf16>
    %c0_75 = arith.constant 0 : index
    %c12 = arith.constant 12 : index
    %132 = vector.load %arg16[%c0_75, %c12] : memref<16x32xbf16, #tpu.memory_space<vmem>>, vector<16x4xbf16>
    tpu.vector_store %arg16[%c0_75, %c12], %131 {strides = array<i32>} : memref<16x32xbf16, #tpu.memory_space<vmem>>, vector<16x4xbf16>,
    %c4_76 = arith.constant 4 : index
    %c0_77 = arith.constant 0 : index
    %c0_78 = arith.constant 0 : index
    %133 = vector.load %arg4[%c4_76, %c0_77, %c0_78] : memref<8x32x4xbf16, #tpu.memory_space<vmem>>, vector<1x32x4xbf16>
    %134 = vector.shape_cast %133 : vector<1x32x4xbf16> to vector<32x4xbf16>
    %cst_79 = arith.constant dense<0.000000e+00> : vector<16x4xf32>
    %135 = tpu.matmul %24, %134, %cst_79 {dimension_numbers = #tpu.dot_dimension_numbers<[1], [0], [0], [1], [0, 0, 1, 1], [], []>} : vector<16x32xbf16>, vector<32x4xbf16>, vector<16x4xf32> -> vector<16x4xf32>
    %c4_80 = arith.constant 4 : index
    %c0_81 = arith.constant 0 : index
    %c0_82 = arith.constant 0 : index
    %136 = vector.load %arg5[%c4_80, %c0_81, %c0_82] : memref<8x32x4xbf16, #tpu.memory_space<vmem>>, vector<1x32x4xbf16>
    %137 = vector.shape_cast %136 : vector<1x32x4xbf16> to vector<32x4xbf16>
    %cst_83 = arith.constant dense<0.000000e+00> : vector<16x4xf32>
    %138 = tpu.matmul %24, %137, %cst_83 {dimension_numbers = #tpu.dot_dimension_numbers<[1], [0], [0], [1], [0, 0, 1, 1], [], []>} : vector<16x32xbf16>, vector<32x4xbf16>, vector<16x4xf32> -> vector<16x4xf32>
    %c4_84 = arith.constant 4 : index
    %c0_85 = arith.constant 0 : index
    %c0_86 = arith.constant 0 : index
    %139 = vector.load %arg6[%c4_84, %c0_85, %c0_86] : memref<8x32x4xbf16, #tpu.memory_space<vmem>>, vector<1x32x4xbf16>
    %140 = vector.shape_cast %139 : vector<1x32x4xbf16> to vector<32x4xbf16>
    %cst_87 = arith.constant dense<0.000000e+00> : vector<16x4xf32>
    %141 = tpu.matmul %24, %140, %cst_87 {dimension_numbers = #tpu.dot_dimension_numbers<[1], [0], [0], [1], [0, 0, 1, 1], [], []>} : vector<16x32xbf16>, vector<32x4xbf16>, vector<16x4xf32> -> vector<16x4xf32>
    %142 = arith.truncf %135 : vector<16x4xf32> to vector<16x4xbf16>
    %143 = arith.truncf %138 : vector<16x4xf32> to vector<16x4xbf16>
    %cst_88 = arith.constant dense<0.000000e+00> : vector<16x16xf32>
    %144 = tpu.matmul %142, %143, %cst_88 {dimension_numbers = #tpu.dot_dimension_numbers<[1], [1], [0], [0], [0, 0, 1, 0], [], []>} : vector<16x4xbf16>, vector<16x4xbf16>, vector<16x16xf32> -> vector<16x16xf32>
    %cst_89 = arith.constant dense<0xFF800000> : vector<16xf32>
    %145 = vector.multi_reduction <maximumf>, %144, %cst_89 [1] : vector<16x16xf32> to vector<16xf32>
    %146 = vector.shape_cast %145 : vector<16xf32> to vector<16x1xf32>
    %147 = vector.broadcast %146 : vector<16x1xf32> to vector<16x16xf32>
    %148 = arith.subf %144, %147 : vector<16x16xf32>
    %149 = math.exp %148 : vector<16x16xf32>
    %cst_90 = arith.constant dense<0.000000e+00> : vector<16xf32>
    %150 = vector.multi_reduction <add>, %149, %cst_90 [1] : vector<16x16xf32> to vector<16xf32>
    %151 = vector.shape_cast %150 : vector<16xf32> to vector<16x1xf32>
    %152 = tpu.reciprocal %151 {approx = true} : vector<16x1xf32> -> vector<16x1xf32>
    %153 = vector.broadcast %152 : vector<16x1xf32> to vector<16x16xf32>
    %154 = arith.mulf %149, %153 : vector<16x16xf32>
    %155 = arith.truncf %154 : vector<16x16xf32> to vector<16x16xbf16>
    %156 = arith.truncf %141 : vector<16x4xf32> to vector<16x4xbf16>
    %cst_91 = arith.constant dense<0.000000e+00> : vector<16x4xf32>
    %157 = tpu.matmul %155, %156, %cst_91 {dimension_numbers = #tpu.dot_dimension_numbers<[1], [0], [0], [1], [0, 0, 1, 1], [], []>} : vector<16x16xbf16>, vector<16x4xbf16>, vector<16x4xf32> -> vector<16x4xf32>
    %158 = arith.truncf %157 : vector<16x4xf32> to vector<16x4xbf16>
    %c0_92 = arith.constant 0 : index
    %c16 = arith.constant 16 : index
    %159 = vector.load %arg16[%c0_92, %c16] : memref<16x32xbf16, #tpu.memory_space<vmem>>, vector<16x4xbf16>
    tpu.vector_store %arg16[%c0_92, %c16], %158 {strides = array<i32>} : memref<16x32xbf16, #tpu.memory_space<vmem>>, vector<16x4xbf16>,
    %c5 = arith.constant 5 : index
    %c0_93 = arith.constant 0 : index
    %c0_94 = arith.constant 0 : index
    %160 = vector.load %arg4[%c5, %c0_93, %c0_94] : memref<8x32x4xbf16, #tpu.memory_space<vmem>>, vector<1x32x4xbf16>
    %161 = vector.shape_cast %160 : vector<1x32x4xbf16> to vector<32x4xbf16>
    %cst_95 = arith.constant dense<0.000000e+00> : vector<16x4xf32>
    %162 = tpu.matmul %24, %161, %cst_95 {dimension_numbers = #tpu.dot_dimension_numbers<[1], [0], [0], [1], [0, 0, 1, 1], [], []>} : vector<16x32xbf16>, vector<32x4xbf16>, vector<16x4xf32> -> vector<16x4xf32>
    %c5_96 = arith.constant 5 : index
    %c0_97 = arith.constant 0 : index
    %c0_98 = arith.constant 0 : index
    %163 = vector.load %arg5[%c5_96, %c0_97, %c0_98] : memref<8x32x4xbf16, #tpu.memory_space<vmem>>, vector<1x32x4xbf16>
    %164 = vector.shape_cast %163 : vector<1x32x4xbf16> to vector<32x4xbf16>
    %cst_99 = arith.constant dense<0.000000e+00> : vector<16x4xf32>
    %165 = tpu.matmul %24, %164, %cst_99 {dimension_numbers = #tpu.dot_dimension_numbers<[1], [0], [0], [1], [0, 0, 1, 1], [], []>} : vector<16x32xbf16>, vector<32x4xbf16>, vector<16x4xf32> -> vector<16x4xf32>
    %c5_100 = arith.constant 5 : index
    %c0_101 = arith.constant 0 : index
    %c0_102 = arith.constant 0 : index
    %166 = vector.load %arg6[%c5_100, %c0_101, %c0_102] : memref<8x32x4xbf16, #tpu.memory_space<vmem>>, vector<1x32x4xbf16>
    %167 = vector.shape_cast %166 : vector<1x32x4xbf16> to vector<32x4xbf16>
    %cst_103 = arith.constant dense<0.000000e+00> : vector<16x4xf32>
    %168 = tpu.matmul %24, %167, %cst_103 {dimension_numbers = #tpu.dot_dimension_numbers<[1], [0], [0], [1], [0, 0, 1, 1], [], []>} : vector<16x32xbf16>, vector<32x4xbf16>, vector<16x4xf32> -> vector<16x4xf32>
    %169 = arith.truncf %162 : vector<16x4xf32> to vector<16x4xbf16>
    %170 = arith.truncf %165 : vector<16x4xf32> to vector<16x4xbf16>
    %cst_104 = arith.constant dense<0.000000e+00> : vector<16x16xf32>
    %171 = tpu.matmul %169, %170, %cst_104 {dimension_numbers = #tpu.dot_dimension_numbers<[1], [1], [0], [0], [0, 0, 1, 0], [], []>} : vector<16x4xbf16>, vector<16x4xbf16>, vector<16x16xf32> -> vector<16x16xf32>
    %cst_105 = arith.constant dense<0xFF800000> : vector<16xf32>
    %172 = vector.multi_reduction <maximumf>, %171, %cst_105 [1] : vector<16x16xf32> to vector<16xf32>
    %173 = vector.shape_cast %172 : vector<16xf32> to vector<16x1xf32>
    %174 = vector.broadcast %173 : vector<16x1xf32> to vector<16x16xf32>
    %175 = arith.subf %171, %174 : vector<16x16xf32>
    %176 = math.exp %175 : vector<16x16xf32>
    %cst_106 = arith.constant dense<0.000000e+00> : vector<16xf32>
    %177 = vector.multi_reduction <add>, %176, %cst_106 [1] : vector<16x16xf32> to vector<16xf32>
    %178 = vector.shape_cast %177 : vector<16xf32> to vector<16x1xf32>
    %179 = tpu.reciprocal %178 {approx = true} : vector<16x1xf32> -> vector<16x1xf32>
    %180 = vector.broadcast %179 : vector<16x1xf32> to vector<16x16xf32>
    %181 = arith.mulf %176, %180 : vector<16x16xf32>
    %182 = arith.truncf %181 : vector<16x16xf32> to vector<16x16xbf16>
    %183 = arith.truncf %168 : vector<16x4xf32> to vector<16x4xbf16>
    %cst_107 = arith.constant dense<0.000000e+00> : vector<16x4xf32>
    %184 = tpu.matmul %182, %183, %cst_107 {dimension_numbers = #tpu.dot_dimension_numbers<[1], [0], [0], [1], [0, 0, 1, 1], [], []>} : vector<16x16xbf16>, vector<16x4xbf16>, vector<16x4xf32> -> vector<16x4xf32>
    %185 = arith.truncf %184 : vector<16x4xf32> to vector<16x4xbf16>
    %c0_108 = arith.constant 0 : index
    %c20 = arith.constant 20 : index
    %186 = vector.load %arg16[%c0_108, %c20] : memref<16x32xbf16, #tpu.memory_space<vmem>>, vector<16x4xbf16>
    tpu.vector_store %arg16[%c0_108, %c20], %185 {strides = array<i32>} : memref<16x32xbf16, #tpu.memory_space<vmem>>, vector<16x4xbf16>,
    %c6 = arith.constant 6 : index
    %c0_109 = arith.constant 0 : index
    %c0_110 = arith.constant 0 : index
    %187 = vector.load %arg4[%c6, %c0_109, %c0_110] : memref<8x32x4xbf16, #tpu.memory_space<vmem>>, vector<1x32x4xbf16>
    %188 = vector.shape_cast %187 : vector<1x32x4xbf16> to vector<32x4xbf16>
    %cst_111 = arith.constant dense<0.000000e+00> : vector<16x4xf32>
    %189 = tpu.matmul %24, %188, %cst_111 {dimension_numbers = #tpu.dot_dimension_numbers<[1], [0], [0], [1], [0, 0, 1, 1], [], []>} : vector<16x32xbf16>, vector<32x4xbf16>, vector<16x4xf32> -> vector<16x4xf32>
    %c6_112 = arith.constant 6 : index
    %c0_113 = arith.constant 0 : index
    %c0_114 = arith.constant 0 : index
    %190 = vector.load %arg5[%c6_112, %c0_113, %c0_114] : memref<8x32x4xbf16, #tpu.memory_space<vmem>>, vector<1x32x4xbf16>
    %191 = vector.shape_cast %190 : vector<1x32x4xbf16> to vector<32x4xbf16>
    %cst_115 = arith.constant dense<0.000000e+00> : vector<16x4xf32>
    %192 = tpu.matmul %24, %191, %cst_115 {dimension_numbers = #tpu.dot_dimension_numbers<[1], [0], [0], [1], [0, 0, 1, 1], [], []>} : vector<16x32xbf16>, vector<32x4xbf16>, vector<16x4xf32> -> vector<16x4xf32>
    %c6_116 = arith.constant 6 : index
    %c0_117 = arith.constant 0 : index
    %c0_118 = arith.constant 0 : index
    %193 = vector.load %arg6[%c6_116, %c0_117, %c0_118] : memref<8x32x4xbf16, #tpu.memory_space<vmem>>, vector<1x32x4xbf16>
    %194 = vector.shape_cast %193 : vector<1x32x4xbf16> to vector<32x4xbf16>
    %cst_119 = arith.constant dense<0.000000e+00> : vector<16x4xf32>
    %195 = tpu.matmul %24, %194, %cst_119 {dimension_numbers = #tpu.dot_dimension_numbers<[1], [0], [0], [1], [0, 0, 1, 1], [], []>} : vector<16x32xbf16>, vector<32x4xbf16>, vector<16x4xf32> -> vector<16x4xf32>
    %196 = arith.truncf %189 : vector<16x4xf32> to vector<16x4xbf16>
    %197 = arith.truncf %192 : vector<16x4xf32> to vector<16x4xbf16>
    %cst_120 = arith.constant dense<0.000000e+00> : vector<16x16xf32>
    %198 = tpu.matmul %196, %197, %cst_120 {dimension_numbers = #tpu.dot_dimension_numbers<[1], [1], [0], [0], [0, 0, 1, 0], [], []>} : vector<16x4xbf16>, vector<16x4xbf16>, vector<16x16xf32> -> vector<16x16xf32>
    %cst_121 = arith.constant dense<0xFF800000> : vector<16xf32>
    %199 = vector.multi_reduction <maximumf>, %198, %cst_121 [1] : vector<16x16xf32> to vector<16xf32>
    %200 = vector.shape_cast %199 : vector<16xf32> to vector<16x1xf32>
    %201 = vector.broadcast %200 : vector<16x1xf32> to vector<16x16xf32>
    %202 = arith.subf %198, %201 : vector<16x16xf32>
    %203 = math.exp %202 : vector<16x16xf32>
    %cst_122 = arith.constant dense<0.000000e+00> : vector<16xf32>
    %204 = vector.multi_reduction <add>, %203, %cst_122 [1] : vector<16x16xf32> to vector<16xf32>
    %205 = vector.shape_cast %204 : vector<16xf32> to vector<16x1xf32>
    %206 = tpu.reciprocal %205 {approx = true} : vector<16x1xf32> -> vector<16x1xf32>
    %207 = vector.broadcast %206 : vector<16x1xf32> to vector<16x16xf32>
    %208 = arith.mulf %203, %207 : vector<16x16xf32>
    %209 = arith.truncf %208 : vector<16x16xf32> to vector<16x16xbf16>
    %210 = arith.truncf %195 : vector<16x4xf32> to vector<16x4xbf16>
    %cst_123 = arith.constant dense<0.000000e+00> : vector<16x4xf32>
    %211 = tpu.matmul %209, %210, %cst_123 {dimension_numbers = #tpu.dot_dimension_numbers<[1], [0], [0], [1], [0, 0, 1, 1], [], []>} : vector<16x16xbf16>, vector<16x4xbf16>, vector<16x4xf32> -> vector<16x4xf32>
    %212 = arith.truncf %211 : vector<16x4xf32> to vector<16x4xbf16>
    %c0_124 = arith.constant 0 : index
    %c24 = arith.constant 24 : index
    %213 = vector.load %arg16[%c0_124, %c24] : memref<16x32xbf16, #tpu.memory_space<vmem>>, vector<16x4xbf16>
    tpu.vector_store %arg16[%c0_124, %c24], %212 {strides = array<i32>} : memref<16x32xbf16, #tpu.memory_space<vmem>>, vector<16x4xbf16>,
    %c7 = arith.constant 7 : index
    %c0_125 = arith.constant 0 : index
    %c0_126 = arith.constant 0 : index
    %214 = vector.load %arg4[%c7, %c0_125, %c0_126] : memref<8x32x4xbf16, #tpu.memory_space<vmem>>, vector<1x32x4xbf16>
    %215 = vector.shape_cast %214 : vector<1x32x4xbf16> to vector<32x4xbf16>
    %cst_127 = arith.constant dense<0.000000e+00> : vector<16x4xf32>
    %216 = tpu.matmul %24, %215, %cst_127 {dimension_numbers = #tpu.dot_dimension_numbers<[1], [0], [0], [1], [0, 0, 1, 1], [], []>} : vector<16x32xbf16>, vector<32x4xbf16>, vector<16x4xf32> -> vector<16x4xf32>
    %c7_128 = arith.constant 7 : index
    %c0_129 = arith.constant 0 : index
    %c0_130 = arith.constant 0 : index
    %217 = vector.load %arg5[%c7_128, %c0_129, %c0_130] : memref<8x32x4xbf16, #tpu.memory_space<vmem>>, vector<1x32x4xbf16>
    %218 = vector.shape_cast %217 : vector<1x32x4xbf16> to vector<32x4xbf16>
    %cst_131 = arith.constant dense<0.000000e+00> : vector<16x4xf32>
    %219 = tpu.matmul %24, %218, %cst_131 {dimension_numbers = #tpu.dot_dimension_numbers<[1], [0], [0], [1], [0, 0, 1, 1], [], []>} : vector<16x32xbf16>, vector<32x4xbf16>, vector<16x4xf32> -> vector<16x4xf32>
    %c7_132 = arith.constant 7 : index
    %c0_133 = arith.constant 0 : index
    %c0_134 = arith.constant 0 : index
    %220 = vector.load %arg6[%c7_132, %c0_133, %c0_134] : memref<8x32x4xbf16, #tpu.memory_space<vmem>>, vector<1x32x4xbf16>
    %221 = vector.shape_cast %220 : vector<1x32x4xbf16> to vector<32x4xbf16>
    %cst_135 = arith.constant dense<0.000000e+00> : vector<16x4xf32>
    %222 = tpu.matmul %24, %221, %cst_135 {dimension_numbers = #tpu.dot_dimension_numbers<[1], [0], [0], [1], [0, 0, 1, 1], [], []>} : vector<16x32xbf16>, vector<32x4xbf16>, vector<16x4xf32> -> vector<16x4xf32>
    %223 = arith.truncf %216 : vector<16x4xf32> to vector<16x4xbf16>
    %224 = arith.truncf %219 : vector<16x4xf32> to vector<16x4xbf16>
    %cst_136 = arith.constant dense<0.000000e+00> : vector<16x16xf32>
    %225 = tpu.matmul %223, %224, %cst_136 {dimension_numbers = #tpu.dot_dimension_numbers<[1], [1], [0], [0], [0, 0, 1, 0], [], []>} : vector<16x4xbf16>, vector<16x4xbf16>, vector<16x16xf32> -> vector<16x16xf32>
    %cst_137 = arith.constant dense<0xFF800000> : vector<16xf32>
    %226 = vector.multi_reduction <maximumf>, %225, %cst_137 [1] : vector<16x16xf32> to vector<16xf32>
    %227 = vector.shape_cast %226 : vector<16xf32> to vector<16x1xf32>
    %228 = vector.broadcast %227 : vector<16x1xf32> to vector<16x16xf32>
    %229 = arith.subf %225, %228 : vector<16x16xf32>
    %230 = math.exp %229 : vector<16x16xf32>
    %cst_138 = arith.constant dense<0.000000e+00> : vector<16xf32>
    %231 = vector.multi_reduction <add>, %230, %cst_138 [1] : vector<16x16xf32> to vector<16xf32>
    %232 = vector.shape_cast %231 : vector<16xf32> to vector<16x1xf32>
    %233 = tpu.reciprocal %232 {approx = true} : vector<16x1xf32> -> vector<16x1xf32>
    %234 = vector.broadcast %233 : vector<16x1xf32> to vector<16x16xf32>
    %235 = arith.mulf %230, %234 : vector<16x16xf32>
    %236 = arith.truncf %235 : vector<16x16xf32> to vector<16x16xbf16>
    %237 = arith.truncf %222 : vector<16x4xf32> to vector<16x4xbf16>
    %cst_139 = arith.constant dense<0.000000e+00> : vector<16x4xf32>
    %238 = tpu.matmul %236, %237, %cst_139 {dimension_numbers = #tpu.dot_dimension_numbers<[1], [0], [0], [1], [0, 0, 1, 1], [], []>} : vector<16x16xbf16>, vector<16x4xbf16>, vector<16x4xf32> -> vector<16x4xf32>
    %239 = arith.truncf %238 : vector<16x4xf32> to vector<16x4xbf16>
    %c0_140 = arith.constant 0 : index
    %c28 = arith.constant 28 : index
    %240 = vector.load %arg16[%c0_140, %c28] : memref<16x32xbf16, #tpu.memory_space<vmem>>, vector<16x4xbf16>
    tpu.vector_store %arg16[%c0_140, %c28], %239 {strides = array<i32>} : memref<16x32xbf16, #tpu.memory_space<vmem>>, vector<16x4xbf16>,
    %c0_141 = arith.constant 0 : index
    %c0_142 = arith.constant 0 : index
    %241 = vector.load %arg16[%c0_141, %c0_142] : memref<16x32xbf16, #tpu.memory_space<vmem>>, vector<16x32xbf16>
    %c0_143 = arith.constant 0 : index
    %c0_144 = arith.constant 0 : index
    %242 = vector.load %arg7[%c0_143, %c0_144] : memref<32x32xbf16, #tpu.memory_space<vmem>>, vector<32x32xbf16>
    %cst_145 = arith.constant dense<0.000000e+00> : vector<16x32xf32>
    %243 = tpu.matmul %241, %242, %cst_145 {dimension_numbers = #tpu.dot_dimension_numbers<[1], [0], [0], [1], [0, 0, 1, 1], [], []>} : vector<16x32xbf16>, vector<32x32xbf16>, vector<16x32xf32> -> vector<16x32xf32>
    %244 = arith.addf %1, %243 : vector<16x32xf32>
    %c0_146 = arith.constant 0 : index
    %c0_147 = arith.constant 0 : index
    %245 = vector.load %arg8[%c0_146, %c0_147] : memref<1x32xf32, #tpu.memory_space<vmem>>, vector<1x32xf32>
    %246 = vector.broadcast %245 : vector<1x32xf32> to vector<16x32xf32>
    %247 = arith.addf %244, %246 : vector<16x32xf32>
    %c0_148 = arith.constant 0 : index
    %c0_149 = arith.constant 0 : index
    %248 = vector.load %arg9[%c0_148, %c0_149] : memref<1x32xf32, #tpu.memory_space<vmem>>, vector<1x32xf32>
    %c0_150 = arith.constant 0 : index
    %c0_151 = arith.constant 0 : index
    %249 = vector.load %arg10[%c0_150, %c0_151] : memref<1x32xf32, #tpu.memory_space<vmem>>, vector<1x32xf32>
    %cst_152 = arith.constant dense<0.000000e+00> : vector<16xf32>
    %250 = vector.multi_reduction <add>, %247, %cst_152 [1] : vector<16x32xf32> to vector<16xf32>
    %251 = vector.shape_cast %250 : vector<16xf32> to vector<16x1xf32>
    %cst_153 = arith.constant 3.200000e+01 : f32
    %252 = vector.broadcast %cst_153 : f32 to vector<16x1xf32>
    %253 = arith.divf %251, %252 : vector<16x1xf32>
    %254 = vector.broadcast %253 : vector<16x1xf32> to vector<16x32xf32>
    %255 = arith.subf %247, %254 : vector<16x32xf32>
    %256 = arith.mulf %255, %255 : vector<16x32xf32>
    %cst_154 = arith.constant dense<0.000000e+00> : vector<16xf32>
    %257 = vector.multi_reduction <add>, %256, %cst_154 [1] : vector<16x32xf32> to vector<16xf32>
    %258 = vector.shape_cast %257 : vector<16xf32> to vector<16x1xf32>
    %cst_155 = arith.constant 3.200000e+01 : f32
    %259 = vector.broadcast %cst_155 : f32 to vector<16x1xf32>
    %260 = arith.divf %258, %259 : vector<16x1xf32>
    %cst_156 = arith.constant 9.99999974E-6 : f32
    %261 = vector.broadcast %cst_156 : f32 to vector<16x1xf32>
    %262 = arith.addf %260, %261 : vector<16x1xf32>
    %263 = math.rsqrt %262 : vector<16x1xf32>
    %264 = vector.broadcast %263 : vector<16x1xf32> to vector<16x32xf32>
    %265 = arith.mulf %255, %264 : vector<16x32xf32>
    %266 = vector.broadcast %248 : vector<1x32xf32> to vector<16x32xf32>
    %267 = arith.mulf %265, %266 : vector<16x32xf32>
    %268 = vector.broadcast %249 : vector<1x32xf32> to vector<16x32xf32>
    %269 = arith.addf %267, %268 : vector<16x32xf32>
    %270 = arith.truncf %269 : vector<16x32xf32> to vector<16x32xbf16>
    %c0_157 = arith.constant 0 : index
    %c0_158 = arith.constant 0 : index
    %271 = vector.load %arg11[%c0_157, %c0_158] : memref<32x128xbf16, #tpu.memory_space<vmem>>, vector<32x128xbf16>
    %cst_159 = arith.constant dense<0.000000e+00> : vector<16x128xf32>
    %272 = tpu.matmul %270, %271, %cst_159 {dimension_numbers = #tpu.dot_dimension_numbers<[1], [0], [0], [1], [0, 0, 1, 1], [], []>} : vector<16x32xbf16>, vector<32x128xbf16>, vector<16x128xf32> -> vector<16x128xf32>
    %c0_160 = arith.constant 0 : index
    %c0_161 = arith.constant 0 : index
    %273 = vector.load %arg12[%c0_160, %c0_161] : memref<1x128xf32, #tpu.memory_space<vmem>>, vector<1x128xf32>
    %274 = vector.broadcast %273 : vector<1x128xf32> to vector<16x128xf32>
    %275 = arith.addf %272, %274 : vector<16x128xf32>
    %cst_162 = arith.constant 5.000000e-01 : f32
    %276 = vector.broadcast %cst_162 : f32 to vector<16x128xf32>
    %277 = arith.mulf %276, %275 : vector<16x128xf32>
    %cst_163 = arith.constant 4.471500e-02 : f32
    %278 = vector.broadcast %cst_163 : f32 to vector<16x128xf32>
    %279 = arith.mulf %278, %275 : vector<16x128xf32>
    %280 = arith.mulf %279, %275 : vector<16x128xf32>
    %281 = arith.mulf %280, %275 : vector<16x128xf32>
    %282 = arith.addf %275, %281 : vector<16x128xf32>
    %cst_164 = arith.constant 0.797884583 : f32
    %283 = vector.broadcast %cst_164 : f32 to vector<16x128xf32>
    %284 = arith.mulf %283, %282 : vector<16x128xf32>
    %285 = math.tanh %284 : vector<16x128xf32>
    %cst_165 = arith.constant 1.000000e+00 : f32
    %286 = vector.broadcast %cst_165 : f32 to vector<16x128xf32>
    %287 = arith.addf %286, %285 : vector<16x128xf32>
    %288 = arith.mulf %277, %287 : vector<16x128xf32>
    %289 = arith.truncf %288 : vector<16x128xf32> to vector<16x128xbf16>
    %c0_166 = arith.constant 0 : index
    %c0_167 = arith.constant 0 : index
    %290 = vector.load %arg13[%c0_166, %c0_167] : memref<128x32xbf16, #tpu.memory_space<vmem>>, vector<128x32xbf16>
    %cst_168 = arith.constant dense<0.000000e+00> : vector<16x32xf32>
    %291 = tpu.matmul %289, %290, %cst_168 {dimension_numbers = #tpu.dot_dimension_numbers<[1], [0], [0], [1], [0, 0, 1, 1], [], []>} : vector<16x128xbf16>, vector<128x32xbf16>, vector<16x32xf32> -> vector<16x32xf32>
    %c0_169 = arith.constant 0 : index
    %c0_170 = arith.constant 0 : index
    %292 = vector.load %arg14[%c0_169, %c0_170] : memref<1x32xf32, #tpu.memory_space<vmem>>, vector<1x32xf32>
    %293 = vector.broadcast %292 : vector<1x32xf32> to vector<16x32xf32>
    %294 = arith.addf %291, %293 : vector<16x32xf32>
    %cst_171 = arith.constant 5.000000e-01 : f32
    %295 = vector.broadcast %cst_171 : f32 to vector<16x32xf32>
    %296 = arith.mulf %295, %294 : vector<16x32xf32>
    %cst_172 = arith.constant 4.471500e-02 : f32
    %297 = vector.broadcast %cst_172 : f32 to vector<16x32xf32>
    %298 = arith.mulf %297, %294 : vector<16x32xf32>
    %299 = arith.mulf %298, %294 : vector<16x32xf32>
    %300 = arith.mulf %299, %294 : vector<16x32xf32>
    %301 = arith.addf %294, %300 : vector<16x32xf32>
    %cst_173 = arith.constant 0.797884583 : f32
    %302 = vector.broadcast %cst_173 : f32 to vector<16x32xf32>
    %303 = arith.mulf %302, %301 : vector<16x32xf32>
    %304 = math.tanh %303 : vector<16x32xf32>
    %cst_174 = arith.constant 1.000000e+00 : f32
    %305 = vector.broadcast %cst_174 : f32 to vector<16x32xf32>
    %306 = arith.addf %305, %304 : vector<16x32xf32>
    %307 = arith.mulf %296, %306 : vector<16x32xf32>
    %308 = arith.addf %247, %307 : vector<16x32xf32>
    %c0_175 = arith.constant 0 : index
    %c0_176 = arith.constant 0 : index
    %c0_177 = arith.constant 0 : index
    %309 = vector.load %arg15[%c0_175, %c0_176, %c0_177] : memref<1x16x32xf32, #tpu.memory_space<vmem>>, vector<1x16x32xf32>
    %310 = vector.shape_cast %309 : vector<1x16x32xf32> to vector<16x32xf32>
    %311 = vector.shape_cast %308 : vector<16x32xf32> to vector<1x16x32xf32>
    tpu.vector_store %arg15[%c0_175, %c0_176, %c0_177], %311 {strides = array<i32>} : memref<1x16x32xf32, #tpu.memory_space<vmem>>, vector<1x16x32xf32>,
    return
  }
  func.func @transform_0(%arg0: i32) -> (i32, i32, i32) {
    %c0_i32 = arith.constant 0 : i32
    %c0_i32_0 = arith.constant 0 : i32
    %c0_i32_1 = arith.constant 0 : i32
    return %arg0, %c0_i32, %c0_i32_0 : i32, i32, i32
  }
  func.func @transform_1(%arg0: i32) -> (i32, i32) {
    %c0_i32 = arith.constant 0 : i32
    %c0_i32_0 = arith.constant 0 : i32
    %c0_i32_1 = arith.constant 0 : i32
    return %c0_i32, %c0_i32_0 : i32, i32
  }
  func.func @transform_2(%arg0: i32) -> (i32, i32) {
    %c0_i32 = arith.constant 0 : i32
    %c0_i32_0 = arith.constant 0 : i32
    %c0_i32_1 = arith.constant 0 : i32
    return %c0_i32, %c0_i32_0 : i32, i32
  }
  func.func @transform_3(%arg0: i32) -> (i32, i32, i32) {
    %c0_i32 = arith.constant 0 : i32
    %c0_i32_0 = arith.constant 0 : i32
    %c0_i32_1 = arith.constant 0 : i32
    %c0_i32_2 = arith.constant 0 : i32
    return %c0_i32, %c0_i32_0, %c0_i32_1 : i32, i32, i32
  }
  func.func @transform_4(%arg0: i32) -> (i32, i32, i32) {
    %c0_i32 = arith.constant 0 : i32
    %c0_i32_0 = arith.constant 0 : i32
    %c0_i32_1 = arith.constant 0 : i32
    %c0_i32_2 = arith.constant 0 : i32
    return %c0_i32, %c0_i32_0, %c0_i32_1 : i32, i32, i32
  }
  func.func @transform_5(%arg0: i32) -> (i32, i32, i32) {
    %c0_i32 = arith.constant 0 : i32
    %c0_i32_0 = arith.constant 0 : i32
    %c0_i32_1 = arith.constant 0 : i32
    %c0_i32_2 = arith.constant 0 : i32
    return %c0_i32, %c0_i32_0, %c0_i32_1 : i32, i32, i32
  }
  func.func @transform_6(%arg0: i32) -> (i32, i32) {
    %c0_i32 = arith.constant 0 : i32
    %c0_i32_0 = arith.constant 0 : i32
    %c0_i32_1 = arith.constant 0 : i32
    return %c0_i32, %c0_i32_0 : i32, i32
  }
  func.func @transform_7(%arg0: i32) -> (i32, i32) {
    %c0_i32 = arith.constant 0 : i32
    %c0_i32_0 = arith.constant 0 : i32
    %c0_i32_1 = arith.constant 0 : i32
    return %c0_i32, %c0_i32_0 : i32, i32
  }
  func.func @transform_8(%arg0: i32) -> (i32, i32) {
    %c0_i32 = arith.constant 0 : i32
    %c0_i32_0 = arith.constant 0 : i32
    %c0_i32_1 = arith.constant 0 : i32
    return %c0_i32, %c0_i32_0 : i32, i32
  }
  func.func @transform_9(%arg0: i32) -> (i32, i32) {
    %c0_i32 = arith.constant 0 : i32
    %c0_i32_0 = arith.constant 0 : i32
    %c0_i32_1 = arith.constant 0 : i32
    return %c0_i32, %c0_i32_0 : i32, i32
  }
  func.func @transform_10(%arg0: i32) -> (i32, i32) {
    %c0_i32 = arith.constant 0 : i32
    %c0_i32_0 = arith.constant 0 : i32
    %c0_i32_1 = arith.constant 0 : i32
    return %c0_i32, %c0_i32_0 : i32, i32
  }
  func.func @transform_11(%arg0: i32) -> (i32, i32) {
    %c0_i32 = arith.constant 0 : i32
    %c0_i32_0 = arith.constant 0 : i32
    %c0_i32_1 = arith.constant 0 : i32
    return %c0_i32, %c0_i32_0 : i32, i32
  }
  func.func @transform_12(%arg0: i32) -> (i32, i32) {
    %c0_i32 = arith.constant 0 : i32
    %c0_i32_0 = arith.constant 0 : i32
    %c0_i32_1 = arith.constant 0 : i32
    return %c0_i32, %c0_i32_0 : i32, i32
  }
  func.func @transform_13(%arg0: i32) -> (i32, i32) {
    %c0_i32 = arith.constant 0 : i32
    %c0_i32_0 = arith.constant 0 : i32
    %c0_i32_1 = arith.constant 0 : i32
    return %c0_i32, %c0_i32_0 : i32, i32
  }
  func.func @transform_14(%arg0: i32) -> (i32, i32, i32) {
    %c0_i32 = arith.constant 0 : i32
    %c0_i32_0 = arith.constant 0 : i32
    %c0_i32_1 = arith.constant 0 : i32
    return %arg0, %c0_i32, %c0_i32_0 : i32, i32, i32
  }
}

module attributes {stable_mosaic.version = 11 : i64} {
  func.func @_deblock_kernel(%arg0: i32, %arg1: memref<1x16x32xf32, #tpu.memory_space<vmem>>, %arg2: memref<1x32xf32, #tpu.memory_space<vmem>>, %arg3: memref<1x32xf32, #tpu.memory_space<vmem>>, %arg4: memref<8x32x4xbf16, #tpu.memory_space<vmem>>, %arg5: memref<8x32x4xbf16, #tpu.memory_space<vmem>>, %arg6: memref<8x32x4xbf16, #tpu.memory_space<vmem>>, %arg7: memref<32x32xbf16, #tpu.memory_space<vmem>>, %arg8: memref<1x32xf32, #tpu.memory_space<vmem>>, %arg9: memref<1x32xf32, #tpu.memory_space<vmem>>, %arg10: memref<1x32xf32, #tpu.memory_space<vmem>>, %arg11: memref<32x128xbf16, #tpu.memory_space<vmem>>, %arg12: memref<1x128xf32, #tpu.memory_space<vmem>>, %arg13: memref<128x32xbf16, #tpu.memory_space<vmem>>, %arg14: memref<1x32xf32, #tpu.memory_space<vmem>>, %arg15: memref<1x16x32xf32, #tpu.memory_space<vmem>>, %arg16: memref<16x32xbf16, #tpu.memory_space<vmem>>) attributes {dimension_semantics = [#tpu.dimension_semantics<parallel>], iteration_bounds = array<i64: 2>, scalar_prefetch = 0 : i64, scratch_operands = 1 : i64, tpu.core_type = #tpu.core_type<tc>, window_params = [{transform_indices = @transform_0, window_bounds = array<i64: 1, 16, 32>}, {pipeline_mode = #tpu.pipeline_mode<synchronous>, transform_indices = @transform_1, window_bounds = array<i64: 1, 32>}, {pipeline_mode = #tpu.pipeline_mode<synchronous>, transform_indices = @transform_2, window_bounds = array<i64: 1, 32>}, {pipeline_mode = #tpu.pipeline_mode<synchronous>, transform_indices = @transform_3, window_bounds = array<i64: 8, 32, 4>}, {pipeline_mode = #tpu.pipeline_mode<synchronous>, transform_indices = @transform_4, window_bounds = array<i64: 8, 32, 4>}, {pipeline_mode = #tpu.pipeline_mode<synchronous>, transform_indices = @transform_5, window_bounds = array<i64: 8, 32, 4>}, {pipeline_mode = #tpu.pipeline_mode<synchronous>, transform_indices = @transform_6, window_bounds = array<i64: 32, 32>}, {pipeline_mode = #tpu.pipeline_mode<synchronous>, transform_indices = @transform_7, window_bounds = array<i64: 1, 32>}, {pipeline_mode = #tpu.pipeline_mode<synchronous>, transform_indices = @transform_8, window_bounds = array<i64: 1, 32>}, {pipeline_mode = #tpu.pipeline_mode<synchronous>, transform_indices = @transform_9, window_bounds = array<i64: 1, 32>}, {pipeline_mode = #tpu.pipeline_mode<synchronous>, transform_indices = @transform_10, window_bounds = array<i64: 32, 128>}, {pipeline_mode = #tpu.pipeline_mode<synchronous>, transform_indices = @transform_11, window_bounds = array<i64: 1, 128>}, {pipeline_mode = #tpu.pipeline_mode<synchronous>, transform_indices = @transform_12, window_bounds = array<i64: 128, 32>}, {pipeline_mode = #tpu.pipeline_mode<synchronous>, transform_indices = @transform_13, window_bounds = array<i64: 1, 32>}, {transform_indices = @transform_14, window_bounds = array<i64: 1, 16, 32>}]} {
    %c0 = arith.constant 0 : index
    %c0_0 = arith.constant 0 : index
    %c0_1 = arith.constant 0 : index
    %0 = vector.load %arg1[%c0, %c0_0, %c0_1] : memref<1x16x32xf32, #tpu.memory_space<vmem>>, vector<1x16x32xf32>
    %1 = vector.shape_cast %0 : vector<1x16x32xf32> to vector<16x32xf32>
    %c0_2 = arith.constant 0 : index
    %c0_3 = arith.constant 0 : index
    %2 = vector.load %arg2[%c0_2, %c0_3] : memref<1x32xf32, #tpu.memory_space<vmem>>, vector<1x32xf32>
    %c0_4 = arith.constant 0 : index
    %c0_5 = arith.constant 0 : index
    %3 = vector.load %arg3[%c0_4, %c0_5] : memref<1x32xf32, #tpu.memory_space<vmem>>, vector<1x32xf32>
    %cst = arith.constant dense<0.000000e+00> : vector<16xf32>
    %4 = vector.multi_reduction <add>, %1, %cst [1] : vector<16x32xf32> to vector<16xf32>
    %5 = vector.shape_cast %4 : vector<16xf32> to vector<16x1xf32>
    %cst_6 = arith.constant 3.200000e+01 : f32
    %6 = vector.broadcast %cst_6 : f32 to vector<16x1xf32>
    %7 = arith.divf %5, %6 : vector<16x1xf32>
    %8 = vector.broadcast %7 : vector<16x1xf32> to vector<16x32xf32>
    %9 = arith.subf %1, %8 : vector<16x32xf32>
    %10 = arith.mulf %9, %9 : vector<16x32xf32>
    %cst_7 = arith.constant dense<0.000000e+00> : vector<16xf32>
    %11 = vector.multi_reduction <add>, %10, %cst_7 [1] : vector<16x32xf32> to vector<16xf32>
    %12 = vector.shape_cast %11 : vector<16xf32> to vector<16x1xf32>
    %cst_8 = arith.constant 3.200000e+01 : f32
    %13 = vector.broadcast %cst_8 : f32 to vector<16x1xf32>
    %14 = arith.divf %12, %13 : vector<16x1xf32>
    %cst_9 = arith.constant 9.99999974E-6 : f32
    %15 = vector.broadcast %cst_9 : f32 to vector<16x1xf32>
    %16 = arith.addf %14, %15 : vector<16x1xf32>
    %17 = math.rsqrt %16 : vector<16x1xf32>
    %18 = vector.broadcast %17 : vector<16x1xf32> to vector<16x32xf32>
    %19 = arith.mulf %9, %18 : vector<16x32xf32>
    %20 = vector.broadcast %2 : vector<1x32xf32> to vector<16x32xf32>
    %21 = arith.mulf %19, %20 : vector<16x32xf32>
    %22 = vector.broadcast %3 : vector<1x32xf32> to vector<16x32xf32>
    %23 = arith.addf %21, %22 : vector<16x32xf32>
    %24 = arith.truncf %23 : vector<16x32xf32> to vector<16x32xbf16>
    %c0_10 = arith.constant 0 : index
    %c0_11 = arith.constant 0 : index
    %c0_12 = arith.constant 0 : index
    %25 = vector.load %arg4[%c0_10, %c0_11, %c0_12] : memref<8x32x4xbf16, #tpu.memory_space<vmem>>, vector<1x32x4xbf16>
    %26 = vector.shape_cast %25 : vector<1x32x4xbf16> to vector<32x4xbf16>
    %cst_13 = arith.constant dense<0.000000e+00> : vector<16x4xf32>
    %27 = tpu.matmul %24, %26, %cst_13 {dimension_numbers = #tpu.dot_dimension_numbers<[1], [0], [0], [1], [0, 0, 1, 1], [], []>} : vector<16x32xbf16>, vector<32x4xbf16>, vector<16x4xf32> -> vector<16x4xf32>
    %c0_14 = arith.constant 0 : index
    %c0_15 = arith.constant 0 : index
    %c0_16 = arith.constant 0 : index
    %28 = vector.load %arg5[%c0_14, %c0_15, %c0_16] : memref<8x32x4xbf16, #tpu.memory_space<vmem>>, vector<1x32x4xbf16>
    %29 = vector.shape_cast %28 : vector<1x32x4xbf16> to vector<32x4xbf16>
    %cst_17 = arith.constant dense<0.000000e+00> : vector<16x4xf32>
    %30 = tpu.matmul %24, %29, %cst_17 {dimension_numbers = #tpu.dot_dimension_numbers<[1], [0], [0], [1], [0, 0, 1, 1], [], []>} : vector<16x32xbf16>, vector<32x4xbf16>, vector<16x4xf32> -> vector<16x4xf32>
    %c0_18 = arith.constant 0 : index
    %c0_19 = arith.constant 0 : index
    %c0_20 = arith.constant 0 : index
    %31 = vector.load %arg6[%c0_18, %c0_19, %c0_20] : memref<8x32x4xbf16, #tpu.memory_space<vmem>>, vector<1x32x4xbf16>
    %32 = vector.shape_cast %31 : vector<1x32x4xbf16> to vector<32x4xbf16>
    %cst_21 = arith.constant dense<0.000000e+00> : vector<16x4xf32>
    %33 = tpu.matmul %24, %32, %cst_21 {dimension_numbers = #tpu.dot_dimension_numbers<[1], [0], [0], [1], [0, 0, 1, 1], [], []>} : vector<16x32xbf16>, vector<32x4xbf16>, vector<16x4xf32> -> vector<16x4xf32>
    %34 = arith.truncf %27 : vector<16x4xf32> to vector<16x4xbf16>
    %35 = arith.truncf %30 : vector<16x4xf32> to vector<16x4xbf16>
    %cst_22 = arith.constant dense<0.000000e+00> : vector<16x16xf32>
    %36 = tpu.matmul %34, %35, %cst_22 {dimension_numbers = #tpu.dot_dimension_numbers<[1], [1], [0], [0], [0, 0, 1, 0], [], []>} : vector<16x4xbf16>, vector<16x4xbf16>, vector<16x16xf32> -> vector<16x16xf32>
    %cst_23 = arith.constant dense<0xFF800000> : vector<16xf32>
    %37 = vector.multi_reduction <maximumf>, %36, %cst_23 [1] : vector<16x16xf32> to vector<16xf32>
    %38 = vector.shape_cast %37 : vector<16xf32> to vector<16x1xf32>
    %39 = vector.broadcast %38 : vector<16x1xf32> to vector<16x16xf32>
    %40 = arith.subf %36, %39 : vector<16x16xf32>
    %41 = math.exp %40 : vector<16x16xf32>
    %cst_24 = arith.constant dense<0.000000e+00> : vector<16xf32>
    %42 = vector.multi_reduction <add>, %41, %cst_24 [1] : vector<16x16xf32> to vector<16xf32>
    %43 = vector.shape_cast %42 : vector<16xf32> to vector<16x1xf32>
    %44 = tpu.reciprocal %43 {approx = true} : vector<16x1xf32> -> vector<16x1xf32>
    %45 = vector.broadcast %44 : vector<16x1xf32> to vector<16x16xf32>
    %46 = arith.mulf %41, %45 : vector<16x16xf32>
    %47 = arith.truncf %46 : vector<16x16xf32> to vector<16x16xbf16>
    %48 = arith.truncf %33 : vector<16x4xf32> to vector<16x4xbf16>
    %cst_25 = arith.constant dense<0.000000e+00> : vector<16x4xf32>
    %49 = tpu.matmul %47, %48, %cst_25 {dimension_numbers = #tpu.dot_dimension_numbers<[1], [0], [0], [1], [0, 0, 1, 1], [], []>} : vector<16x16xbf16>, vector<16x4xbf16>, vector<16x4xf32> -> vector<16x4xf32>
    %50 = arith.truncf %49 : vector<16x4xf32> to vector<16x4xbf16>
    %c0_26 = arith.constant 0 : index
    %c0_27 = arith.constant 0 : index
    %51 = vector.load %arg16[%c0_26, %c0_27] : memref<16x32xbf16, #tpu.memory_space<vmem>>, vector<16x4xbf16>
    tpu.vector_store %arg16[%c0_26, %c0_27], %50 {strides = array<i32>} : memref<16x32xbf16, #tpu.memory_space<vmem>>, vector<16x4xbf16>,
    %c1 = arith.constant 1 : index
    %c0_28 = arith.constant 0 : index
    %c0_29 = arith.constant 0 : index
    %52 = vector.load %arg4[%c1, %c0_28, %c0_29] : memref<8x32x4xbf16, #tpu.memory_space<vmem>>, vector<1x32x4xbf16>
    %53 = vector.shape_cast %52 : vector<1x32x4xbf16> to vector<32x4xbf16>
    %cst_30 = arith.constant dense<0.000000e+00> : vector<16x4xf32>
    %54 = tpu.matmul %24, %53, %cst_30 {dimension_numbers = #tpu.dot_dimension_numbers<[1], [0], [0], [1], [0, 0, 1, 1], [], []>} : vector<16x32xbf16>, vector<32x4xbf16>, vector<16x4xf32> -> vector<16x4xf32>
    %c1_31 = arith.constant 1 : index
    %c0_32 = arith.constant 0 : index
    %c0_33 = arith.constant 0 : index
    %55 = vector.load %arg5[%c1_31, %c0_32, %c0_33] : memref<8x32x4xbf16, #tpu.memory_space<vmem>>, vector<1x32x4xbf16>
    %56 = vector.shape_cast %55 : vector<1x32x4xbf16> to vector<32x4xbf16>
    %cst_34 = arith.constant dense<0.000000e+00> : vector<16x4xf32>
    %57 = tpu.matmul %24, %56, %cst_34 {dimension_numbers = #tpu.dot_dimension_numbers<[1], [0], [0], [1], [0, 0, 1, 1], [], []>} : vector<16x32xbf16>, vector<32x4xbf16>, vector<16x4xf32> -> vector<16x4xf32>
    %c1_35 = arith.constant 1 : index
    %c0_36 = arith.constant 0 : index
    %c0_37 = arith.constant 0 : index
    %58 = vector.load %arg6[%c1_35, %c0_36, %c0_37] : memref<8x32x4xbf16, #tpu.memory_space<vmem>>, vector<1x32x4xbf16>
    %59 = vector.shape_cast %58 : vector<1x32x4xbf16> to vector<32x4xbf16>
    %cst_38 = arith.constant dense<0.000000e+00> : vector<16x4xf32>
    %60 = tpu.matmul %24, %59, %cst_38 {dimension_numbers = #tpu.dot_dimension_numbers<[1], [0], [0], [1], [0, 0, 1, 1], [], []>} : vector<16x32xbf16>, vector<32x4xbf16>, vector<16x4xf32> -> vector<16x4xf32>
    %61 = arith.truncf %54 : vector<16x4xf32> to vector<16x4xbf16>
    %62 = arith.truncf %57 : vector<16x4xf32> to vector<16x4xbf16>
    %cst_39 = arith.constant dense<0.000000e+00> : vector<16x16xf32>
    %63 = tpu.matmul %61, %62, %cst_39 {dimension_numbers = #tpu.dot_dimension_numbers<[1], [1], [0], [0], [0, 0, 1, 0], [], []>} : vector<16x4xbf16>, vector<16x4xbf16>, vector<16x16xf32> -> vector<16x16xf32>
    %cst_40 = arith.constant dense<0xFF800000> : vector<16xf32>
    %64 = vector.multi_reduction <maximumf>, %63, %cst_40 [1] : vector<16x16xf32> to vector<16xf32>
    %65 = vector.shape_cast %64 : vector<16xf32> to vector<16x1xf32>
    %66 = vector.broadcast %65 : vector<16x1xf32> to vector<16x16xf32>
    %67 = arith.subf %63, %66 : vector<16x16xf32>
    %68 = math.exp %67 : vector<16x16xf32>
    %cst_41 = arith.constant dense<0.000000e+00> : vector<16xf32>
    %69 = vector.multi_reduction <add>, %68, %cst_41 [1] : vector<16x16xf32> to vector<16xf32>
    %70 = vector.shape_cast %69 : vector<16xf32> to vector<16x1xf32>
    %71 = tpu.reciprocal %70 {approx = true} : vector<16x1xf32> -> vector<16x1xf32>
    %72 = vector.broadcast %71 : vector<16x1xf32> to vector<16x16xf32>
    %73 = arith.mulf %68, %72 : vector<16x16xf32>
    %74 = arith.truncf %73 : vector<16x16xf32> to vector<16x16xbf16>
    %75 = arith.truncf %60 : vector<16x4xf32> to vector<16x4xbf16>
    %cst_42 = arith.constant dense<0.000000e+00> : vector<16x4xf32>
    %76 = tpu.matmul %74, %75, %cst_42 {dimension_numbers = #tpu.dot_dimension_numbers<[1], [0], [0], [1], [0, 0, 1, 1], [], []>} : vector<16x16xbf16>, vector<16x4xbf16>, vector<16x4xf32> -> vector<16x4xf32>
    %77 = arith.truncf %76 : vector<16x4xf32> to vector<16x4xbf16>
    %c0_43 = arith.constant 0 : index
    %c4 = arith.constant 4 : index
    %78 = vector.load %arg16[%c0_43, %c4] : memref<16x32xbf16, #tpu.memory_space<vmem>>, vector<16x4xbf16>
    tpu.vector_store %arg16[%c0_43, %c4], %77 {strides = array<i32>} : memref<16x32xbf16, #tpu.memory_space<vmem>>, vector<16x4xbf16>,
    %c2 = arith.constant 2 : index
    %c0_44 = arith.constant 0 : index
    %c0_45 = arith.constant 0 : index
    %79 = vector.load %arg4[%c2, %c0_44, %c0_45] : memref<8x32x4xbf16, #tpu.memory_space<vmem>>, vector<1x32x4xbf16>
    %80 = vector.shape_cast %79 : vector<1x32x4xbf16> to vector<32x4xbf16>
    %cst_46 = arith.constant dense<0.000000e+00> : vector<16x4xf32>
    %81 = tpu.matmul %24, %80, %cst_46 {dimension_numbers = #tpu.dot_dimension_numbers<[1], [0], [0], [1], [0, 0, 1, 1], [], []>} : vector<16x32xbf16>, vector<32x4xbf16>, vector<16x4xf32> -> vector<16x4xf32>
    %c2_47 = arith.constant 2 : index
    %c0_48 = arith.constant 0 : index
    %c0_49 = arith.constant 0 : index
    %82 = vector.load %arg5[%c2_47, %c0_48, %c0_49] : memref<8x32x4xbf16, #tpu.memory_space<vmem>>, vector<1x32x4xbf16>
    %83 = vector.shape_cast %82 : vector<1x32x4xbf16> to vector<32x4xbf16>
    %cst_50 = arith.constant dense<0.000000e+00> : vector<16x4xf32>
    %84 = tpu.matmul %24, %83, %cst_50 {dimension_numbers = #tpu.dot_dimension_numbers<[1], [0], [0], [1], [0, 0, 1, 1], [], []>} : vector<16x32xbf16>, vector<32x4xbf16>, vector<16x4xf32> -> vector<16x4xf32>
    %c2_51 = arith.constant 2 : index
    %c0_52 = arith.constant 0 : index
    %c0_53 = arith.constant 0 : index
    %85 = vector.load %arg6[%c2_51, %c0_52, %c0_53] : memref<8x32x4xbf16, #tpu.memory_space<vmem>>, vector<1x32x4xbf16>
    %86 = vector.shape_cast %85 : vector<1x32x4xbf16> to vector<32x4xbf16>
    %cst_54 = arith.constant dense<0.000000e+00> : vector<16x4xf32>
    %87 = tpu.matmul %24, %86, %cst_54 {dimension_numbers = #tpu.dot_dimension_numbers<[1], [0], [0], [1], [0, 0, 1, 1], [], []>} : vector<16x32xbf16>, vector<32x4xbf16>, vector<16x4xf32> -> vector<16x4xf32>
    %88 = arith.truncf %81 : vector<16x4xf32> to vector<16x4xbf16>
    %89 = arith.truncf %84 : vector<16x4xf32> to vector<16x4xbf16>
    %cst_55 = arith.constant dense<0.000000e+00> : vector<16x16xf32>
    %90 = tpu.matmul %88, %89, %cst_55 {dimension_numbers = #tpu.dot_dimension_numbers<[1], [1], [0], [0], [0, 0, 1, 0], [], []>} : vector<16x4xbf16>, vector<16x4xbf16>, vector<16x16xf32> -> vector<16x16xf32>
    %cst_56 = arith.constant dense<0xFF800000> : vector<16xf32>
    %91 = vector.multi_reduction <maximumf>, %90, %cst_56 [1] : vector<16x16xf32> to vector<16xf32>
    %92 = vector.shape_cast %91 : vector<16xf32> to vector<16x1xf32>
    %93 = vector.broadcast %92 : vector<16x1xf32> to vector<16x16xf32>
    %94 = arith.subf %90, %93 : vector<16x16xf32>
    %95 = math.exp %94 : vector<16x16xf32>
    %cst_57 = arith.constant dense<0.000000e+00> : vector<16xf32>
    %96 = vector.multi_reduction <add>, %95, %cst_57 [1] : vector<16x16xf32> to vector<16xf32>
    %97 = vector.shape_cast %96 : vector<16xf32> to vector<16x1xf32>
    %98 = tpu.reciprocal %97 {approx = true} : vector<16x1xf32> -> vector<16x1xf32>
    %99 = vector.broadcast %98 : vector<16x1xf32> to vector<16x16xf32>
    %100 = arith.mulf %95, %99 : vector<16x16xf32>
    %101 = arith.truncf %100 : vector<16x16xf32> to vector<16x16xbf16>
    %102 = arith.truncf %87 : vector<16x4xf32> to vector<16x4xbf16>
    %cst_58 = arith.constant dense<0.000000e+00> : vector<16x4xf32>
    %103 = tpu.matmul %101, %102, %cst_58 {dimension_numbers = #tpu.dot_dimension_numbers<[1], [0], [0], [1], [0, 0, 1, 1], [], []>} : vector<16x16xbf16>, vector<16x4xbf16>, vector<16x4xf32> -> vector<16x4xf32>
    %104 = arith.truncf %103 : vector<16x4xf32> to vector<16x4xbf16>
    %c0_59 = arith.constant 0 : index
    %c8 = arith.constant 8 : index
    %105 = vector.load %arg16[%c0_59, %c8] : memref<16x32xbf16, #tpu.memory_space<vmem>>, vector<16x4xbf16>
    tpu.vector_store %arg16[%c0_59, %c8], %104 {strides = array<i32>} : memref<16x32xbf16, #tpu.memory_space<vmem>>, vector<16x4xbf16>,
    %c3 = arith.constant 3 : index
    %c0_60 = arith.constant 0 : index
    %c0_61 = arith.constant 0 : index
    %106 = vector.load %arg4[%c3, %c0_60, %c0_61] : memref<8x32x4xbf16, #tpu.memory_space<vmem>>, vector<1x32x4xbf16>
    %107 = vector.shape_cast %106 : vector<1x32x4xbf16> to vector<32x4xbf16>
    %cst_62 = arith.constant dense<0.000000e+00> : vector<16x4xf32>
    %108 = tpu.matmul %24, %107, %cst_62 {dimension_numbers = #tpu.dot_dimension_numbers<[1], [0], [0], [1], [0, 0, 1, 1], [], []>} : vector<16x32xbf16>, vector<32x4xbf16>, vector<16x4xf32> -> vector<16x4xf32>
    %c3_63 = arith.constant 3 : index
    %c0_64 = arith.constant 0 : index
    %c0_65 = arith.constant 0 : index
    %109 = vector.load %arg5[%c3_63, %c0_64, %c0_65] : memref<8x32x4xbf16, #tpu.memory_space<vmem>>, vector<1x32x4xbf16>
    %110 = vector.shape_cast %109 : vector<1x32x4xbf16> to vector<32x4xbf16>
    %cst_66 = arith.constant dense<0.000000e+00> : vector<16x4xf32>
    %111 = tpu.matmul %24, %110, %cst_66 {dimension_numbers = #tpu.dot_dimension_numbers<[1], [0], [0], [1], [0, 0, 1, 1], [], []>} : vector<16x32xbf16>, vector<32x4xbf16>, vector<16x4xf32> -> vector<16x4xf32>
    %c3_67 = arith.constant 3 : index
    %c0_68 = arith.constant 0 : index
    %c0_69 = arith.constant 0 : index
    %112 = vector.load %arg6[%c3_67, %c0_68, %c0_69] : memref<8x32x4xbf16, #tpu.memory_space<vmem>>, vector<1x32x4xbf16>
    %113 = vector.shape_cast %112 : vector<1x32x4xbf16> to vector<32x4xbf16>
    %cst_70 = arith.constant dense<0.000000e+00> : vector<16x4xf32>
    %114 = tpu.matmul %24, %113, %cst_70 {dimension_numbers = #tpu.dot_dimension_numbers<[1], [0], [0], [1], [0, 0, 1, 1], [], []>} : vector<16x32xbf16>, vector<32x4xbf16>, vector<16x4xf32> -> vector<16x4xf32>
    %115 = arith.truncf %108 : vector<16x4xf32> to vector<16x4xbf16>
    %116 = arith.truncf %111 : vector<16x4xf32> to vector<16x4xbf16>
    %cst_71 = arith.constant dense<0.000000e+00> : vector<16x16xf32>
    %117 = tpu.matmul %115, %116, %cst_71 {dimension_numbers = #tpu.dot_dimension_numbers<[1], [1], [0], [0], [0, 0, 1, 0], [], []>} : vector<16x4xbf16>, vector<16x4xbf16>, vector<16x16xf32> -> vector<16x16xf32>
    %cst_72 = arith.constant dense<0xFF800000> : vector<16xf32>
    %118 = vector.multi_reduction <maximumf>, %117, %cst_72 [1] : vector<16x16xf32> to vector<16xf32>
    %119 = vector.shape_cast %118 : vector<16xf32> to vector<16x1xf32>
    %120 = vector.broadcast %119 : vector<16x1xf32> to vector<16x16xf32>
    %121 = arith.subf %117, %120 : vector<16x16xf32>
    %122 = math.exp %121 : vector<16x16xf32>
    %cst_73 = arith.constant dense<0.000000e+00> : vector<16xf32>
    %123 = vector.multi_reduction <add>, %122, %cst_73 [1] : vector<16x16xf32> to vector<16xf32>
    %124 = vector.shape_cast %123 : vector<16xf32> to vector<16x1xf32>
    %125 = tpu.reciprocal %124 {approx = true} : vector<16x1xf32> -> vector<16x1xf32>
    %126 = vector.broadcast %125 : vector<16x1xf32> to vector<16x16xf32>
    %127 = arith.mulf %122, %126 : vector<16x16xf32>
    %128 = arith.truncf %127 : vector<16x16xf32> to vector<16x16xbf16>
    %129 = arith.truncf %114 : vector<16x4xf32> to vector<16x4xbf16>
    %cst_74 = arith.constant dense<0.000000e+00> : vector<16x4xf32>
    %130 = tpu.matmul %128, %129, %cst_74 {dimension_numbers = #tpu.dot_dimension_numbers<[1], [0], [0], [1], [0, 0, 1, 1], [], []>} : vector<16x16xbf16>, vector<16x4xbf16>, vector<16x4xf32> -> vector<16x4xf32>
    %131 = arith.truncf %130 : vector<16x4xf32> to vector<16x4xbf16>
    %c0_75 = arith.constant 0 : index
    %c12 = arith.constant 12 : index
    %132 = vector.load %arg16[%c0_75, %c12] : memref<16x32xbf16, #tpu.memory_space<vmem>>, vector<16x4xbf16>
    tpu.vector_store %arg16[%c0_75, %c12], %131 {strides = array<i32>} : memref<16x32xbf16, #tpu.memory_space<vmem>>, vector<16x4xbf16>,
    %c4_76 = arith.constant 4 : index
    %c0_77 = arith.constant 0 : index
    %c0_78 = arith.constant 0 : index
    %133 = vector.load %arg4[%c4_76, %c0_77, %c0_78] : memref<8x32x4xbf16, #tpu.memory_space<vmem>>, vector<1x32x4xbf16>
    %134 = vector.shape_cast %133 : vector<1x32x4xbf16> to vector<32x4xbf16>
    %cst_79 = arith.constant dense<0.000000e+00> : vector<16x4xf32>
    %135 = tpu.matmul %24, %134, %cst_79 {dimension_numbers = #tpu.dot_dimension_numbers<[1], [0], [0], [1], [0, 0, 1, 1], [], []>} : vector<16x32xbf16>, vector<32x4xbf16>, vector<16x4xf32> -> vector<16x4xf32>
    %c4_80 = arith.constant 4 : index
    %c0_81 = arith.constant 0 : index
    %c0_82 = arith.constant 0 : index
    %136 = vector.load %arg5[%c4_80, %c0_81, %c0_82] : memref<8x32x4xbf16, #tpu.memory_space<vmem>>, vector<1x32x4xbf16>
    %137 = vector.shape_cast %136 : vector<1x32x4xbf16> to vector<32x4xbf16>
    %cst_83 = arith.constant dense<0.000000e+00> : vector<16x4xf32>
    %138 = tpu.matmul %24, %137, %cst_83 {dimension_numbers = #tpu.dot_dimension_numbers<[1], [0], [0], [1], [0, 0, 1, 1], [], []>} : vector<16x32xbf16>, vector<32x4xbf16>, vector<16x4xf32> -> vector<16x4xf32>
    %c4_84 = arith.constant 4 : index
    %c0_85 = arith.constant 0 : index
    %c0_86 = arith.constant 0 : index
    %139 = vector.load %arg6[%c4_84, %c0_85, %c0_86] : memref<8x32x4xbf16, #tpu.memory_space<vmem>>, vector<1x32x4xbf16>
    %140 = vector.shape_cast %139 : vector<1x32x4xbf16> to vector<32x4xbf16>
    %cst_87 = arith.constant dense<0.000000e+00> : vector<16x4xf32>
    %141 = tpu.matmul %24, %140, %cst_87 {dimension_numbers = #tpu.dot_dimension_numbers<[1], [0], [0], [1], [0, 0, 1, 1], [], []>} : vector<16x32xbf16>, vector<32x4xbf16>, vector<16x4xf32> -> vector<16x4xf32>
    %142 = arith.truncf %135 : vector<16x4xf32> to vector<16x4xbf16>
    %143 = arith.truncf %138 : vector<16x4xf32> to vector<16x4xbf16>
    %cst_88 = arith.constant dense<0.000000e+00> : vector<16x16xf32>
    %144 = tpu.matmul %142, %143, %cst_88 {dimension_numbers = #tpu.dot_dimension_numbers<[1], [1], [0], [0], [0, 0, 1, 0], [], []>} : vector<16x4xbf16>, vector<16x4xbf16>, vector<16x16xf32> -> vector<16x16xf32>
    %cst_89 = arith.constant dense<0xFF800000> : vector<16xf32>
    %145 = vector.multi_reduction <maximumf>, %144, %cst_89 [1] : vector<16x16xf32> to vector<16xf32>
    %146 = vector.shape_cast %145 : vector<16xf32> to vector<16x1xf32>
    %147 = vector.broadcast %146 : vector<16x1xf32> to vector<16x16xf32>
    %148 = arith.subf %144, %147 : vector<16x16xf32>
    %149 = math.exp %148 : vector<16x16xf32>
    %cst_90 = arith.constant dense<0.000000e+00> : vector<16xf32>
    %150 = vector.multi_reduction <add>, %149, %cst_90 [1] : vector<16x16xf32> to vector<16xf32>
    %151 = vector.shape_cast %150 : vector<16xf32> to vector<16x1xf32>
    %152 = tpu.reciprocal %151 {approx = true} : vector<16x1xf32> -> vector<16x1xf32>
    %153 = vector.broadcast %152 : vector<16x1xf32> to vector<16x16xf32>
    %154 = arith.mulf %149, %153 : vector<16x16xf32>
    %155 = arith.truncf %154 : vector<16x16xf32> to vector<16x16xbf16>
    %156 = arith.truncf %141 : vector<16x4xf32> to vector<16x4xbf16>
    %cst_91 = arith.constant dense<0.000000e+00> : vector<16x4xf32>
    %157 = tpu.matmul %155, %156, %cst_91 {dimension_numbers = #tpu.dot_dimension_numbers<[1], [0], [0], [1], [0, 0, 1, 1], [], []>} : vector<16x16xbf16>, vector<16x4xbf16>, vector<16x4xf32> -> vector<16x4xf32>
    %158 = arith.truncf %157 : vector<16x4xf32> to vector<16x4xbf16>
    %c0_92 = arith.constant 0 : index
    %c16 = arith.constant 16 : index
    %159 = vector.load %arg16[%c0_92, %c16] : memref<16x32xbf16, #tpu.memory_space<vmem>>, vector<16x4xbf16>
    tpu.vector_store %arg16[%c0_92, %c16], %158 {strides = array<i32>} : memref<16x32xbf16, #tpu.memory_space<vmem>>, vector<16x4xbf16>,
    %c5 = arith.constant 5 : index
    %c0_93 = arith.constant 0 : index
    %c0_94 = arith.constant 0 : index
    %160 = vector.load %arg4[%c5, %c0_93, %c0_94] : memref<8x32x4xbf16, #tpu.memory_space<vmem>>, vector<1x32x4xbf16>
    %161 = vector.shape_cast %160 : vector<1x32x4xbf16> to vector<32x4xbf16>
    %cst_95 = arith.constant dense<0.000000e+00> : vector<16x4xf32>
    %162 = tpu.matmul %24, %161, %cst_95 {dimension_numbers = #tpu.dot_dimension_numbers<[1], [0], [0], [1], [0, 0, 1, 1], [], []>} : vector<16x32xbf16>, vector<32x4xbf16>, vector<16x4xf32> -> vector<16x4xf32>
    %c5_96 = arith.constant 5 : index
    %c0_97 = arith.constant 0 : index
    %c0_98 = arith.constant 0 : index
    %163 = vector.load %arg5[%c5_96, %c0_97, %c0_98] : memref<8x32x4xbf16, #tpu.memory_space<vmem>>, vector<1x32x4xbf16>
    %164 = vector.shape_cast %163 : vector<1x32x4xbf16> to vector<32x4xbf16>
    %cst_99 = arith.constant dense<0.000000e+00> : vector<16x4xf32>
    %165 = tpu.matmul %24, %164, %cst_99 {dimension_numbers = #tpu.dot_dimension_numbers<[1], [0], [0], [1], [0, 0, 1, 1], [], []>} : vector<16x32xbf16>, vector<32x4xbf16>, vector<16x4xf32> -> vector<16x4xf32>
    %c5_100 = arith.constant 5 : index
    %c0_101 = arith.constant 0 : index
    %c0_102 = arith.constant 0 : index
    %166 = vector.load %arg6[%c5_100, %c0_101, %c0_102] : memref<8x32x4xbf16, #tpu.memory_space<vmem>>, vector<1x32x4xbf16>
    %167 = vector.shape_cast %166 : vector<1x32x4xbf16> to vector<32x4xbf16>
    %cst_103 = arith.constant dense<0.000000e+00> : vector<16x4xf32>
    %168 = tpu.matmul %24, %167, %cst_103 {dimension_numbers = #tpu.dot_dimension_numbers<[1], [0], [0], [1], [0, 0, 1, 1], [], []>} : vector<16x32xbf16>, vector<32x4xbf16>, vector<16x4xf32> -> vector<16x4xf32>
    %169 = arith.truncf %162 : vector<16x4xf32> to vector<16x4xbf16>
    %170 = arith.truncf %165 : vector<16x4xf32> to vector<16x4xbf16>
    %cst_104 = arith.constant dense<0.000000e+00> : vector<16x16xf32>
    %171 = tpu.matmul %169, %170, %cst_104 {dimension_numbers = #tpu.dot_dimension_numbers<[1], [1], [0], [0], [0, 0, 1, 0], [], []>} : vector<16x4xbf16>, vector<16x4xbf16>, vector<16x16xf32> -> vector<16x16xf32>
    %cst_105 = arith.constant dense<0xFF800000> : vector<16xf32>
    %172 = vector.multi_reduction <maximumf>, %171, %cst_105 [1] : vector<16x16xf32> to vector<16xf32>
    %173 = vector.shape_cast %172 : vector<16xf32> to vector<16x1xf32>
    %174 = vector.broadcast %173 : vector<16x1xf32> to vector<16x16xf32>
    %175 = arith.subf %171, %174 : vector<16x16xf32>
    %176 = math.exp %175 : vector<16x16xf32>
    %cst_106 = arith.constant dense<0.000000e+00> : vector<16xf32>
    %177 = vector.multi_reduction <add>, %176, %cst_106 [1] : vector<16x16xf32> to vector<16xf32>
    %178 = vector.shape_cast %177 : vector<16xf32> to vector<16x1xf32>
    %179 = tpu.reciprocal %178 {approx = true} : vector<16x1xf32> -> vector<16x1xf32>
    %180 = vector.broadcast %179 : vector<16x1xf32> to vector<16x16xf32>
    %181 = arith.mulf %176, %180 : vector<16x16xf32>
    %182 = arith.truncf %181 : vector<16x16xf32> to vector<16x16xbf16>
    %183 = arith.truncf %168 : vector<16x4xf32> to vector<16x4xbf16>
    %cst_107 = arith.constant dense<0.000000e+00> : vector<16x4xf32>
    %184 = tpu.matmul %182, %183, %cst_107 {dimension_numbers = #tpu.dot_dimension_numbers<[1], [0], [0], [1], [0, 0, 1, 1], [], []>} : vector<16x16xbf16>, vector<16x4xbf16>, vector<16x4xf32> -> vector<16x4xf32>
    %185 = arith.truncf %184 : vector<16x4xf32> to vector<16x4xbf16>
    %c0_108 = arith.constant 0 : index
    %c20 = arith.constant 20 : index
    %186 = vector.load %arg16[%c0_108, %c20] : memref<16x32xbf16, #tpu.memory_space<vmem>>, vector<16x4xbf16>
    tpu.vector_store %arg16[%c0_108, %c20], %185 {strides = array<i32>} : memref<16x32xbf16, #tpu.memory_space<vmem>>, vector<16x4xbf16>,
    %c6 = arith.constant 6 : index
    %c0_109 = arith.constant 0 : index
    %c0_110 = arith.constant 0 : index
    %187 = vector.load %arg4[%c6, %c0_109, %c0_110] : memref<8x32x4xbf16, #tpu.memory_space<vmem>>, vector<1x32x4xbf16>
    %188 = vector.shape_cast %187 : vector<1x32x4xbf16> to vector<32x4xbf16>
    %cst_111 = arith.constant dense<0.000000e+00> : vector<16x4xf32>
    %189 = tpu.matmul %24, %188, %cst_111 {dimension_numbers = #tpu.dot_dimension_numbers<[1], [0], [0], [1], [0, 0, 1, 1], [], []>} : vector<16x32xbf16>, vector<32x4xbf16>, vector<16x4xf32> -> vector<16x4xf32>
    %c6_112 = arith.constant 6 : index
    %c0_113 = arith.constant 0 : index
    %c0_114 = arith.constant 0 : index
    %190 = vector.load %arg5[%c6_112, %c0_113, %c0_114] : memref<8x32x4xbf16, #tpu.memory_space<vmem>>, vector<1x32x4xbf16>
    %191 = vector.shape_cast %190 : vector<1x32x4xbf16> to vector<32x4xbf16>
    %cst_115 = arith.constant dense<0.000000e+00> : vector<16x4xf32>
    %192 = tpu.matmul %24, %191, %cst_115 {dimension_numbers = #tpu.dot_dimension_numbers<[1], [0], [0], [1], [0, 0, 1, 1], [], []>} : vector<16x32xbf16>, vector<32x4xbf16>, vector<16x4xf32> -> vector<16x4xf32>
    %c6_116 = arith.constant 6 : index
    %c0_117 = arith.constant 0 : index
    %c0_118 = arith.constant 0 : index
    %193 = vector.load %arg6[%c6_116, %c0_117, %c0_118] : memref<8x32x4xbf16, #tpu.memory_space<vmem>>, vector<1x32x4xbf16>
    %194 = vector.shape_cast %193 : vector<1x32x4xbf16> to vector<32x4xbf16>
    %cst_119 = arith.constant dense<0.000000e+00> : vector<16x4xf32>
    %195 = tpu.matmul %24, %194, %cst_119 {dimension_numbers = #tpu.dot_dimension_numbers<[1], [0], [0], [1], [0, 0, 1, 1], [], []>} : vector<16x32xbf16>, vector<32x4xbf16>, vector<16x4xf32> -> vector<16x4xf32>
    %196 = arith.truncf %189 : vector<16x4xf32> to vector<16x4xbf16>
    %197 = arith.truncf %192 : vector<16x4xf32> to vector<16x4xbf16>
    %cst_120 = arith.constant dense<0.000000e+00> : vector<16x16xf32>
    %198 = tpu.matmul %196, %197, %cst_120 {dimension_numbers = #tpu.dot_dimension_numbers<[1], [1], [0], [0], [0, 0, 1, 0], [], []>} : vector<16x4xbf16>, vector<16x4xbf16>, vector<16x16xf32> -> vector<16x16xf32>
    %cst_121 = arith.constant dense<0xFF800000> : vector<16xf32>
    %199 = vector.multi_reduction <maximumf>, %198, %cst_121 [1] : vector<16x16xf32> to vector<16xf32>
    %200 = vector.shape_cast %199 : vector<16xf32> to vector<16x1xf32>
    %201 = vector.broadcast %200 : vector<16x1xf32> to vector<16x16xf32>
    %202 = arith.subf %198, %201 : vector<16x16xf32>
    %203 = math.exp %202 : vector<16x16xf32>
    %cst_122 = arith.constant dense<0.000000e+00> : vector<16xf32>
    %204 = vector.multi_reduction <add>, %203, %cst_122 [1] : vector<16x16xf32> to vector<16xf32>
    %205 = vector.shape_cast %204 : vector<16xf32> to vector<16x1xf32>
    %206 = tpu.reciprocal %205 {approx = true} : vector<16x1xf32> -> vector<16x1xf32>
    %207 = vector.broadcast %206 : vector<16x1xf32> to vector<16x16xf32>
    %208 = arith.mulf %203, %207 : vector<16x16xf32>
    %209 = arith.truncf %208 : vector<16x16xf32> to vector<16x16xbf16>
    %210 = arith.truncf %195 : vector<16x4xf32> to vector<16x4xbf16>
    %cst_123 = arith.constant dense<0.000000e+00> : vector<16x4xf32>
    %211 = tpu.matmul %209, %210, %cst_123 {dimension_numbers = #tpu.dot_dimension_numbers<[1], [0], [0], [1], [0, 0, 1, 1], [], []>} : vector<16x16xbf16>, vector<16x4xbf16>, vector<16x4xf32> -> vector<16x4xf32>
    %212 = arith.truncf %211 : vector<16x4xf32> to vector<16x4xbf16>
    %c0_124 = arith.constant 0 : index
    %c24 = arith.constant 24 : index
    %213 = vector.load %arg16[%c0_124, %c24] : memref<16x32xbf16, #tpu.memory_space<vmem>>, vector<16x4xbf16>
    tpu.vector_store %arg16[%c0_124, %c24], %212 {strides = array<i32>} : memref<16x32xbf16, #tpu.memory_space<vmem>>, vector<16x4xbf16>,
    %c7 = arith.constant 7 : index
    %c0_125 = arith.constant 0 : index
    %c0_126 = arith.constant 0 : index
    %214 = vector.load %arg4[%c7, %c0_125, %c0_126] : memref<8x32x4xbf16, #tpu.memory_space<vmem>>, vector<1x32x4xbf16>
    %215 = vector.shape_cast %214 : vector<1x32x4xbf16> to vector<32x4xbf16>
    %cst_127 = arith.constant dense<0.000000e+00> : vector<16x4xf32>
    %216 = tpu.matmul %24, %215, %cst_127 {dimension_numbers = #tpu.dot_dimension_numbers<[1], [0], [0], [1], [0, 0, 1, 1], [], []>} : vector<16x32xbf16>, vector<32x4xbf16>, vector<16x4xf32> -> vector<16x4xf32>
    %c7_128 = arith.constant 7 : index
    %c0_129 = arith.constant 0 : index
    %c0_130 = arith.constant 0 : index
    %217 = vector.load %arg5[%c7_128, %c0_129, %c0_130] : memref<8x32x4xbf16, #tpu.memory_space<vmem>>, vector<1x32x4xbf16>
    %218 = vector.shape_cast %217 : vector<1x32x4xbf16> to vector<32x4xbf16>
    %cst_131 = arith.constant dense<0.000000e+00> : vector<16x4xf32>
    %219 = tpu.matmul %24, %218, %cst_131 {dimension_numbers = #tpu.dot_dimension_numbers<[1], [0], [0], [1], [0, 0, 1, 1], [], []>} : vector<16x32xbf16>, vector<32x4xbf16>, vector<16x4xf32> -> vector<16x4xf32>
    %c7_132 = arith.constant 7 : index
    %c0_133 = arith.constant 0 : index
    %c0_134 = arith.constant 0 : index
    %220 = vector.load %arg6[%c7_132, %c0_133, %c0_134] : memref<8x32x4xbf16, #tpu.memory_space<vmem>>, vector<1x32x4xbf16>
    %221 = vector.shape_cast %220 : vector<1x32x4xbf16> to vector<32x4xbf16>
    %cst_135 = arith.constant dense<0.000000e+00> : vector<16x4xf32>
    %222 = tpu.matmul %24, %221, %cst_135 {dimension_numbers = #tpu.dot_dimension_numbers<[1], [0], [0], [1], [0, 0, 1, 1], [], []>} : vector<16x32xbf16>, vector<32x4xbf16>, vector<16x4xf32> -> vector<16x4xf32>
    %223 = arith.truncf %216 : vector<16x4xf32> to vector<16x4xbf16>
    %224 = arith.truncf %219 : vector<16x4xf32> to vector<16x4xbf16>
    %cst_136 = arith.constant dense<0.000000e+00> : vector<16x16xf32>
    %225 = tpu.matmul %223, %224, %cst_136 {dimension_numbers = #tpu.dot_dimension_numbers<[1], [1], [0], [0], [0, 0, 1, 0], [], []>} : vector<16x4xbf16>, vector<16x4xbf16>, vector<16x16xf32> -> vector<16x16xf32>
    %cst_137 = arith.constant dense<0xFF800000> : vector<16xf32>
    %226 = vector.multi_reduction <maximumf>, %225, %cst_137 [1] : vector<16x16xf32> to vector<16xf32>
    %227 = vector.shape_cast %226 : vector<16xf32> to vector<16x1xf32>
    %228 = vector.broadcast %227 : vector<16x1xf32> to vector<16x16xf32>
    %229 = arith.subf %225, %228 : vector<16x16xf32>
    %230 = math.exp %229 : vector<16x16xf32>
    %cst_138 = arith.constant dense<0.000000e+00> : vector<16xf32>
    %231 = vector.multi_reduction <add>, %230, %cst_138 [1] : vector<16x16xf32> to vector<16xf32>
    %232 = vector.shape_cast %231 : vector<16xf32> to vector<16x1xf32>
    %233 = tpu.reciprocal %232 {approx = true} : vector<16x1xf32> -> vector<16x1xf32>
    %234 = vector.broadcast %233 : vector<16x1xf32> to vector<16x16xf32>
    %235 = arith.mulf %230, %234 : vector<16x16xf32>
    %236 = arith.truncf %235 : vector<16x16xf32> to vector<16x16xbf16>
    %237 = arith.truncf %222 : vector<16x4xf32> to vector<16x4xbf16>
    %cst_139 = arith.constant dense<0.000000e+00> : vector<16x4xf32>
    %238 = tpu.matmul %236, %237, %cst_139 {dimension_numbers = #tpu.dot_dimension_numbers<[1], [0], [0], [1], [0, 0, 1, 1], [], []>} : vector<16x16xbf16>, vector<16x4xbf16>, vector<16x4xf32> -> vector<16x4xf32>
    %239 = arith.truncf %238 : vector<16x4xf32> to vector<16x4xbf16>
    %c0_140 = arith.constant 0 : index
    %c28 = arith.constant 28 : index
    %240 = vector.load %arg16[%c0_140, %c28] : memref<16x32xbf16, #tpu.memory_space<vmem>>, vector<16x4xbf16>
    tpu.vector_store %arg16[%c0_140, %c28], %239 {strides = array<i32>} : memref<16x32xbf16, #tpu.memory_space<vmem>>, vector<16x4xbf16>,
    %c0_141 = arith.constant 0 : index
    %c0_142 = arith.constant 0 : index
    %241 = vector.load %arg16[%c0_141, %c0_142] : memref<16x32xbf16, #tpu.memory_space<vmem>>, vector<16x32xbf16>
    %c0_143 = arith.constant 0 : index
    %c0_144 = arith.constant 0 : index
    %242 = vector.load %arg7[%c0_143, %c0_144] : memref<32x32xbf16, #tpu.memory_space<vmem>>, vector<32x32xbf16>
    %cst_145 = arith.constant dense<0.000000e+00> : vector<16x32xf32>
    %243 = tpu.matmul %241, %242, %cst_145 {dimension_numbers = #tpu.dot_dimension_numbers<[1], [0], [0], [1], [0, 0, 1, 1], [], []>} : vector<16x32xbf16>, vector<32x32xbf16>, vector<16x32xf32> -> vector<16x32xf32>
    %244 = arith.addf %1, %243 : vector<16x32xf32>
    %c0_146 = arith.constant 0 : index
    %c0_147 = arith.constant 0 : index
    %245 = vector.load %arg8[%c0_146, %c0_147] : memref<1x32xf32, #tpu.memory_space<vmem>>, vector<1x32xf32>
    %246 = vector.broadcast %245 : vector<1x32xf32> to vector<16x32xf32>
    %247 = arith.addf %244, %246 : vector<16x32xf32>
    %c0_148 = arith.constant 0 : index
    %c0_149 = arith.constant 0 : index
    %248 = vector.load %arg9[%c0_148, %c0_149] : memref<1x32xf32, #tpu.memory_space<vmem>>, vector<1x32xf32>
    %c0_150 = arith.constant 0 : index
    %c0_151 = arith.constant 0 : index
    %249 = vector.load %arg10[%c0_150, %c0_151] : memref<1x32xf32, #tpu.memory_space<vmem>>, vector<1x32xf32>
    %cst_152 = arith.constant dense<0.000000e+00> : vector<16xf32>
    %250 = vector.multi_reduction <add>, %247, %cst_152 [1] : vector<16x32xf32> to vector<16xf32>
    %251 = vector.shape_cast %250 : vector<16xf32> to vector<16x1xf32>
    %cst_153 = arith.constant 3.200000e+01 : f32
    %252 = vector.broadcast %cst_153 : f32 to vector<16x1xf32>
    %253 = arith.divf %251, %252 : vector<16x1xf32>
    %254 = vector.broadcast %253 : vector<16x1xf32> to vector<16x32xf32>
    %255 = arith.subf %247, %254 : vector<16x32xf32>
    %256 = arith.mulf %255, %255 : vector<16x32xf32>
    %cst_154 = arith.constant dense<0.000000e+00> : vector<16xf32>
    %257 = vector.multi_reduction <add>, %256, %cst_154 [1] : vector<16x32xf32> to vector<16xf32>
    %258 = vector.shape_cast %257 : vector<16xf32> to vector<16x1xf32>
    %cst_155 = arith.constant 3.200000e+01 : f32
    %259 = vector.broadcast %cst_155 : f32 to vector<16x1xf32>
    %260 = arith.divf %258, %259 : vector<16x1xf32>
    %cst_156 = arith.constant 9.99999974E-6 : f32
    %261 = vector.broadcast %cst_156 : f32 to vector<16x1xf32>
    %262 = arith.addf %260, %261 : vector<16x1xf32>
    %263 = math.rsqrt %262 : vector<16x1xf32>
    %264 = vector.broadcast %263 : vector<16x1xf32> to vector<16x32xf32>
    %265 = arith.mulf %255, %264 : vector<16x32xf32>
    %266 = vector.broadcast %248 : vector<1x32xf32> to vector<16x32xf32>
    %267 = arith.mulf %265, %266 : vector<16x32xf32>
    %268 = vector.broadcast %249 : vector<1x32xf32> to vector<16x32xf32>
    %269 = arith.addf %267, %268 : vector<16x32xf32>
    %270 = arith.truncf %269 : vector<16x32xf32> to vector<16x32xbf16>
    %c0_157 = arith.constant 0 : index
    %c0_158 = arith.constant 0 : index
    %271 = vector.load %arg11[%c0_157, %c0_158] : memref<32x128xbf16, #tpu.memory_space<vmem>>, vector<32x128xbf16>
    %cst_159 = arith.constant dense<0.000000e+00> : vector<16x128xf32>
    %272 = tpu.matmul %270, %271, %cst_159 {dimension_numbers = #tpu.dot_dimension_numbers<[1], [0], [0], [1], [0, 0, 1, 1], [], []>} : vector<16x32xbf16>, vector<32x128xbf16>, vector<16x128xf32> -> vector<16x128xf32>
    %c0_160 = arith.constant 0 : index
    %c0_161 = arith.constant 0 : index
    %273 = vector.load %arg12[%c0_160, %c0_161] : memref<1x128xf32, #tpu.memory_space<vmem>>, vector<1x128xf32>
    %274 = vector.broadcast %273 : vector<1x128xf32> to vector<16x128xf32>
    %275 = arith.addf %272, %274 : vector<16x128xf32>
    %cst_162 = arith.constant 5.000000e-01 : f32
    %276 = vector.broadcast %cst_162 : f32 to vector<16x128xf32>
    %277 = arith.mulf %276, %275 : vector<16x128xf32>
    %cst_163 = arith.constant 4.471500e-02 : f32
    %278 = vector.broadcast %cst_163 : f32 to vector<16x128xf32>
    %279 = arith.mulf %278, %275 : vector<16x128xf32>
    %280 = arith.mulf %279, %275 : vector<16x128xf32>
    %281 = arith.mulf %280, %275 : vector<16x128xf32>
    %282 = arith.addf %275, %281 : vector<16x128xf32>
    %cst_164 = arith.constant 0.797884583 : f32
    %283 = vector.broadcast %cst_164 : f32 to vector<16x128xf32>
    %284 = arith.mulf %283, %282 : vector<16x128xf32>
    %285 = math.tanh %284 : vector<16x128xf32>
    %cst_165 = arith.constant 1.000000e+00 : f32
    %286 = vector.broadcast %cst_165 : f32 to vector<16x128xf32>
    %287 = arith.addf %286, %285 : vector<16x128xf32>
    %288 = arith.mulf %277, %287 : vector<16x128xf32>
    %289 = arith.truncf %288 : vector<16x128xf32> to vector<16x128xbf16>
    %c0_166 = arith.constant 0 : index
    %c0_167 = arith.constant 0 : index
    %290 = vector.load %arg13[%c0_166, %c0_167] : memref<128x32xbf16, #tpu.memory_space<vmem>>, vector<128x32xbf16>
    %cst_168 = arith.constant dense<0.000000e+00> : vector<16x32xf32>
    %291 = tpu.matmul %289, %290, %cst_168 {dimension_numbers = #tpu.dot_dimension_numbers<[1], [0], [0], [1], [0, 0, 1, 1], [], []>} : vector<16x128xbf16>, vector<128x32xbf16>, vector<16x32xf32> -> vector<16x32xf32>
    %c0_169 = arith.constant 0 : index
    %c0_170 = arith.constant 0 : index
    %292 = vector.load %arg14[%c0_169, %c0_170] : memref<1x32xf32, #tpu.memory_space<vmem>>, vector<1x32xf32>
    %293 = vector.broadcast %292 : vector<1x32xf32> to vector<16x32xf32>
    %294 = arith.addf %291, %293 : vector<16x32xf32>
    %cst_171 = arith.constant 5.000000e-01 : f32
    %295 = vector.broadcast %cst_171 : f32 to vector<16x32xf32>
    %296 = arith.mulf %295, %294 : vector<16x32xf32>
    %cst_172 = arith.constant 4.471500e-02 : f32
    %297 = vector.broadcast %cst_172 : f32 to vector<16x32xf32>
    %298 = arith.mulf %297, %294 : vector<16x32xf32>
    %299 = arith.mulf %298, %294 : vector<16x32xf32>
    %300 = arith.mulf %299, %294 : vector<16x32xf32>
    %301 = arith.addf %294, %300 : vector<16x32xf32>
    %cst_173 = arith.constant 0.797884583 : f32
    %302 = vector.broadcast %cst_173 : f32 to vector<16x32xf32>
    %303 = arith.mulf %302, %301 : vector<16x32xf32>
    %304 = math.tanh %303 : vector<16x32xf32>
    %cst_174 = arith.constant 1.000000e+00 : f32
    %305 = vector.broadcast %cst_174 : f32 to vector<16x32xf32>
    %306 = arith.addf %305, %304 : vector<16x32xf32>
    %307 = arith.mulf %296, %306 : vector<16x32xf32>
    %308 = arith.addf %247, %307 : vector<16x32xf32>
    %c0_175 = arith.constant 0 : index
    %c0_176 = arith.constant 0 : index
    %c0_177 = arith.constant 0 : index
    %309 = vector.load %arg15[%c0_175, %c0_176, %c0_177] : memref<1x16x32xf32, #tpu.memory_space<vmem>>, vector<1x16x32xf32>
    %310 = vector.shape_cast %309 : vector<1x16x32xf32> to vector<16x32xf32>
    %311 = vector.shape_cast %308 : vector<16x32xf32> to vector<1x16x32xf32>
    tpu.vector_store %arg15[%c0_175, %c0_176, %c0_177], %311 {strides = array<i32>} : memref<1x16x32xf32, #tpu.memory_space<vmem>>, vector<1x16x32xf32>,
    return
  }
  func.func @transform_0(%arg0: i32) -> (i32, i32, i32) {
    %c0_i32 = arith.constant 0 : i32
    %c0_i32_0 = arith.constant 0 : i32
    %c0_i32_1 = arith.constant 0 : i32
    return %arg0, %c0_i32, %c0_i32_0 : i32, i32, i32
  }
  func.func @transform_1(%arg0: i32) -> (i32, i32) {
    %c0_i32 = arith.constant 0 : i32
    %c0_i32_0 = arith.constant 0 : i32
    %c0_i32_1 = arith.constant 0 : i32
    return %c0_i32, %c0_i32_0 : i32, i32
  }
  func.func @transform_2(%arg0: i32) -> (i32, i32) {
    %c0_i32 = arith.constant 0 : i32
    %c0_i32_0 = arith.constant 0 : i32
    %c0_i32_1 = arith.constant 0 : i32
    return %c0_i32, %c0_i32_0 : i32, i32
  }
  func.func @transform_3(%arg0: i32) -> (i32, i32, i32) {
    %c0_i32 = arith.constant 0 : i32
    %c0_i32_0 = arith.constant 0 : i32
    %c0_i32_1 = arith.constant 0 : i32
    %c0_i32_2 = arith.constant 0 : i32
    return %c0_i32, %c0_i32_0, %c0_i32_1 : i32, i32, i32
  }
  func.func @transform_4(%arg0: i32) -> (i32, i32, i32) {
    %c0_i32 = arith.constant 0 : i32
    %c0_i32_0 = arith.constant 0 : i32
    %c0_i32_1 = arith.constant 0 : i32
    %c0_i32_2 = arith.constant 0 : i32
    return %c0_i32, %c0_i32_0, %c0_i32_1 : i32, i32, i32
  }
  func.func @transform_5(%arg0: i32) -> (i32, i32, i32) {
    %c0_i32 = arith.constant 0 : i32
    %c0_i32_0 = arith.constant 0 : i32
    %c0_i32_1 = arith.constant 0 : i32
    %c0_i32_2 = arith.constant 0 : i32
    return %c0_i32, %c0_i32_0, %c0_i32_1 : i32, i32, i32
  }
  func.func @transform_6(%arg0: i32) -> (i32, i32) {
    %c0_i32 = arith.constant 0 : i32
    %c0_i32_0 = arith.constant 0 : i32
    %c0_i32_1 = arith.constant 0 : i32
    return %c0_i32, %c0_i32_0 : i32, i32
  }
  func.func @transform_7(%arg0: i32) -> (i32, i32) {
    %c0_i32 = arith.constant 0 : i32
    %c0_i32_0 = arith.constant 0 : i32
    %c0_i32_1 = arith.constant 0 : i32
    return %c0_i32, %c0_i32_0 : i32, i32
  }
  func.func @transform_8(%arg0: i32) -> (i32, i32) {
    %c0_i32 = arith.constant 0 : i32
    %c0_i32_0 = arith.constant 0 : i32
    %c0_i32_1 = arith.constant 0 : i32
    return %c0_i32, %c0_i32_0 : i32, i32
  }
  func.func @transform_9(%arg0: i32) -> (i32, i32) {
    %c0_i32 = arith.constant 0 : i32
    %c0_i32_0 = arith.constant 0 : i32
    %c0_i32_1 = arith.constant 0 : i32
    return %c0_i32, %c0_i32_0 : i32, i32
  }
  func.func @transform_10(%arg0: i32) -> (i32, i32) {
    %c0_i32 = arith.constant 0 : i32
    %c0_i32_0 = arith.constant 0 : i32
    %c0_i32_1 = arith.constant 0 : i32
    return %c0_i32, %c0_i32_0 : i32, i32
  }
  func.func @transform_11(%arg0: i32) -> (i32, i32) {
    %c0_i32 = arith.constant 0 : i32
    %c0_i32_0 = arith.constant 0 : i32
    %c0_i32_1 = arith.constant 0 : i32
    return %c0_i32, %c0_i32_0 : i32, i32
  }
  func.func @transform_12(%arg0: i32) -> (i32, i32) {
    %c0_i32 = arith.constant 0 : i32
    %c0_i32_0 = arith.constant 0 : i32
    %c0_i32_1 = arith.constant 0 : i32
    return %c0_i32, %c0_i32_0 : i32, i32
  }
  func.func @transform_13(%arg0: i32) -> (i32, i32) {
    %c0_i32 = arith.constant 0 : i32
    %c0_i32_0 = arith.constant 0 : i32
    %c0_i32_1 = arith.constant 0 : i32
    return %c0_i32, %c0_i32_0 : i32, i32
  }
  func.func @transform_14(%arg0: i32) -> (i32, i32, i32) {
    %c0_i32 = arith.constant 0 : i32
    %c0_i32_0 = arith.constant 0 : i32
    %c0_i32_1 = arith.constant 0 : i32
    return %arg0, %c0_i32, %c0_i32_0 : i32, i32, i32
  }
}

</mosaic_0001>

<bundles_post_ra>
// kernel: tpu_custom_call.1
= control target key start
LH: loop header
LB: loop body
LE: loop exit
PB: predicated region body
PF: predicated region fallthrough
CT: control target
= control target key end

     0   :  { %s4949_s0 = inlined_call_operand.vmem [shape: f32[2,16,32], index: 0, kind: input, shape index: {}]   ;;  %s4950_s1 = inlined_call_operand.vmem [shape: f32[1,32], index: 1, kind: input, shape index: {}]   ;;  %s4951_s2 = inlined_call_operand.vmem [shape: f32[1,32], index: 2, kind: input, shape index: {}]   ;;  %s4952_s3 = inlined_call_operand.vmem [shape: bf16[8,32,4], index: 3, kind: input, shape index: {}]   ;;  %s4953_s4 = inlined_call_operand.vmem [shape: bf16[8,32,4], index: 4, kind: input, shape index: {}]   ;;  %s4954_s5 = inlined_call_operand.vmem [shape: bf16[8,32,4], index: 5, kind: input, shape index: {}]   ;;  %s4955_s6 = inlined_call_operand.vmem [shape: bf16[32,32], index: 6, kind: input, shape index: {}]   ;;  %s4956_s7 = inlined_call_operand.vmem [shape: f32[1,32], index: 7, kind: input, shape index: {}]   ;;  %s4957_s8 = inlined_call_operand.vmem [shape: f32[1,32], index: 8, kind: input, shape index: {}]   ;;  %s4958_s9 = inlined_call_operand.vmem [shape: f32[1,32], index: 9, kind: input, shape index: {}]   ;;  %s4959_s10 = inlined_call_operand.vmem [shape: bf16[32,128], index: 10, kind: input, shape index: {}]   ;;  %s4960_s11 = inlined_call_operand.vmem [shape: f32[1,128], index: 11, kind: input, shape index: {}]   ;;  %s4961_s12 = inlined_call_operand.vmem [shape: bf16[128,32], index: 12, kind: input, shape index: {}]   ;;  %s4962_s13 = inlined_call_operand.vmem [shape: f32[1,32], index: 13, kind: input, shape index: {}]   ;;  %s4963_s14 = inlined_call_operand.hbm [shape: f32[2,16,32], index: 14, kind: output, shape index: {}]  }
   0x1   :  { %4965 = sst [smem:[#allocation6_spill]] %s4949_s0 }
   0x2   :  { %4966 = sst [smem:[#allocation7_spill]] %s4950_s1 }
   0x3   :  { %4967 = sst [smem:[#allocation8_spill]] %s4951_s2 }
   0x4   :  { %19 = vsyncpa [#allocation4], 0 }
   0x5   :  { %21 = vsyncpa [#allocation4 + $0x1], 0  ;;  %s4301_s29 = smov 0   ;;  %s4303_s30 = smov 0  }
   0x6   :  { %s4305_s15 = smov 0   ;;  %s4307_s16 = smov 0  }
   0x7 LB: > { %s4322_s17 = sadd.s32 4294967295, %s4213_s16   ;;  %s3310_s18 = sadd.s32 4294967294, %s4213_s16   ;;  %s4213_s16 = sphi %s4307_s16, %s4977_s16   ;;  %s4209_s15 = sphi %s4305_s15, %s4976_s15   ;;  %s4205_s30 = sphi %s4303_s30, %s4975_s30   ;;  %s4201_s29 = sphi %s4301_s29, %s4974_s29  }
   0x8   : > { %s4326_s19 = sadd.s32 1, %s4213_s16   ;;  %s333_s20 = sadd.s32 1, %s4209_s15 }
   0x9   : > { %s330_s21 = ssub.s32 %s4213_s16, %s4326_s19  ;;  %p343_p0 = scmp.ne.s32.totalorder %s4209_s15, %s4205_s30 }
   0xa   : > { %p331_p1 = scmp.eq.s32.totalorder %s330_s21, 0  ;;  %p344_p2 = scmp.eq.s32.totalorder %s4322_s17, 1 }
   0xb   : > { %p349_p3 = scmp.ne.s32.totalorder %s4205_s30, %s4201_s29  ;;  %p350_p4 = scmp.eq.s32.totalorder %s3310_s18, 1 }
   0xc   : > { %s4337_s22 = scalar_select %p331_p1, %s4209_s15, %s333_s20  }
   0xd   : > { %p4339_p5 = por %p344_p2, %p343_p0  ;;  %p4343_p6 = por %p350_p4, %p349_p3 }
   0xe   : > { %p3313_p7 = scmp.ge.s32.totalorder %s4213_s16, 1  ;;  %p415_p8 = scmp.lt.s32.totalorder %s4213_s16, 3 }
  0x10   : > { %p416_p9 = pnand %p3313_p7, %p415_p8 }
  0x11   : > { %p461_p10 = scmp.lt.s32.totalorder (!%p416_p9), %s4322_s17, 1  ;;  %vm471_vm0 = vcmask (!%p416_p9), 261120   ;;  %s4970_s0 = sld [smem:[#allocation6_spill]] (!%p416_p9)  ;;  %v4009_v14 = vld [vmem:[%s4952_s3] sm:$0xff] (!%p416_p9)   ;;  %v4215_v15 = vmov (!%p416_p9), 0.0   ;;  %v4010_v16 = vld [vmem:[%s4952_s3 + $0x8] sm:$0xff] (!%p416_p9)  }
  0x12   : > { %419 = sbr.rel (%p416_p9) target bundleno = 7820 (0x1e8c), region = 76  ;;  %3636 = vmatprep.subr.bf16.mxu1 (!%p416_p9), %v4215_v15  ;;  %3666 = vmatprep.subr.bf16.mxu0 (!%p416_p9), %v4215_v15  ;;  %vm4216_vm1 = vmmov (!%p416_p9), 0   ;;  %s4971_s1 = sld [smem:[#allocation7_spill]] (!%p416_p9)  ;;  %v4011_v33 = vld [vmem:[%s4953_s4] sm:$0xff] (!%p416_p9)   ;;  %v4012_v35 = vld [vmem:[%s4953_s4 + $0x8] sm:$0xff] (!%p416_p9)   ;;  %vm692_vm2 = vcmask (!%p416_p9), 31744  }
  0x13   : > { %3637 = vmatpush3.bf16.msra.mxu1 (!%p416_p9), %v4009_v14  ;;  %3640 = vmatprep.mubr.msk.bf16.mxu1 (!%p416_p9), %vm4216_vm1, %v4215_v15  ;;  %s4972_s2 = sld [smem:[#allocation8_spill]] (!%p416_p9)  ;;  %v4013_v36 = vld [vmem:[%s4954_s5] sm:$0xff] (!%p416_p9)   ;;  %v4014_v37 = vld [vmem:[%s4954_s5 + $0x8] sm:$0xff] (!%p416_p9)   ;;  %v4015_v52 = vld [vmem:[%s4952_s3 + $0x10] sm:$0xff] (!%p416_p9)   ;;  %vm740_vm3 = vcmask (!%p416_p9), 130048   ;;  %s4964_s27 = smov (!%p416_p9), 8  }
  0x14   : > { %3638 = vmatprep.subr.bf16.mxu1 (!%p416_p9), %v4215_v15  ;;  %3668 = vmatprep.mubr.msk.bf16.mxu0 (!%p416_p9), %vm4216_vm1, %v4215_v15  ;;  %v4016_v55 = vld [vmem:[%s4952_s3 + $0x18] sm:$0xff] (!%p416_p9)   ;;  %v4017_v56 = vld [vmem:[%s4954_s5 + $0x10] sm:$0xff] (!%p416_p9)   ;;  %s4218_s28 = smov (!%p416_p9), 4   ;;  %s4219_s20 = smov (!%p416_p9), 12   ;;  %vm1107_vm4 = vcmask (!%p416_p9), 64544   ;;  %vm1405_vm5 = vcmask (!%p416_p9), 97344  }
  0x15   : > { %v4018_v57 = vld [vmem:[%s4954_s5 + $0x18] sm:$0xff] (!%p416_p9)   ;;  %s4220_s21 = smov (!%p416_p9), 20   ;;  %vm1703_vm6 = vcmask (!%p416_p9), 130144   ;;  %vm2001_vm7 = vcmask (!%p416_p9), 162944   ;;  %vm2299_vm8 = vcmask (!%p416_p9), 195744   ;;  %vm2597_vm9 = vcmask (!%p416_p9), 228544  }
  0x16   : > { %vm2895_vm10 = vcmask (!%p416_p9), 261344  }
  0x17   : > { %3639 = vmatpush3.bf16.msra.mxu1 (!%p416_p9), %v4010_v16 }
  0x18   : > { %3644 = vmatprep.subr.bf16.mxu1 (!%p416_p9), %v4215_v15  ;;  %v3317_v25 = vld [vmem:[%s4971_s1] ss:$0 sm:$0xff] (!%p416_p9) }
  0x19   : > { %s462_s25 = scalar_select %p461_p10, %s4322_s17, 1  ;;  %v3318_v29 = vld [vmem:[%s4972_s2] ss:$0 sm:$0xff] }
  0x1b   : > { %s3515_s26 = sshll.u32 %s462_s25, 4  ;;  %s4221_s25 = smov 16  }
  0x1c   : > { %s4354_s18 = scalar_lea.vmem %s4970_s0, %s3515_s26  ;;  %s4222_s26 = smov 24  }
  0x1d   : > { %v467_v0 = vld [vmem:[%s4354_s18] sm:$0xff]  ;;  %v468_v1 = vld [vmem:[%s4354_s18 + $0x8] sm:$0xff] }
  0x1e   : > { %v472_v2 = vsel %vm471_vm0, %v467_v0, 0.0  ;;  %v475_v3 = vsel %vm471_vm0, %v468_v1, 0.0 }
  0x1f   : > { %473 = vadd.xlane.f32.xlu0 %v472_v2 }
  0x23   : > { %476 = vadd.xlane.f32.xlu0 %v475_v3 }
  0xac   : > { %v474_v4 = vpop.xlane.xlu0 %473 }
  0xad   : > { %v479_v5 = vmul.f32 0.03125, %v474_v4 }
  0xaf   : > { %v481_v6 = vsub.f32 %v467_v0, %v479_v5 }
  0xb0   : > { %v477_v7 = vpop.xlane.xlu0 %476 }
  0xb1   : > { %v480_v8 = vmul.f32 0.03125, %v477_v7  ;;  %v483_v9 = vmul.f32 %v481_v6, %v481_v6 }
  0xb3   : > { %v482_v10 = vsub.f32 %v468_v1, %v480_v8  ;;  %v485_v11 = vsel %vm471_vm0, %v483_v9, 0.0 }
  0xb4   : > { %486 = vadd.xlane.f32.xlu1 %v485_v11 }
  0xb5   : > { %v484_v12 = vmul.f32 %v482_v10, %v482_v10 }
  0xb7   : > { %v488_v13 = vsel %vm471_vm0, %v484_v12, 0.0 }
  0xb8   : > { %489 = vadd.xlane.f32.xlu1 %v488_v13 }
 0x141   : > { %v487_v17 = vpop.xlane.xlu1 %486 }
 0x142   : > { %v491_v18 = vmul.f32 0.03125, %v487_v17 }
 0x144   : > { %v493_v19 = vadd.f32 1e-05, %v491_v18 }
 0x145   : > { %v490_v20 = vpop.xlane.xlu1 %489 }
 0x146   : > { %4069 = vrsqrt.f32 %v493_v19  ;;  %v492_v21 = vmul.f32 0.03125, %v490_v20 }
 0x148   : > { %v494_v22 = vadd.f32 1e-05, %v492_v21 }
 0x14a   : > { %4071 = vrsqrt.f32 %v494_v22 }
 0x150   : > { %v4070_v23 = vpop.eup %4069 }
 0x151   : > { %v497_v24 = vmul.f32 %v4070_v23, %v481_v6 }
 0x153   : > { %v505_v27 = vmul.f32 %v3317_v25, %v497_v24 }
 0x154   : > { %v4072_v26 = vpop.eup %4071 }
 0x155   : > { %v498_v28 = vmul.f32 %v4072_v26, %v482_v10  ;;  %v513_v31 = vadd.f32 %v3318_v29, %v505_v27  ;;  %v4019_v27 = vld [vmem:[%s4953_s4 + $0x10] sm:$0xff]  }
 0x157   : > { %v506_v30 = vmul.f32 %v3317_v25, %v498_v28 }
 0x159   : > { %v514_v32 = vadd.f32 %v3318_v29, %v506_v30  ;;  %v4020_v29 = vld [vmem:[%s4953_s4 + $0x18] sm:$0xff]  }
 0x15b   : > { %v4385_v34 = vpack.c.bf16 %v514_v32, %v513_v31 }
 0x15d   : > { %3641 = vmatmul.mubr.msk.bf16.vlgmr.msra.gmra.mrb[0].mxu1 %vm471_vm0, %v4385_v34 }
 0x15e   : > { %3645 = vmatpush3.bf16.msra.mxu1 %v4011_v33  ;;  %3648 = vmatprep.mubr.msk.bf16.mxu1 %vm4216_vm1, %v4215_v15 }
 0x15f   : > { %3646 = vmatprep.subr.bf16.mxu1 %v4215_v15 }
 0x162   : > { %3647 = vmatpush3.bf16.msra.mxu1 %v4012_v35 }
 0x163   : > { %3652 = vmatprep.subr.bf16.mxu1 %v4215_v15 }
 0x165   : > { %3649 = vmatmul.mubr.msk.bf16.vlgmr.msra.gmra.mrb[4].mxu1 %vm471_vm0, %v4385_v34 }
 0x166   : > { %3653 = vmatpush3.bf16.msra.mxu1 %v4013_v36  ;;  %3656 = vmatprep.mubr.msk.bf16.mxu1 %vm4216_vm1, %v4215_v15 }
 0x167   : > { %3654 = vmatprep.subr.bf16.mxu1 %v4215_v15 }
 0x16a   : > { %3655 = vmatpush3.bf16.msra.mxu1 %v4014_v37 }
 0x16b   : > { %3660 = vmatprep.subr.bf16.mxu1 %v4215_v15 }
 0x16d   : > { %3657 = vmatmul.mubr.msk.bf16.vlgmr.msra.gmra.mrb[8].mxu1 %vm471_vm0, %v4385_v34 }
 0x16e   : > { %3662 = vmatprep.mubr.msk.bf16.mxu1 %vm4216_vm1, %v4215_v15 }
 0x230   : > { %v569_v38 = vpop.f32.mrb[0].mxu1 }
 0x231   : > { %v3642_v39 = vpop.f32.mrb[1].mxu1 }
 0x232   : > { %v572_v40 = vpop.f32.mrb[2].mxu1 }
 0x233   : > { %v690_v41 = vpack.c.bf16 %v572_v40, %v569_v38  ;;  %v3643_v42 = vpop.f32.mrb[3].mxu1 }
 0x234   : > { %v4021_v42 = vld [vmem:[%s4952_s3 + $0x20] sm:$0xff]  }
 0x238   : > { %v626_v43 = vpop.f32.mrb[4].mxu1 }
 0x239   : > { %v3650_v44 = vpop.f32.mrb[5].mxu1 }
 0x23a   : > { %v629_v45 = vpop.f32.mrb[6].mxu1  ;;  %v4023_v44 = vld [vmem:[%s4954_s5 + $0x20] sm:$0xff]  }
 0x23b   : > { %v691_v46 = vpack.c.bf16 %v629_v45, %v626_v43  ;;  %v3651_v47 = vpop.f32.mrb[7].mxu1  ;;  %v4022_v43 = vld [vmem:[%s4952_s3 + $0x28] sm:$0xff]  }
 0x23c   : > { %v4024_v45 = vld [vmem:[%s4954_s5 + $0x28] sm:$0xff]  }
 0x23d   : > { %v697_v48 = vsel %vm692_vm2, %v691_v46, 0 }
 0x23e   : > { %3661 = vmatpush3.bf16.xpose.msra.mxu1 %v697_v48 }
 0x23f   : > { %3672 = vmatprep.subr.bf16.mxu1 %v4215_v15 }
 0x240   : > { %v683_v49 = vpop.f32.mrb[8].mxu1 }
 0x241   : > { %v3658_v50 = vpop.f32.mrb[9].mxu1 }
 0x242   : > { %v686_v51 = vpop.f32.mrb[10].mxu1 }
 0x243   : > { %v764_v53 = vpack.c.bf16 %v686_v51, %v683_v49  ;;  %v3659_v54 = vpop.f32.mrb[11].mxu1 }
 0x245   : > { %3663 = vmatmul.mubr.msk.bf16.vlgmr.msra.gmra.mrb[12].mxu1 %vm692_vm2, %v690_v41  ;;  %3667 = vmatpush3.bf16.msra.mxu0 %v764_v53 }
 0x246   : > { %3673 = vmatpush3.bf16.msra.mxu1 %v4015_v52  ;;  %3676 = vmatprep.mubr.msk.bf16.mxu1 %vm4216_vm1, %v4215_v15 }
 0x247   : > { %3674 = vmatprep.subr.bf16.mxu1 %v4215_v15  ;;  %3680 = vmatprep.subr.bf16.mxu0 %v4215_v15 }
 0x24a   : > { %3675 = vmatpush3.bf16.msra.mxu1 %v4016_v55 }
 0x24b   : > { %3688 = vmatprep.subr.bf16.mxu1 %v4215_v15 }
 0x24d   : > { %3677 = vmatmul.mubr.msk.bf16.vlgmr.msra.gmra.mrb[16].mxu1 %vm471_vm0, %v4385_v34 }
 0x24e   : > { %3689 = vmatpush3.bf16.msra.mxu1 %v4017_v56  ;;  %3692 = vmatprep.mubr.msk.bf16.mxu1 %vm4216_vm1, %v4215_v15 }
 0x24f   : > { %3690 = vmatprep.subr.bf16.mxu1 %v4215_v15 }
 0x252   : > { %3691 = vmatpush3.bf16.msra.mxu1 %v4018_v57 }
 0x253   : > { %3702 = vmatprep.subr.bf16.mxu1 %v4215_v15 }
 0x255   : > { %3693 = vmatmul.mubr.msk.bf16.vlgmr.msra.gmra.mrb[20].mxu1 %vm471_vm0, %v4385_v34 }
 0x256   : > { %3704 = vmatprep.mubr.msk.bf16.mxu1 %vm4216_vm1, %v4215_v15 }
 0x318   : > { %v733_v58 = vpop.f32.mrb[12].mxu1 }
 0x319   : > { %v3664_v59 = vpop.f32.mrb[13].mxu1  ;;  %v741_v60 = vsel %vm740_vm3, %v733_v58, -inf }
 0x31a   : > { %742 = vmax.xlane.f32.xlu0 %v741_v60  ;;  %v736_v61 = vpop.f32.mrb[14].mxu1 }
 0x31b   : > { %v3665_v62 = vpop.f32.mrb[15].mxu1  ;;  %v744_v63 = vsel %vm740_vm3, %v736_v61, -inf }
 0x31c   : > { %745 = vmax.xlane.f32.xlu1 %v744_v63 }
 0x320   : > { %v862_v0 = vpop.f32.mrb[16].mxu1 }
 0x321   : > { %v3678_v1 = vpop.f32.mrb[17].mxu1 }
 0x322   : > { %v865_v2 = vpop.f32.mrb[18].mxu1 }
 0x323   : > { %v985_v3 = vpack.c.bf16 %v865_v2, %v862_v0  ;;  %v3679_v4 = vpop.f32.mrb[19].mxu1 }
 0x328   : > { %v978_v5 = vpop.f32.mrb[20].mxu1 }
 0x329   : > { %v3694_v6 = vpop.f32.mrb[21].mxu1 }
 0x32a   : > { %v981_v7 = vpop.f32.mrb[22].mxu1 }
 0x32b   : > { %v1057_v8 = vpack.c.bf16 %v981_v7, %v978_v5  ;;  %v3695_v9 = vpop.f32.mrb[23].mxu1 }
 0x32d   : > { %3703 = vmatpush3.bf16.msra.mxu1 %v1057_v8 }
 0x32e   : > { %3716 = vmatprep.subr.bf16.mxu1 %v4215_v15 }
 0x3a7   : > { %v743_v10 = vpop.xlane.xlu0 %742 }
 0x3a8   : > { %v747_v11 = vsub.f32 %v733_v58, %v743_v10 }
 0x3a9   : > { %v746_v12 = vpop.xlane.xlu1 %745 }
 0x3aa   : > { %v749_v13 = vmul.f32 1.442695, %v747_v11  ;;  %v748_v14 = vsub.f32 %v736_v61, %v746_v12 }
 0x3ac   : > { %4073 = vpow2.f32 %v749_v13  ;;  %v751_v16 = vmul.f32 1.442695, %v748_v14  ;;  %v4025_v14 = vld [vmem:[%s4953_s4 + $0x20] sm:$0xff]  }
 0x3ae   : > { %4075 = vpow2.f32 %v751_v16 }
 0x3b6   : > { %v4074_v17 = vpop.eup %4073 }
 0x3b7   : > { %v753_v18 = vsel %vm740_vm3, %v4074_v17, 0.0 }
 0x3b8   : > { %v4076_v19 = vpop.eup %4075  ;;  %754 = vadd.xlane.f32.xlu0 %v753_v18 }
 0x3b9   : > { %v756_v20 = vsel %vm740_vm3, %v4076_v19, 0.0 }
 0x3ba   : > { %757 = vadd.xlane.f32.xlu1 %v756_v20 }
 0x445   : > { %v755_v21 = vpop.xlane.xlu0 %754 }
 0x446   : > { %4077 = vrcp.f32 %v755_v21 }
 0x447   : > { %v758_v22 = vpop.xlane.xlu1 %757 }
 0x448   : > { %4079 = vrcp.f32 %v758_v22 }
 0x450   : > { %v4078_v23 = vpop.eup %4077 }
 0x451   : > { %v761_v25 = vmul.f32 %v4078_v23, %v4074_v17  ;;  %v4026_v17 = vld [vmem:[%s4953_s4 + $0x28] sm:$0xff]  }
 0x452   : > { %v4080_v24 = vpop.eup %4079 }
 0x453   : > { %v762_v26 = vmul.f32 %v4080_v24, %v4076_v19 }
 0x455   : > { %v763_v28 = vpack.c.bf16 %v762_v26, %v761_v25 }
 0x457   : > { %3669 = vmatmul.mubr.msk.bf16.vlgmr.msra.gmra.mrb[0].mxu0 %vm740_vm3, %v763_v28 }
 0x458   : > { %3681 = vmatpush3.bf16.msra.mxu0 %v4019_v27  ;;  %3684 = vmatprep.mubr.msk.bf16.mxu0 %vm4216_vm1, %v4215_v15 }
 0x459   : > { %3682 = vmatprep.subr.bf16.mxu0 %v4215_v15 }
 0x45c   : > { %3683 = vmatpush3.bf16.msra.mxu0 %v4020_v29  ;;  %v4027_v29 = vld [vmem:[%s4952_s3 + $0x30] sm:$0xff]  }
 0x45d   : > { %3696 = vmatprep.subr.bf16.mxu0 %v4215_v15 }
 0x45f   : > { %3685 = vmatmul.mubr.msk.bf16.vlgmr.msra.gmra.mrb[4].mxu0 %vm471_vm0, %v4385_v34 }
 0x460   : > { %3698 = vmatprep.mubr.msk.bf16.mxu0 %vm4216_vm1, %v4215_v15 }
 0x52a   : > { %v802_v30 = vpop.f32.mrb[0].mxu0 }
 0x52b   : > { %v3670_v31 = vpop.f32.mrb[1].mxu0 }
 0x52c   : > { %v805_v32 = vpop.f32.mrb[2].mxu0  ;;  %v4029_v31 = vld [vmem:[%s4954_s5 + $0x30] sm:$0xff]  }
 0x52d   : > { %v809_v33 = vpack.c.bf16 %v805_v32, %v802_v30  ;;  %v3671_v35 = vpop.f32.mrb[3].mxu0  ;;  %v4028_v30 = vld [vmem:[%s4952_s3 + $0x38] sm:$0xff]  }
 0x52e   : > { %v4030_v32 = vld [vmem:[%s4954_s5 + $0x38] sm:$0xff]  }
 0x52f   : > { %810 = vst.msk [vmem:[#allocation2] sm:$0xff] %vm692_vm2, %v809_v33 }
 0x532   : > { %v920_v36 = vpop.f32.mrb[4].mxu0 }
 0x533   : > { %v3686_v37 = vpop.f32.mrb[5].mxu0 }
 0x534   : > { %v923_v38 = vpop.f32.mrb[6].mxu0 }
 0x535   : > { %v986_v39 = vpack.c.bf16 %v923_v38, %v920_v36  ;;  %v3687_v40 = vpop.f32.mrb[7].mxu0 }
 0x537   : > { %v991_v41 = vsel %vm692_vm2, %v986_v39, 0 }
 0x538   : > { %3697 = vmatpush3.bf16.xpose.msra.mxu0 %v991_v41 }
 0x539   : > { %3708 = vmatprep.subr.bf16.mxu0 %v4215_v15 }
 0x53f   : > { %3699 = vmatmul.mubr.msk.bf16.vlgmr.msra.gmra.mrb[8].mxu0 %vm692_vm2, %v985_v3 }
 0x540   : > { %3709 = vmatpush3.bf16.msra.mxu0 %v4021_v42  ;;  %3712 = vmatprep.mubr.msk.bf16.mxu0 %vm4216_vm1, %v4215_v15 }
 0x541   : > { %3710 = vmatprep.subr.bf16.mxu0 %v4215_v15 }
 0x544   : > { %3711 = vmatpush3.bf16.msra.mxu0 %v4022_v43 }
 0x545   : > { %3724 = vmatprep.subr.bf16.mxu0 %v4215_v15 }
 0x547   : > { %3713 = vmatmul.mubr.msk.bf16.vlgmr.msra.gmra.mrb[12].mxu0 %vm471_vm0, %v4385_v34 }
 0x548   : > { %3725 = vmatpush3.bf16.msra.mxu0 %v4023_v44  ;;  %3728 = vmatprep.mubr.msk.bf16.mxu0 %vm4216_vm1, %v4215_v15 }
 0x549   : > { %3726 = vmatprep.subr.bf16.mxu0 %v4215_v15 }
 0x54c   : > { %3727 = vmatpush3.bf16.msra.mxu0 %v4024_v45 }
 0x54d   : > { %3738 = vmatprep.subr.bf16.mxu0 %v4215_v15 }
 0x54f   : > { %3729 = vmatmul.mubr.msk.bf16.vlgmr.msra.gmra.mrb[16].mxu0 %vm471_vm0, %v4385_v34 }
 0x550   : > { %3740 = vmatprep.mubr.msk.bf16.mxu0 %vm4216_vm1, %v4215_v15 }
 0x612   : > { %v1027_v46 = vpop.f32.mrb[8].mxu0 }
 0x613   : > { %v3700_v47 = vpop.f32.mrb[9].mxu0  ;;  %v1034_v48 = vsel %vm740_vm3, %v1027_v46, -inf }
 0x614   : > { %1035 = vmax.xlane.f32.xlu0 %v1034_v48  ;;  %v1030_v49 = vpop.f32.mrb[10].mxu0 }
 0x615   : > { %v3701_v50 = vpop.f32.mrb[11].mxu0  ;;  %v1037_v51 = vsel %vm740_vm3, %v1030_v49, -inf }
 0x616   : > { %1038 = vmax.xlane.f32.xlu1 %v1037_v51 }
 0x61a   : > { %v1160_v52 = vpop.f32.mrb[12].mxu0 }
 0x61b   : > { %v3714_v53 = vpop.f32.mrb[13].mxu0 }
 0x61c   : > { %v1163_v54 = vpop.f32.mrb[14].mxu0 }
 0x61d   : > { %v1283_v55 = vpack.c.bf16 %v1163_v54, %v1160_v52  ;;  %v3715_v56 = vpop.f32.mrb[15].mxu0 }
 0x622   : > { %v1276_v57 = vpop.f32.mrb[16].mxu0 }
 0x623   : > { %v3730_v58 = vpop.f32.mrb[17].mxu0 }
 0x624   : > { %v1279_v59 = vpop.f32.mrb[18].mxu0 }
 0x625   : > { %v1355_v60 = vpack.c.bf16 %v1279_v59, %v1276_v57  ;;  %v3731_v61 = vpop.f32.mrb[19].mxu0 }
 0x627   : > { %3739 = vmatpush3.bf16.msra.mxu0 %v1355_v60 }
 0x628   : > { %3752 = vmatprep.subr.bf16.mxu0 %v4215_v15 }
 0x6a1   : > { %v1036_v62 = vpop.xlane.xlu0 %1035 }
 0x6a2   : > { %v1040_v63 = vsub.f32 %v1027_v46, %v1036_v62 }
 0x6a3   : > { %v1039_v0 = vpop.xlane.xlu1 %1038 }
 0x6a4   : > { %v1042_v1 = vmul.f32 1.442695, %v1040_v63  ;;  %v1041_v2 = vsub.f32 %v1030_v49, %v1039_v0 }
 0x6a6   : > { %4081 = vpow2.f32 %v1042_v1  ;;  %v1044_v3 = vmul.f32 1.442695, %v1041_v2  ;;  %v4031_v2 = vld [vmem:[%s4953_s4 + $0x30] sm:$0xff]  }
 0x6a8   : > { %4083 = vpow2.f32 %v1044_v3 }
 0x6b0   : > { %v4082_v4 = vpop.eup %4081 }
 0x6b1   : > { %v1046_v5 = vsel %vm740_vm3, %v4082_v4, 0.0 }
 0x6b2   : > { %v4084_v6 = vpop.eup %4083  ;;  %1047 = vadd.xlane.f32.xlu0 %v1046_v5 }
 0x6b3   : > { %v1049_v7 = vsel %vm740_vm3, %v4084_v6, 0.0 }
 0x6b4   : > { %1050 = vadd.xlane.f32.xlu1 %v1049_v7 }
 0x73f   : > { %v1048_v8 = vpop.xlane.xlu0 %1047 }
 0x740   : > { %4085 = vrcp.f32 %v1048_v8 }
 0x741   : > { %v1051_v9 = vpop.xlane.xlu1 %1050 }
 0x742   : > { %4087 = vrcp.f32 %v1051_v9 }
 0x74a   : > { %v4086_v10 = vpop.eup %4085 }
 0x74b   : > { %v1054_v12 = vmul.f32 %v4086_v10, %v4082_v4  ;;  %v4032_v4 = vld [vmem:[%s4953_s4 + $0x38] sm:$0xff]  }
 0x74c   : > { %v4088_v11 = vpop.eup %4087 }
 0x74d   : > { %v1055_v13 = vmul.f32 %v4088_v11, %v4084_v6 }
 0x74f   : > { %v1056_v16 = vpack.c.bf16 %v1055_v13, %v1054_v12 }
 0x751   : > { %3705 = vmatmul.mubr.msk.bf16.vlgmr.msra.gmra.mrb[24].mxu1 %vm740_vm3, %v1056_v16 }
 0x752   : > { %3717 = vmatpush3.bf16.msra.mxu1 %v4025_v14  ;;  %3720 = vmatprep.mubr.msk.bf16.mxu1 %vm4216_vm1, %v4215_v15 }
 0x753   : > { %3718 = vmatprep.subr.bf16.mxu1 %v4215_v15 }
 0x756   : > { %3719 = vmatpush3.bf16.msra.mxu1 %v4026_v17  ;;  %v4033_v17 = vld [vmem:[%s4952_s3 + $0x40] sm:$0xff]  }
 0x757   : > { %3732 = vmatprep.subr.bf16.mxu1 %v4215_v15 }
 0x759   : > { %3721 = vmatmul.mubr.msk.bf16.vlgmr.msra.gmra.mrb[28].mxu1 %vm471_vm0, %v4385_v34 }
 0x75a   : > { %3734 = vmatprep.mubr.msk.bf16.mxu1 %vm4216_vm1, %v4215_v15 }
 0x824   : > { %v4512_v18 = vpop.f32.mrb[24].mxu1 }
 0x825   : > { %v3706_v19 = vpop.f32.mrb[25].mxu1 }
 0x826   : > { %v4514_v20 = vpop.f32.mrb[26].mxu1  ;;  %v4034_v19 = vld [vmem:[%s4952_s3 + $0x48] sm:$0xff]  }
 0x827   : > { %v1102_v21 = vpack.c.bf16 %v4514_v20, %v4512_v18  ;;  %v3707_v22 = vpop.f32.mrb[27].mxu1 }
 0x828   : > { %v4035_v22 = vld [vmem:[%s4954_s5 + $0x40] sm:$0xff]  }
 0x82c   : > { %v1218_v23 = vpop.f32.mrb[28].mxu1 }
 0x82d   : > { %v3722_v24 = vpop.f32.mrb[29].mxu1 }
 0x82e   : > { %v1221_v25 = vpop.f32.mrb[30].mxu1 }
 0x82f   : > { %v1284_v26 = vpack.c.bf16 %v1221_v25, %v1218_v23  ;;  %v3723_v27 = vpop.f32.mrb[31].mxu1  ;;  %v4036_v23 = vld [vmem:[%s4954_s5 + $0x48] sm:$0xff]  }
 0x831   : > { %v1289_v28 = vsel %vm692_vm2, %v1284_v26, 0 }
 0x832   : > { %3733 = vmatpush3.bf16.xpose.msra.mxu1 %v1289_v28 }
 0x833   : > { %3744 = vmatprep.subr.bf16.mxu1 %v4215_v15 }
 0x839   : > { %3735 = vmatmul.mubr.msk.bf16.vlgmr.msra.gmra.mrb[32].mxu1 %vm692_vm2, %v1283_v55 }
 0x83a   : > { %3745 = vmatpush3.bf16.msra.mxu1 %v4027_v29  ;;  %3748 = vmatprep.mubr.msk.bf16.mxu1 %vm4216_vm1, %v4215_v15 }
 0x83b   : > { %3746 = vmatprep.subr.bf16.mxu1 %v4215_v15 }
 0x83e   : > { %3747 = vmatpush3.bf16.msra.mxu1 %v4028_v30 }
 0x83f   : > { %3760 = vmatprep.subr.bf16.mxu1 %v4215_v15 }
 0x841   : > { %3749 = vmatmul.mubr.msk.bf16.vlgmr.msra.gmra.mrb[36].mxu1 %vm471_vm0, %v4385_v34 }
 0x842   : > { %3761 = vmatpush3.bf16.msra.mxu1 %v4029_v31  ;;  %3764 = vmatprep.mubr.msk.bf16.mxu1 %vm4216_vm1, %v4215_v15 }
 0x843   : > { %3762 = vmatprep.subr.bf16.mxu1 %v4215_v15 }
 0x846   : > { %3763 = vmatpush3.bf16.msra.mxu1 %v4030_v32 }
 0x847   : > { %3774 = vmatprep.subr.bf16.mxu1 %v4215_v15 }
 0x849   : > { %3765 = vmatmul.mubr.msk.bf16.vlgmr.msra.gmra.mrb[40].mxu1 %vm471_vm0, %v4385_v34 }
 0x84a   : > { %3776 = vmatprep.mubr.msk.bf16.mxu1 %vm4216_vm1, %v4215_v15 }
 0x90c   : > { %v1325_v33 = vpop.f32.mrb[32].mxu1 }
 0x90d   : > { %v3736_v35 = vpop.f32.mrb[33].mxu1  ;;  %v1332_v36 = vsel %vm740_vm3, %v1325_v33, -inf }
 0x90e   : > { %1333 = vmax.xlane.f32.xlu0 %v1332_v36  ;;  %v1328_v37 = vpop.f32.mrb[34].mxu1 }
 0x90f   : > { %v3737_v38 = vpop.f32.mrb[35].mxu1  ;;  %v1335_v39 = vsel %vm740_vm3, %v1328_v37, -inf }
 0x910   : > { %1336 = vmax.xlane.f32.xlu1 %v1335_v39 }
 0x914   : > { %v1458_v40 = vpop.f32.mrb[36].mxu1 }
 0x915   : > { %v3750_v41 = vpop.f32.mrb[37].mxu1 }
 0x916   : > { %v1461_v42 = vpop.f32.mrb[38].mxu1 }
 0x917   : > { %v1581_v43 = vpack.c.bf16 %v1461_v42, %v1458_v40  ;;  %v3751_v44 = vpop.f32.mrb[39].mxu1 }
 0x91c   : > { %v1574_v45 = vpop.f32.mrb[40].mxu1 }
 0x91d   : > { %v3766_v46 = vpop.f32.mrb[41].mxu1 }
 0x91e   : > { %v1577_v47 = vpop.f32.mrb[42].mxu1 }
 0x91f   : > { %v1653_v48 = vpack.c.bf16 %v1577_v47, %v1574_v45  ;;  %v3767_v49 = vpop.f32.mrb[43].mxu1 }
 0x921   : > { %3775 = vmatpush3.bf16.msra.mxu1 %v1653_v48 }
 0x922   : > { %3788 = vmatprep.subr.bf16.mxu1 %v4215_v15 }
 0x99b   : > { %v1334_v50 = vpop.xlane.xlu0 %1333 }
 0x99c   : > { %v1338_v51 = vsub.f32 %v1325_v33, %v1334_v50 }
 0x99d   : > { %v1337_v52 = vpop.xlane.xlu1 %1336 }
 0x99e   : > { %v1340_v53 = vmul.f32 1.442695, %v1338_v51  ;;  %v1339_v54 = vsub.f32 %v1328_v37, %v1337_v52 }
 0x9a0   : > { %4089 = vpow2.f32 %v1340_v53  ;;  %v1342_v55 = vmul.f32 1.442695, %v1339_v54 }
 0x9a2   : > { %4091 = vpow2.f32 %v1342_v55 }
 0x9aa   : > { %v4090_v56 = vpop.eup %4089 }
 0x9ab   : > { %v1344_v57 = vsel %vm740_vm3, %v4090_v56, 0.0 }
 0x9ac   : > { %v4092_v58 = vpop.eup %4091  ;;  %1345 = vadd.xlane.f32.xlu0 %v1344_v57  ;;  %v4037_v57 = vld [vmem:[%s4953_s4 + $0x40] sm:$0xff]  }
 0x9ad   : > { %v1347_v59 = vsel %vm740_vm3, %v4092_v58, 0.0 }
 0x9ae   : > { %1348 = vadd.xlane.f32.xlu1 %v1347_v59  ;;  %v4038_v59 = vld [vmem:[%s4953_s4 + $0x48] sm:$0xff]  }
 0xa39   : > { %v1346_v60 = vpop.xlane.xlu0 %1345 }
 0xa3a   : > { %4093 = vrcp.f32 %v1346_v60 }
 0xa3b   : > { %v1349_v61 = vpop.xlane.xlu1 %1348 }
 0xa3c   : > { %4095 = vrcp.f32 %v1349_v61 }
 0xa44   : > { %v4094_v62 = vpop.eup %4093 }
 0xa45   : > { %v1352_v0 = vmul.f32 %v4094_v62, %v4090_v56 }
 0xa46   : > { %v4096_v63 = vpop.eup %4095 }
 0xa47   : > { %v1353_v1 = vmul.f32 %v4096_v63, %v4092_v58 }
 0xa49   : > { %v1354_v3 = vpack.c.bf16 %v1353_v1, %v1352_v0 }
 0xa4b   : > { %3741 = vmatmul.mubr.msk.bf16.vlgmr.msra.gmra.mrb[20].mxu0 %vm740_vm3, %v1354_v3 }
 0xa4c   : > { %3753 = vmatpush3.bf16.msra.mxu0 %v4031_v2  ;;  %3756 = vmatprep.mubr.msk.bf16.mxu0 %vm4216_vm1, %v4215_v15 }
 0xa4d   : > { %3754 = vmatprep.subr.bf16.mxu0 %v4215_v15 }
 0xa50   : > { %3755 = vmatpush3.bf16.msra.mxu0 %v4032_v4 }
 0xa51   : > { %3768 = vmatprep.subr.bf16.mxu0 %v4215_v15 }
 0xa53   : > { %3757 = vmatmul.mubr.msk.bf16.vlgmr.msra.gmra.mrb[24].mxu0 %vm471_vm0, %v4385_v34 }
 0xa54   : > { %3770 = vmatprep.mubr.msk.bf16.mxu0 %vm4216_vm1, %v4215_v15 }
 0xb1e   : > { %v4567_v5 = vpop.f32.mrb[20].mxu0 }
 0xb1f   : > { %v3742_v6 = vpop.f32.mrb[21].mxu0 }
 0xb20   : > { %v4569_v7 = vpop.f32.mrb[22].mxu0 }
 0xb21   : > { %v1400_v8 = vpack.c.bf16 %v4569_v7, %v4567_v5  ;;  %v3743_v9 = vpop.f32.mrb[23].mxu0 }
 0xb26   : > { %v1516_v10 = vpop.f32.mrb[24].mxu0 }
 0xb27   : > { %v3758_v11 = vpop.f32.mrb[25].mxu0 }
 0xb28   : > { %v1519_v12 = vpop.f32.mrb[26].mxu0  ;;  %v4040_v11 = vld [vmem:[%s4952_s3 + $0x58] sm:$0xff]  }
 0xb29   : > { %v1582_v13 = vpack.c.bf16 %v1519_v12, %v1516_v10  ;;  %v3759_v14 = vpop.f32.mrb[27].mxu0  ;;  %v4039_v10 = vld [vmem:[%s4952_s3 + $0x50] sm:$0xff]  }
 0xb2a   : > { %v4041_v12 = vld [vmem:[%s4954_s5 + $0x50] sm:$0xff]  }
 0xb2b   : > { %v1587_v16 = vsel %vm692_vm2, %v1582_v13, 0  ;;  %v4042_v13 = vld [vmem:[%s4954_s5 + $0x58] sm:$0xff]  }
 0xb2c   : > { %3769 = vmatpush3.bf16.xpose.msra.mxu0 %v1587_v16 }
 0xb2d   : > { %3780 = vmatprep.subr.bf16.mxu0 %v4215_v15 }
 0xb33   : > { %3771 = vmatmul.mubr.msk.bf16.vlgmr.msra.gmra.mrb[28].mxu0 %vm692_vm2, %v1581_v43 }
 0xb34   : > { %3781 = vmatpush3.bf16.msra.mxu0 %v4033_v17  ;;  %3784 = vmatprep.mubr.msk.bf16.mxu0 %vm4216_vm1, %v4215_v15 }
 0xb35   : > { %3782 = vmatprep.subr.bf16.mxu0 %v4215_v15 }
 0xb38   : > { %3783 = vmatpush3.bf16.msra.mxu0 %v4034_v19 }
 0xb39   : > { %3796 = vmatprep.subr.bf16.mxu0 %v4215_v15 }
 0xb3b   : > { %3785 = vmatmul.mubr.msk.bf16.vlgmr.msra.gmra.mrb[32].mxu0 %vm471_vm0, %v4385_v34 }
 0xb3c   : > { %3797 = vmatpush3.bf16.msra.mxu0 %v4035_v22  ;;  %3800 = vmatprep.mubr.msk.bf16.mxu0 %vm4216_vm1, %v4215_v15 }
 0xb3d   : > { %3798 = vmatprep.subr.bf16.mxu0 %v4215_v15 }
 0xb40   : > { %3799 = vmatpush3.bf16.msra.mxu0 %v4036_v23 }
 0xb41   : > { %3810 = vmatprep.subr.bf16.mxu0 %v4215_v15 }
 0xb43   : > { %3801 = vmatmul.mubr.msk.bf16.vlgmr.msra.gmra.mrb[36].mxu0 %vm471_vm0, %v4385_v34 }
 0xb44   : > { %3812 = vmatprep.mubr.msk.bf16.mxu0 %vm4216_vm1, %v4215_v15 }
 0xc06   : > { %v1623_v24 = vpop.f32.mrb[28].mxu0 }
 0xc07   : > { %v3772_v25 = vpop.f32.mrb[29].mxu0  ;;  %v1630_v26 = vsel %vm740_vm3, %v1623_v24, -inf }
 0xc08   : > { %1631 = vmax.xlane.f32.xlu0 %v1630_v26  ;;  %v1626_v27 = vpop.f32.mrb[30].mxu0 }
 0xc09   : > { %v3773_v28 = vpop.f32.mrb[31].mxu0  ;;  %v1633_v29 = vsel %vm740_vm3, %v1626_v27, -inf }
 0xc0a   : > { %1634 = vmax.xlane.f32.xlu1 %v1633_v29 }
 0xc0e   : > { %v1756_v30 = vpop.f32.mrb[32].mxu0 }
 0xc0f   : > { %v3786_v31 = vpop.f32.mrb[33].mxu0 }
 0xc10   : > { %v1759_v32 = vpop.f32.mrb[34].mxu0 }
 0xc11   : > { %v1879_v33 = vpack.c.bf16 %v1759_v32, %v1756_v30  ;;  %v3787_v35 = vpop.f32.mrb[35].mxu0 }
 0xc16   : > { %v1872_v36 = vpop.f32.mrb[36].mxu0 }
 0xc17   : > { %v3802_v37 = vpop.f32.mrb[37].mxu0 }
 0xc18   : > { %v1875_v38 = vpop.f32.mrb[38].mxu0 }
 0xc19   : > { %v1951_v39 = vpack.c.bf16 %v1875_v38, %v1872_v36  ;;  %v3803_v40 = vpop.f32.mrb[39].mxu0 }
 0xc1b   : > { %3811 = vmatpush3.bf16.msra.mxu0 %v1951_v39 }
 0xc1c   : > { %3824 = vmatprep.subr.bf16.mxu0 %v4215_v15 }
 0xc95   : > { %v1632_v41 = vpop.xlane.xlu0 %1631 }
 0xc96   : > { %v1636_v42 = vsub.f32 %v1623_v24, %v1632_v41 }
 0xc97   : > { %v1635_v43 = vpop.xlane.xlu1 %1634 }
 0xc98   : > { %v1638_v44 = vmul.f32 1.442695, %v1636_v42  ;;  %v1637_v45 = vsub.f32 %v1626_v27, %v1635_v43 }
 0xc9a   : > { %4097 = vpow2.f32 %v1638_v44  ;;  %v1640_v46 = vmul.f32 1.442695, %v1637_v45 }
 0xc9c   : > { %4099 = vpow2.f32 %v1640_v46 }
 0xca4   : > { %v4098_v47 = vpop.eup %4097 }
 0xca5   : > { %v1642_v48 = vsel %vm740_vm3, %v4098_v47, 0.0 }
 0xca6   : > { %v4100_v49 = vpop.eup %4099  ;;  %1643 = vadd.xlane.f32.xlu0 %v1642_v48 }
 0xca7   : > { %v1645_v50 = vsel %vm740_vm3, %v4100_v49, 0.0 }
 0xca8   : > { %1646 = vadd.xlane.f32.xlu1 %v1645_v50 }
 0xd33   : > { %v1644_v51 = vpop.xlane.xlu0 %1643 }
 0xd34   : > { %4101 = vrcp.f32 %v1644_v51  ;;  %v4043_v51 = vld [vmem:[%s4953_s4 + $0x50] sm:$0xff]  }
 0xd35   : > { %v1647_v52 = vpop.xlane.xlu1 %1646 }
 0xd36   : > { %4103 = vrcp.f32 %v1647_v52 }
 0xd3e   : > { %v4102_v53 = vpop.eup %4101 }
 0xd3f   : > { %v1650_v55 = vmul.f32 %v4102_v53, %v4098_v47  ;;  %v4044_v53 = vld [vmem:[%s4953_s4 + $0x58] sm:$0xff]  }
 0xd40   : > { %v4104_v54 = vpop.eup %4103 }
 0xd41   : > { %v1651_v56 = vmul.f32 %v4104_v54, %v4100_v49 }
 0xd43   : > { %v1652_v58 = vpack.c.bf16 %v1651_v56, %v1650_v55 }
 0xd45   : > { %3777 = vmatmul.mubr.msk.bf16.vlgmr.msra.gmra.mrb[44].mxu1 %vm740_vm3, %v1652_v58 }
 0xd46   : > { %3789 = vmatpush3.bf16.msra.mxu1 %v4037_v57  ;;  %3792 = vmatprep.mubr.msk.bf16.mxu1 %vm4216_vm1, %v4215_v15 }
 0xd47   : > { %3790 = vmatprep.subr.bf16.mxu1 %v4215_v15 }
 0xd4a   : > { %3791 = vmatpush3.bf16.msra.mxu1 %v4038_v59 }
 0xd4b   : > { %3804 = vmatprep.subr.bf16.mxu1 %v4215_v15 }
 0xd4d   : > { %3793 = vmatmul.mubr.msk.bf16.vlgmr.msra.gmra.mrb[48].mxu1 %vm471_vm0, %v4385_v34 }
 0xd4e   : > { %3806 = vmatprep.mubr.msk.bf16.mxu1 %vm4216_vm1, %v4215_v15 }
 0xe18   : > { %v4622_v60 = vpop.f32.mrb[44].mxu1 }
 0xe19   : > { %v3778_v61 = vpop.f32.mrb[45].mxu1 }
 0xe1a   : > { %v4624_v62 = vpop.f32.mrb[46].mxu1 }
 0xe1b   : > { %v1698_v63 = vpack.c.bf16 %v4624_v62, %v4622_v60  ;;  %v3779_v0 = vpop.f32.mrb[47].mxu1 }
 0xe20   : > { %v1814_v1 = vpop.f32.mrb[48].mxu1 }
 0xe21   : > { %v3794_v2 = vpop.f32.mrb[49].mxu1 }
 0xe22   : > { %v1817_v3 = vpop.f32.mrb[50].mxu1 }
 0xe23   : > { %v1880_v4 = vpack.c.bf16 %v1817_v3, %v1814_v1  ;;  %v3795_v6 = vpop.f32.mrb[51].mxu1 }
 0xe24   : > { %v4046_v6 = vld [vmem:[%s4952_s3 + $0x68] sm:$0xff]  }
 0xe25   : > { %v1885_v9 = vsel %vm692_vm2, %v1880_v4, 0  ;;  %v4045_v4 = vld [vmem:[%s4952_s3 + $0x60] sm:$0xff]  }
 0xe26   : > { %3805 = vmatpush3.bf16.xpose.msra.mxu1 %v1885_v9  ;;  %v4047_v9 = vld [vmem:[%s4954_s5 + $0x60] sm:$0xff]  }
 0xe27   : > { %3816 = vmatprep.subr.bf16.mxu1 %v4215_v15 }
 0xe2d   : > { %3807 = vmatmul.mubr.msk.bf16.vlgmr.msra.gmra.mrb[52].mxu1 %vm692_vm2, %v1879_v33 }
 0xe2e   : > { %3817 = vmatpush3.bf16.msra.mxu1 %v4039_v10  ;;  %3820 = vmatprep.mubr.msk.bf16.mxu1 %vm4216_vm1, %v4215_v15  ;;  %v4048_v10 = vld [vmem:[%s4954_s5 + $0x68] sm:$0xff]  }
 0xe2f   : > { %3818 = vmatprep.subr.bf16.mxu1 %v4215_v15 }
 0xe32   : > { %3819 = vmatpush3.bf16.msra.mxu1 %v4040_v11 }
 0xe33   : > { %3832 = vmatprep.subr.bf16.mxu1 %v4215_v15 }
 0xe35   : > { %3821 = vmatmul.mubr.msk.bf16.vlgmr.msra.gmra.mrb[56].mxu1 %vm471_vm0, %v4385_v34 }
 0xe36   : > { %3833 = vmatpush3.bf16.msra.mxu1 %v4041_v12  ;;  %3836 = vmatprep.mubr.msk.bf16.mxu1 %vm4216_vm1, %v4215_v15 }
 0xe37   : > { %3834 = vmatprep.subr.bf16.mxu1 %v4215_v15 }
 0xe3a   : > { %3835 = vmatpush3.bf16.msra.mxu1 %v4042_v13 }
 0xe3b   : > { %3846 = vmatprep.subr.bf16.mxu1 %v4215_v15 }
 0xe3d   : > { %3837 = vmatmul.mubr.msk.bf16.vlgmr.msra.gmra.mrb[60].mxu1 %vm471_vm0, %v4385_v34 }
 0xe3e   : > { %3848 = vmatprep.mubr.msk.bf16.mxu1 %vm4216_vm1, %v4215_v15 }
 0xf00   : > { %v1921_v14 = vpop.f32.mrb[52].mxu1 }
 0xf01   : > { %v3808_v16 = vpop.f32.mrb[53].mxu1  ;;  %v1928_v17 = vsel %vm740_vm3, %v1921_v14, -inf }
 0xf02   : > { %1929 = vmax.xlane.f32.xlu0 %v1928_v17  ;;  %v1924_v19 = vpop.f32.mrb[54].mxu1 }
 0xf03   : > { %v3809_v22 = vpop.f32.mrb[55].mxu1  ;;  %v1931_v23 = vsel %vm740_vm3, %v1924_v19, -inf }
 0xf04   : > { %1932 = vmax.xlane.f32.xlu1 %v1931_v23 }
 0xf08   : > { %v2054_v24 = vpop.f32.mrb[56].mxu1 }
 0xf09   : > { %v3822_v25 = vpop.f32.mrb[57].mxu1 }
 0xf0a   : > { %v2057_v26 = vpop.f32.mrb[58].mxu1 }
 0xf0b   : > { %v2177_v27 = vpack.c.bf16 %v2057_v26, %v2054_v24  ;;  %v3823_v28 = vpop.f32.mrb[59].mxu1 }
 0xf10   : > { %v2170_v29 = vpop.f32.mrb[60].mxu1 }
 0xf11   : > { %v3838_v30 = vpop.f32.mrb[61].mxu1 }
 0xf12   : > { %v2173_v31 = vpop.f32.mrb[62].mxu1 }
 0xf13   : > { %v2249_v32 = vpack.c.bf16 %v2173_v31, %v2170_v29  ;;  %v3839_v33 = vpop.f32.mrb[63].mxu1 }
 0xf15   : > { %3847 = vmatpush3.bf16.msra.mxu1 %v2249_v32 }
 0xf16   : > { %3860 = vmatprep.subr.bf16.mxu1 %v4215_v15 }
 0xf8f   : > { %v1930_v35 = vpop.xlane.xlu0 %1929 }
 0xf90   : > { %v1934_v36 = vsub.f32 %v1921_v14, %v1930_v35 }
 0xf91   : > { %v1933_v37 = vpop.xlane.xlu1 %1932 }
 0xf92   : > { %v1936_v38 = vmul.f32 1.442695, %v1934_v36  ;;  %v1935_v39 = vsub.f32 %v1924_v19, %v1933_v37 }
 0xf94   : > { %4105 = vpow2.f32 %v1936_v38  ;;  %v1938_v40 = vmul.f32 1.442695, %v1935_v39 }
 0xf96   : > { %4107 = vpow2.f32 %v1938_v40 }
 0xf9e   : > { %v4106_v41 = vpop.eup %4105 }
 0xf9f   : > { %v1940_v42 = vsel %vm740_vm3, %v4106_v41, 0.0 }
 0xfa0   : > { %v4108_v43 = vpop.eup %4107  ;;  %1941 = vadd.xlane.f32.xlu0 %v1940_v42 }
 0xfa1   : > { %v1943_v44 = vsel %vm740_vm3, %v4108_v43, 0.0 }
 0xfa2   : > { %1944 = vadd.xlane.f32.xlu1 %v1943_v44 }
0x102d   : > { %v1942_v45 = vpop.xlane.xlu0 %1941 }
0x102e   : > { %4109 = vrcp.f32 %v1942_v45 }
0x102f   : > { %v1945_v46 = vpop.xlane.xlu1 %1944 }
0x1030   : > { %4111 = vrcp.f32 %v1945_v46 }
0x1038   : > { %v4110_v47 = vpop.eup %4109 }
0x1039   : > { %v1948_v49 = vmul.f32 %v4110_v47, %v4106_v41 }
0x103a   : > { %v4112_v48 = vpop.eup %4111 }
0x103b   : > { %v1949_v50 = vmul.f32 %v4112_v48, %v4108_v43  ;;  %v4049_v48 = vld [vmem:[%s4953_s4 + $0x60] sm:$0xff]  }
0x103d   : > { %v1950_v52 = vpack.c.bf16 %v1949_v50, %v1948_v49  ;;  %v4050_v50 = vld [vmem:[%s4953_s4 + $0x68] sm:$0xff]  }
0x103f   : > { %3813 = vmatmul.mubr.msk.bf16.vlgmr.msra.gmra.mrb[40].mxu0 %vm740_vm3, %v1950_v52 }
0x1040   : > { %3825 = vmatpush3.bf16.msra.mxu0 %v4043_v51  ;;  %3828 = vmatprep.mubr.msk.bf16.mxu0 %vm4216_vm1, %v4215_v15 }
0x1041   : > { %3826 = vmatprep.subr.bf16.mxu0 %v4215_v15 }
0x1044   : > { %3827 = vmatpush3.bf16.msra.mxu0 %v4044_v53 }
0x1045   : > { %3840 = vmatprep.subr.bf16.mxu0 %v4215_v15 }
0x1047   : > { %3829 = vmatmul.mubr.msk.bf16.vlgmr.msra.gmra.mrb[44].mxu0 %vm471_vm0, %v4385_v34 }
0x1048   : > { %3842 = vmatprep.mubr.msk.bf16.mxu0 %vm4216_vm1, %v4215_v15 }
0x1112   : > { %v4677_v54 = vpop.f32.mrb[40].mxu0 }
0x1113   : > { %v3814_v55 = vpop.f32.mrb[41].mxu0 }
0x1114   : > { %v4679_v56 = vpop.f32.mrb[42].mxu0 }
0x1115   : > { %v1996_v57 = vpack.c.bf16 %v4679_v56, %v4677_v54  ;;  %v3815_v58 = vpop.f32.mrb[43].mxu0 }
0x111a   : > { %v2112_v59 = vpop.f32.mrb[44].mxu0 }
0x111b   : > { %v3830_v61 = vpop.f32.mrb[45].mxu0 }
0x111c   : > { %v2115_v0 = vpop.f32.mrb[46].mxu0 }
0x111d   : > { %v2178_v1 = vpack.c.bf16 %v2115_v0, %v2112_v59  ;;  %v3831_v2 = vpop.f32.mrb[47].mxu0 }
0x111f   : > { %v2183_v3 = vsel %vm692_vm2, %v2178_v1, 0 }
0x1120   : > { %3841 = vmatpush3.bf16.xpose.msra.mxu0 %v2183_v3 }
0x1121   : > { %3852 = vmatprep.subr.bf16.mxu0 %v4215_v15 }
0x1127   : > { %3843 = vmatmul.mubr.msk.bf16.vlgmr.msra.gmra.mrb[48].mxu0 %vm692_vm2, %v2177_v27 }
0x1128   : > { %3853 = vmatpush3.bf16.msra.mxu0 %v4045_v4  ;;  %3856 = vmatprep.mubr.msk.bf16.mxu0 %vm4216_vm1, %v4215_v15  ;;  %v4051_v4 = vld [vmem:[%s4952_s3 + $0x70] sm:$0xff]  }
0x1129   : > { %3854 = vmatprep.subr.bf16.mxu0 %v4215_v15 }
0x112c   : > { %3855 = vmatpush3.bf16.msra.mxu0 %v4046_v6  ;;  %v4052_v6 = vld [vmem:[%s4952_s3 + $0x78] sm:$0xff]  }
0x112d   : > { %3868 = vmatprep.subr.bf16.mxu0 %v4215_v15 }
0x112f   : > { %3857 = vmatmul.mubr.msk.bf16.vlgmr.msra.gmra.mrb[52].mxu0 %vm471_vm0, %v4385_v34 }
0x1130   : > { %3869 = vmatpush3.bf16.msra.mxu0 %v4047_v9  ;;  %3872 = vmatprep.mubr.msk.bf16.mxu0 %vm4216_vm1, %v4215_v15  ;;  %v4053_v9 = vld [vmem:[%s4954_s5 + $0x70] sm:$0xff]  }
0x1131   : > { %3870 = vmatprep.subr.bf16.mxu0 %v4215_v15 }
0x1134   : > { %3871 = vmatpush3.bf16.msra.mxu0 %v4048_v10  ;;  %v4054_v10 = vld [vmem:[%s4954_s5 + $0x78] sm:$0xff]  }
0x1135   : > { %3882 = vmatprep.subr.bf16.mxu0 %v4215_v15 }
0x1137   : > { %3873 = vmatmul.mubr.msk.bf16.vlgmr.msra.gmra.mrb[56].mxu0 %vm471_vm0, %v4385_v34 }
0x1138   : > { %3884 = vmatprep.mubr.msk.bf16.mxu0 %vm4216_vm1, %v4215_v15 }
0x11fa   : > { %v2219_v11 = vpop.f32.mrb[48].mxu0 }
0x11fb   : > { %v3844_v12 = vpop.f32.mrb[49].mxu0  ;;  %v2226_v13 = vsel %vm740_vm3, %v2219_v11, -inf }
0x11fc   : > { %2227 = vmax.xlane.f32.xlu0 %v2226_v13  ;;  %v2222_v14 = vpop.f32.mrb[50].mxu0 }
0x11fd   : > { %v3845_v16 = vpop.f32.mrb[51].mxu0  ;;  %v2229_v17 = vsel %vm740_vm3, %v2222_v14, -inf }
0x11fe   : > { %2230 = vmax.xlane.f32.xlu1 %v2229_v17 }
0x1202   : > { %v2352_v19 = vpop.f32.mrb[52].mxu0 }
0x1203   : > { %v3858_v22 = vpop.f32.mrb[53].mxu0 }
0x1204   : > { %v2355_v23 = vpop.f32.mrb[54].mxu0 }
0x1205   : > { %v2475_v24 = vpack.c.bf16 %v2355_v23, %v2352_v19  ;;  %v3859_v25 = vpop.f32.mrb[55].mxu0 }
0x120a   : > { %v2468_v26 = vpop.f32.mrb[56].mxu0 }
0x120b   : > { %v3874_v27 = vpop.f32.mrb[57].mxu0 }
0x120c   : > { %v2471_v28 = vpop.f32.mrb[58].mxu0 }
0x120d   : > { %v2547_v29 = vpack.c.bf16 %v2471_v28, %v2468_v26  ;;  %v3875_v30 = vpop.f32.mrb[59].mxu0 }
0x120f   : > { %3883 = vmatpush3.bf16.msra.mxu0 %v2547_v29 }
0x1210   : > { %3896 = vmatprep.subr.bf16.mxu0 %v4215_v15 }
0x1289   : > { %v2228_v31 = vpop.xlane.xlu0 %2227 }
0x128a   : > { %v2232_v32 = vsub.f32 %v2219_v11, %v2228_v31 }
0x128b   : > { %v2231_v33 = vpop.xlane.xlu1 %2230 }
0x128c   : > { %v2234_v35 = vmul.f32 1.442695, %v2232_v32  ;;  %v2233_v36 = vsub.f32 %v2222_v14, %v2231_v33 }
0x128e   : > { %4113 = vpow2.f32 %v2234_v35  ;;  %v2236_v37 = vmul.f32 1.442695, %v2233_v36 }
0x1290   : > { %4115 = vpow2.f32 %v2236_v37 }
0x1298   : > { %v4114_v38 = vpop.eup %4113 }
0x1299   : > { %v2238_v39 = vsel %vm740_vm3, %v4114_v38, 0.0 }
0x129a   : > { %v4116_v40 = vpop.eup %4115  ;;  %2239 = vadd.xlane.f32.xlu0 %v2238_v39 }
0x129b   : > { %v2241_v41 = vsel %vm740_vm3, %v4116_v40, 0.0 }
0x129c   : > { %2242 = vadd.xlane.f32.xlu1 %v2241_v41 }
0x1327   : > { %v2240_v42 = vpop.xlane.xlu0 %2239 }
0x1328   : > { %4117 = vrcp.f32 %v2240_v42 }
0x1329   : > { %v2243_v43 = vpop.xlane.xlu1 %2242 }
0x132a   : > { %4119 = vrcp.f32 %v2243_v43 }
0x1332   : > { %v4118_v44 = vpop.eup %4117 }
0x1333   : > { %v2246_v46 = vmul.f32 %v4118_v44, %v4114_v38 }
0x1334   : > { %v4120_v45 = vpop.eup %4119 }
0x1335   : > { %v2247_v47 = vmul.f32 %v4120_v45, %v4116_v40 }
0x1337   : > { %v2248_v49 = vpack.c.bf16 %v2247_v47, %v2246_v46 }
0x1339   : > { %3849 = vmatmul.mubr.msk.bf16.vlgmr.msra.gmra.mrb[64].mxu1 %vm740_vm3, %v2248_v49 }
0x133a   : > { %3861 = vmatpush3.bf16.msra.mxu1 %v4049_v48  ;;  %3864 = vmatprep.mubr.msk.bf16.mxu1 %vm4216_vm1, %v4215_v15  ;;  %v4055_v48 = vld [vmem:[%s4953_s4 + $0x70] sm:$0xff]  }
0x133b   : > { %3862 = vmatprep.subr.bf16.mxu1 %v4215_v15 }
0x133e   : > { %3863 = vmatpush3.bf16.msra.mxu1 %v4050_v50  ;;  %v4056_v50 = vld [vmem:[%s4953_s4 + $0x78] sm:$0xff]  }
0x133f   : > { %3876 = vmatprep.subr.bf16.mxu1 %v4215_v15 }
0x1341   : > { %3865 = vmatmul.mubr.msk.bf16.vlgmr.msra.gmra.mrb[68].mxu1 %vm471_vm0, %v4385_v34 }
0x1342   : > { %3878 = vmatprep.mubr.msk.bf16.mxu1 %vm4216_vm1, %v4215_v15 }
0x140c   : > { %v4732_v51 = vpop.f32.mrb[64].mxu1 }
0x140d   : > { %v3850_v52 = vpop.f32.mrb[65].mxu1 }
0x140e   : > { %v4734_v53 = vpop.f32.mrb[66].mxu1 }
0x140f   : > { %v2294_v55 = vpack.c.bf16 %v4734_v53, %v4732_v51  ;;  %v3851_v58 = vpop.f32.mrb[67].mxu1  ;;  %v4057_v53 = vld [vmem:[%s4955_s6] sm:$0xff]  }
0x1414   : > { %v2410_v59 = vpop.f32.mrb[68].mxu1 }
0x1415   : > { %v3866_v61 = vpop.f32.mrb[69].mxu1 }
0x1416   : > { %v2413_v0 = vpop.f32.mrb[70].mxu1 }
0x1417   : > { %v2476_v1 = vpack.c.bf16 %v2413_v0, %v2410_v59  ;;  %v3867_v2 = vpop.f32.mrb[71].mxu1 }
0x1419   : > { %v2481_v3 = vsel %vm692_vm2, %v2476_v1, 0 }
0x141a   : > { %3877 = vmatpush3.bf16.xpose.msra.mxu1 %v2481_v3 }
0x141b   : > { %3888 = vmatprep.subr.bf16.mxu1 %v4215_v15 }
0x1421   : > { %3879 = vmatmul.mubr.msk.bf16.vlgmr.msra.gmra.mrb[72].mxu1 %vm692_vm2, %v2475_v24 }
0x1422   : > { %3889 = vmatpush3.bf16.msra.mxu1 %v4051_v4  ;;  %3892 = vmatprep.mubr.msk.bf16.mxu1 %vm4216_vm1, %v4215_v15 }
0x1423   : > { %3890 = vmatprep.subr.bf16.mxu1 %v4215_v15 }
0x1426   : > { %3891 = vmatpush3.bf16.msra.mxu1 %v4052_v6 }
0x1427   : > { %3904 = vmatprep.subr.bf16.mxu1 %v4215_v15 }
0x1429   : > { %3893 = vmatmul.mubr.msk.bf16.vlgmr.msra.gmra.mrb[76].mxu1 %vm471_vm0, %v4385_v34 }
0x142a   : > { %3905 = vmatpush3.bf16.msra.mxu1 %v4053_v9  ;;  %3908 = vmatprep.mubr.msk.bf16.mxu1 %vm4216_vm1, %v4215_v15 }
0x142b   : > { %3906 = vmatprep.subr.bf16.mxu1 %v4215_v15 }
0x142e   : > { %3907 = vmatpush3.bf16.msra.mxu1 %v4054_v10 }
0x142f   : > { %3918 = vmatprep.subr.bf16.mxu1 %v4215_v15 }
0x1431   : > { %3909 = vmatmul.mubr.msk.bf16.vlgmr.msra.gmra.mrb[80].mxu1 %vm471_vm0, %v4385_v34 }
0x1432   : > { %3920 = vmatprep.mubr.msk.bf16.mxu1 %vm4216_vm1, %v4215_v15 }
0x14f4   : > { %v2517_v11 = vpop.f32.mrb[72].mxu1 }
0x14f5   : > { %v3880_v12 = vpop.f32.mrb[73].mxu1  ;;  %v2524_v13 = vsel %vm740_vm3, %v2517_v11, -inf }
0x14f6   : > { %2525 = vmax.xlane.f32.xlu0 %v2524_v13  ;;  %v2520_v14 = vpop.f32.mrb[74].mxu1 }
0x14f7   : > { %v3881_v16 = vpop.f32.mrb[75].mxu1  ;;  %v2527_v17 = vsel %vm740_vm3, %v2520_v14, -inf }
0x14f8   : > { %2528 = vmax.xlane.f32.xlu1 %v2527_v17 }
0x14fc   : > { %v2650_v19 = vpop.f32.mrb[76].mxu1 }
0x14fd   : > { %v3894_v22 = vpop.f32.mrb[77].mxu1 }
0x14fe   : > { %v2653_v23 = vpop.f32.mrb[78].mxu1 }
0x14ff   : > { %v2773_v24 = vpack.c.bf16 %v2653_v23, %v2650_v19  ;;  %v3895_v25 = vpop.f32.mrb[79].mxu1 }
0x1504   : > { %v2766_v26 = vpop.f32.mrb[80].mxu1 }
0x1505   : > { %v3910_v27 = vpop.f32.mrb[81].mxu1 }
0x1506   : > { %v2769_v28 = vpop.f32.mrb[82].mxu1 }
0x1507   : > { %v2845_v29 = vpack.c.bf16 %v2769_v28, %v2766_v26  ;;  %v3911_v30 = vpop.f32.mrb[83].mxu1 }
0x1509   : > { %3919 = vmatpush3.bf16.msra.mxu1 %v2845_v29 }
0x150a   : > { %3932 = vmatprep.subr.bf16.mxu1 %v4215_v15 }
0x1583   : > { %v2526_v31 = vpop.xlane.xlu0 %2525 }
0x1584   : > { %v2530_v32 = vsub.f32 %v2517_v11, %v2526_v31 }
0x1585   : > { %v2529_v33 = vpop.xlane.xlu1 %2528 }
0x1586   : > { %v2532_v35 = vmul.f32 1.442695, %v2530_v32  ;;  %v2531_v36 = vsub.f32 %v2520_v14, %v2529_v33 }
0x1588   : > { %4121 = vpow2.f32 %v2532_v35  ;;  %v2534_v37 = vmul.f32 1.442695, %v2531_v36 }
0x158a   : > { %4123 = vpow2.f32 %v2534_v37 }
0x1592   : > { %v4122_v38 = vpop.eup %4121 }
0x1593   : > { %v2536_v39 = vsel %vm740_vm3, %v4122_v38, 0.0 }
0x1594   : > { %v4124_v40 = vpop.eup %4123  ;;  %2537 = vadd.xlane.f32.xlu0 %v2536_v39  ;;  %v4149_v39 = vld [vmem:[%s4354_s18] sm:$0xff] }
0x1595   : > { %v2539_v41 = vsel %vm740_vm3, %v4124_v40, 0.0 }
0x1596   : > { %2540 = vadd.xlane.f32.xlu1 %v2539_v41 }
0x1621   : > { %v2538_v42 = vpop.xlane.xlu0 %2537 }
0x1622   : > { %4125 = vrcp.f32 %v2538_v42 }
0x1623   : > { %v2541_v43 = vpop.xlane.xlu1 %2540 }
0x1624   : > { %4127 = vrcp.f32 %v2541_v43 }
0x162c   : > { %v4126_v44 = vpop.eup %4125 }
0x162d   : > { %v2544_v46 = vmul.f32 %v4126_v44, %v4122_v38  ;;  %v3494_v38 = vld [vmem:[%s4956_s7] ss:$0 sm:$0xff]  ;;  %v4150_v44 = vld [vmem:[%s4354_s18 + $0x8] sm:$0xff]  ;;  %s458_s18 = sand.u32 1, %s4205_s30  }
0x162e   : > { %v4128_v45 = vpop.eup %4127 }
0x162f   : > { %v2545_v47 = vmul.f32 %v4128_v45, %v4124_v40 }
0x1631   : > { %v2546_v49 = vpack.c.bf16 %v2545_v47, %v2544_v46 }
0x1633   : > { %3885 = vmatmul.mubr.msk.bf16.vlgmr.msra.gmra.mrb[60].mxu0 %vm740_vm3, %v2546_v49 }
0x1634   : > { %3897 = vmatpush3.bf16.msra.mxu0 %v4055_v48  ;;  %3900 = vmatprep.mubr.msk.bf16.mxu0 %vm4216_vm1, %v4215_v15 }
0x1635   : > { %3898 = vmatprep.subr.bf16.mxu0 %v4215_v15 }
0x1638   : > { %3899 = vmatpush3.bf16.msra.mxu0 %v4056_v50 }
0x1639   : > { %3912 = vmatprep.subr.bf16.mxu0 %v4215_v15 }
0x163b   : > { %3901 = vmatmul.mubr.msk.bf16.vlgmr.msra.gmra.mrb[64].mxu0 %vm471_vm0, %v4385_v34 }
0x163c   : > { %3914 = vmatprep.mubr.msk.bf16.mxu0 %vm4216_vm1, %v4215_v15 }
0x1706   : > { %v2585_v52 = vpop.f32.mrb[60].mxu0 }
0x1707   : > { %v3886_v58 = vpop.f32.mrb[61].mxu0 }
0x1708   : > { %v2588_v59 = vpop.f32.mrb[62].mxu0 }
0x1709   : > { %v2592_v61 = vpack.c.bf16 %v2588_v59, %v2585_v52  ;;  %v3887_v0 = vpop.f32.mrb[63].mxu0 }
0x170e   : > { %v2708_v1 = vpop.f32.mrb[64].mxu0 }
0x170f   : > { %v3902_v2 = vpop.f32.mrb[65].mxu0 }
0x1710   : > { %v2711_v3 = vpop.f32.mrb[66].mxu0 }
0x1711   : > { %v2774_v4 = vpack.c.bf16 %v2711_v3, %v2708_v1  ;;  %v3903_v6 = vpop.f32.mrb[67].mxu0 }
0x1712   : > { %v4059_v6 = vld [vmem:[%s4959_s10] sm:$0xff]  }
0x1713   : > { %v2779_v9 = vsel %vm692_vm2, %v2774_v4, 0 }
0x1714   : > { %3913 = vmatpush3.bf16.xpose.msra.mxu0 %v2779_v9  ;;  %v4060_v9 = vld [vmem:[%s4959_s10 + $0x8] sm:$0xff]  }
0x1715   : > { %3924 = vmatprep.subr.bf16.mxu0 %v4215_v15 }
0x171b   : > { %3915 = vmatmul.mubr.msk.bf16.vlgmr.msra.gmra.mrb[68].mxu0 %vm692_vm2, %v2773_v24 }
0x171c   : > { %3928 = vmatprep.mubr.msk.bf16.mxu0 %vm4216_vm1, %v4215_v15  ;;  %3925 = vmatpush3.bf16.msra.mxu0 %v4057_v53 }
0x171d   : > { %3926 = vmatprep.subr.bf16.mxu0 %v4215_v15 }
0x17ee   : > { %v2815_v34 = vpop.f32.mrb[68].mxu0 }
0x17ef   : > { %v3916_v10 = vpop.f32.mrb[69].mxu0  ;;  %v2822_v11 = vsel %vm740_vm3, %v2815_v34, -inf }
0x17f0   : > { %2823 = vmax.xlane.f32.xlu0 %v2822_v11  ;;  %v2818_v12 = vpop.f32.mrb[70].mxu0 }
0x17f1   : > { %v3917_v13 = vpop.f32.mrb[71].mxu0  ;;  %v2825_v14 = vsel %vm740_vm3, %v2818_v12, -inf }
0x17f2   : > { %2826 = vmax.xlane.f32.xlu1 %v2825_v14 }
0x187d   : > { %v2824_v16 = vpop.xlane.xlu0 %2823 }
0x187e   : > { %v2828_v17 = vsub.f32 %v2815_v34, %v2824_v16 }
0x187f   : > { %v2827_v19 = vpop.xlane.xlu1 %2826 }
0x1880   : > { %v2830_v22 = vmul.f32 1.442695, %v2828_v17  ;;  %v2829_v23 = vsub.f32 %v2818_v12, %v2827_v19  ;;  %v3495_v19 = vld [vmem:[%s4957_s8] ss:$0 sm:$0xff] }
0x1882   : > { %4129 = vpow2.f32 %v2830_v22  ;;  %v2832_v24 = vmul.f32 1.442695, %v2829_v23 }
0x1884   : > { %4131 = vpow2.f32 %v2832_v24 }
0x188c   : > { %v4130_v25 = vpop.eup %4129 }
0x188d   : > { %v2834_v26 = vsel %vm740_vm3, %v4130_v25, 0.0 }
0x188e   : > { %v4132_v27 = vpop.eup %4131  ;;  %2835 = vadd.xlane.f32.xlu0 %v2834_v26 }
0x188f   : > { %v2837_v28 = vsel %vm740_vm3, %v4132_v27, 0.0 }
0x1890   : > { %2838 = vadd.xlane.f32.xlu1 %v2837_v28 }
0x18a1   : > { %1402 = vrot.lane.b32.xlu1 %v1400_v8, %s4964_s27  ;;  %s3516_s27 = sshll.u32 %s4322_s17, 8  ;;  %s4907_s17 = scalar_lea.sflag [#allocation4], %s458_s18 }
0x18a4   : > { %1104 = vrot.lane.b32.xlu0 %v1102_v21, %s4218_s28 }
0x18a5   : > { %1700 = vrot.lane.b32.xlu1 %v1698_v63, %s4219_s20  ;;  %s4900_s20 = scalar_lea.hbm %s4963_s14, %s3516_s27  ;;  %s4224_s27 = smov [#allocation3]  }
0x18a6   : > { %s4155_s0 = sshll.u32 %s4224_s27, 4  ;;  %s4156_s0 = int_to_ptr.vmem [resolvable:$false] %s4155_s0 }
0x18a7   : > { %s4157_s28 = scalar_lea.vmem %s4156_s0, 512 }
0x18a8   : > { %2296 = vrot.lane.b32.xlu0 %v2294_v55, %s4220_s21  ;;  %v4058_v55 = vld [vmem:[%s4955_s6 + $0x8] sm:$0xff]   ;;  %s3314_s21 = sshll.u32 %s458_s18, 4 }
0x18a9   : > { %1998 = vrot.lane.b32.xlu1 %v1996_v57, %s4221_s25  ;;  %3927 = vmatpush3.bf16.msra.mxu0 %v4058_v55  ;;  %s460_s25 = scalar_lea.vmem [#allocation3], %s3314_s21 }
0x18aa   : > { %3940 = vmatprep.subr.bf16.mxu0 %v4215_v15 }
0x18ad   : > { %2594 = vrot.lane.b32.xlu1 %v2592_v61, %s4222_s26  ;;  %s4223_s26 = smov 28  }
0x191b   : > { %v2836_v5 = vpop.xlane.xlu0 %2835 }
0x191c   : > { %4133 = vrcp.f32 %v2836_v5 }
0x191d   : > { %v2839_v18 = vpop.xlane.xlu1 %2838 }
0x191e   : > { %4135 = vrcp.f32 %v2839_v18  ;;  %v4061_v18 = vld [vmem:[%s4961_s12] sm:$0xff]  }
0x191f   : > { %v1105_v20 = vpop.permute.xlu0 %1104 }
0x1920   : > { %1108 = vst.msk [vmem:[#allocation2] sm:$0xff] %vm1107_vm4, %v1105_v20  ;;  %v4062_v20 = vld [vmem:[%s4961_s12 + $0x8] sm:$0xff]  }
0x1921   : > { %v1403_v21 = vpop.permute.xlu1 %1402 }
0x1922   : > { %1406 = vst.msk [vmem:[#allocation2] sm:$0xff] %vm1405_vm5, %v1403_v21  ;;  %v4063_v21 = vld [vmem:[%s4961_s12 + $0x10] sm:$0xff]  }
0x1923   : > { %v2297_v56 = vpop.permute.xlu0 %2296 }
0x1925   : > { %v1701_v7 = vpop.permute.xlu1 %1700 }
0x1926   : > { %v4134_v8 = vpop.eup %4133  ;;  %1704 = vst.msk [vmem:[#allocation2] sm:$0xff] %vm1703_vm6, %v1701_v7  ;;  %v4064_v7 = vld [vmem:[%s4961_s12 + $0x18] sm:$0xff]  }
0x1927   : > { %v2842_v62 = vmul.f32 %v4134_v8, %v4130_v25  ;;  %v3496_v25 = vld [vmem:[%s4958_s9] ss:$0 sm:$0xff] }
0x1928   : > { %v4136_v60 = vpop.eup %4135  ;;  %v4065_v8 = vld [vmem:[%s4961_s12 + $0x20] sm:$0xff]  }
0x1929   : > { %v2843_v63 = vmul.f32 %v4136_v60, %v4132_v27  ;;  %v1999_v54 = vpop.permute.xlu1 %1998  ;;  %v4066_v60 = vld [vmem:[%s4961_s12 + $0x28] sm:$0xff]  }
0x192a   : > { %2002 = vst.msk [vmem:[#allocation2] sm:$0xff] %vm2001_vm7, %v1999_v54  ;;  %v3497_v54 = vld [vmem:[%s4960_s11] ss:$0 sm:$0xff] }
0x192b   : > { %2300 = vst.msk [vmem:[#allocation2] sm:$0xff] %vm2299_vm8, %v2297_v56  ;;  %v2844_v57 = vpack.c.bf16 %v2843_v63, %v2842_v62  ;;  %v4067_v62 = vld [vmem:[%s4961_s12 + $0x30] sm:$0xff]   ;;  %v4068_v63 = vld [vmem:[%s4961_s12 + $0x38] sm:$0xff]  }
0x192d   : > { %v2595_v51 = vpop.permute.xlu1 %2594  ;;  %3921 = vmatmul.mubr.msk.bf16.vlgmr.msra.gmra.mrb[84].mxu1 %vm740_vm3, %v2844_v57 }
0x192e   : > { %2598 = vst.msk [vmem:[#allocation2] sm:$0xff] %vm2597_vm9, %v2595_v51  ;;  %3936 = vmatprep.mubr.msk.bf16.mxu1 %vm4216_vm1, %v4215_v15  ;;  %3933 = vmatpush3.bf16.msra.mxu1 %v4059_v6 }
0x192f   : > { %3934 = vmatprep.subr.bf16.mxu1 %v4215_v15 }
0x1932   : > { %3935 = vmatpush3.bf16.msra.mxu1 %v4060_v9 }
0x1a00   : > { %v2883_v29 = vpop.f32.mrb[84].mxu1 }
0x1a01   : > { %v3922_v30 = vpop.f32.mrb[85].mxu1 }
0x1a02   : > { %v2886_v31 = vpop.f32.mrb[86].mxu1 }
0x1a03   : > { %v2890_v32 = vpack.c.bf16 %v2886_v31, %v2883_v29  ;;  %v3923_v33 = vpop.f32.mrb[87].mxu1 }
0x1a05   : > { %2892 = vrot.lane.b32.xlu0 %v2890_v32, %s4223_s26  ;;  %s3248_s26 = sshll.u32 %s460_s25, 4  ;;  %s4904_s26 = int_to_ptr.vmem [resolvable:$true] %s3248_s26 }
0x1a06   : > { %s4151_s21 = scalar_lea.vmem %s4904_s26, 256  ;;  %p4158_p0 = scmp.lt.s32.totalorder %s4904_s26, %s4156_s0 }
0x1a07   : > { %p4152_p11 = scmp.ne.s32.totalorder %s4904_s26, %s4151_s21  ;;  %p4159_p1 = scmp.lt.s32.totalorder %s4157_s28, %s4151_s21 }
0x1a09   : > { %p4153_p12 = pnand %p4152_p11, %p4339_p5  ;;  %p4160_p2 = por %p4159_p1, %p4158_p0 }
0x1a0b   : > { %p4154_p13 = pneg %p4153_p12 }
0x1a0d   : > { %p4161_p3 = pnand %p4160_p2, %p4154_p13 }
0x1a77   : > { %v2893_v35 = vpop.permute.xlu0 %2892 }
0x1a78   : > { %2896 = vst.msk [vmem:[#allocation2] sm:$0xff] %vm2895_vm10, %v2893_v35 }
0x1a7f   : > { %v2897_v36 = vld [vmem:[#allocation2] sm:$0xff] }
0x1a80   : > { %3929 = vmatmul.mubr.msk.bf16.vlgmr.msra.gmra.mrb[72].mxu0 %vm471_vm0, %v2897_v36 }
0x1a81   : > { %3956 = vmatprep.mubr.msk.bf16.mxu0 %vm4216_vm1, %v4215_v15  ;;  %3941 = vmatpush3.bf16.msra.mxu0 %v4061_v18 }
0x1a82   : > { %3942 = vmatprep.subr.bf16.mxu0 %v4215_v15 }
0x1a85   : > { %3943 = vmatpush3.bf16.msra.mxu0 %v4062_v20 }
0x1a86   : > { %3944 = vmatprep.subr.bf16.mxu0 %v4215_v15 }
0x1a89   : > { %3945 = vmatpush3.bf16.msra.mxu0 %v4063_v21 }
0x1a8a   : > { %3946 = vmatprep.subr.bf16.mxu0 %v4215_v15 }
0x1a8d   : > { %3947 = vmatpush3.bf16.msra.mxu0 %v4064_v7 }
0x1a8e   : > { %3948 = vmatprep.subr.bf16.mxu0 %v4215_v15 }
0x1a91   : > { %3949 = vmatpush3.bf16.msra.mxu0 %v4065_v8 }
0x1a92   : > { %3950 = vmatprep.subr.bf16.mxu0 %v4215_v15 }
0x1a95   : > { %3951 = vmatpush3.bf16.msra.mxu0 %v4066_v60 }
0x1a96   : > { %3952 = vmatprep.subr.bf16.mxu0 %v4215_v15 }
0x1a99   : > { %3953 = vmatpush3.bf16.msra.mxu0 %v4067_v62 }
0x1a9a   : > { %3954 = vmatprep.subr.bf16.mxu0 %v4215_v15 }
0x1a9d   : > { %3955 = vmatpush3.bf16.msra.mxu0 %v4068_v63 }
0x1b53   : > { %v2951_v37 = vpop.f32.mrb[72].mxu0 }
0x1b54   : > { %v2958_v40 = vadd.f32 %v4149_v39, %v2951_v37  ;;  %v3930_v41 = vpop.f32.mrb[73].mxu0 }
0x1b55   : > { %v2954_v42 = vpop.f32.mrb[74].mxu0 }
0x1b56   : > { %v4830_v43 = vadd.f32 %v3494_v38, %v2958_v40  ;;  %v2959_v45 = vadd.f32 %v4150_v44, %v2954_v42  ;;  %v3931_v46 = vpop.f32.mrb[75].mxu0 }
0x1b58   : > { %v4833_v47 = vadd.f32 %v3494_v38, %v2959_v45  ;;  %v2971_v48 = vsel %vm471_vm0, %v4830_v43, 0.0 }
0x1b59   : > { %2972 = vadd.xlane.f32.xlu1 %v2971_v48 }
0x1b5a   : > { %v2974_v49 = vsel %vm471_vm0, %v4833_v47, 0.0 }
0x1b5b   : > { %2975 = vadd.xlane.f32.xlu0 %v2974_v49 }
0x1be6   : > { %v2973_v50 = vpop.xlane.xlu1 %2972 }
0x1be7   : > { %v2977_v52 = vmul.f32 0.03125, %v2973_v50 }
0x1be8   : > { %v2976_v58 = vpop.xlane.xlu0 %2975 }
0x1be9   : > { %v2979_v59 = vsub.f32 %v4830_v43, %v2977_v52  ;;  %v2978_v61 = vmul.f32 0.03125, %v2976_v58  ;;  %v3501_v52 = vld [vmem:[%s4962_s13] ss:$0 sm:$0xff] }
0x1beb   : > { %v2980_v0 = vsub.f32 %v4833_v47, %v2978_v61  ;;  %v2981_v1 = vmul.f32 %v2979_v59, %v2979_v59 }
0x1bed   : > { %v2983_v2 = vsel %vm471_vm0, %v2981_v1, 0.0  ;;  %v2982_v3 = vmul.f32 %v2980_v0, %v2980_v0 }
0x1bee   : > { %2984 = vadd.xlane.f32.xlu0 %v2983_v2 }
0x1bef   : > { %v2986_v4 = vsel %vm471_vm0, %v2982_v3, 0.0 }
0x1bf2   : > { %2987 = vadd.xlane.f32.xlu0 %v2986_v4 }
0x1c7b   : > { %v2985_v34 = vpop.xlane.xlu0 %2984 }
0x1c7c   : > { %v2989_v10 = vmul.f32 0.03125, %v2985_v34 }
0x1c7e   : > { %v2991_v11 = vadd.f32 1e-05, %v2989_v10 }
0x1c7f   : > { %v2988_v12 = vpop.xlane.xlu0 %2987 }
0x1c80   : > { %4137 = vrsqrt.f32 %v2991_v11  ;;  %v2990_v13 = vmul.f32 0.03125, %v2988_v12 }
0x1c82   : > { %v2992_v14 = vadd.f32 1e-05, %v2990_v13 }
0x1c84   : > { %4139 = vrsqrt.f32 %v2992_v14 }
0x1c8a   : > { %v4138_v16 = vpop.eup %4137 }
0x1c8b   : > { %v2995_v17 = vmul.f32 %v4138_v16, %v2979_v59 }
0x1c8d   : > { %v3003_v23 = vmul.f32 %v3495_v19, %v2995_v17 }
0x1c8e   : > { %v4140_v22 = vpop.eup %4139 }
0x1c8f   : > { %v2996_v24 = vmul.f32 %v4140_v22, %v2980_v0  ;;  %v3011_v27 = vadd.f32 %v3496_v25, %v3003_v23 }
0x1c91   : > { %v3004_v26 = vmul.f32 %v3495_v19, %v2996_v24 }
0x1c93   : > { %v3012_v28 = vadd.f32 %v3496_v25, %v3004_v26 }
0x1c95   : > { %v3013_v5 = vpack.c.bf16 %v3012_v28, %v3011_v27 }
0x1c97   : > { %3937 = vmatmul.mubr.msk.bf16.vlgmr.msra.gmra.mrb[88].mxu1 %vm471_vm0, %v3013_v5 }
0x1d6a   : > { %v3074_v56 = vpop.f32.mrb[88].mxu1 }
0x1d6b   : > { %v3075_v57 = vadd.f32 %v3497_v54, %v3074_v56  ;;  %v3938_v51 = vpop.f32.mrb[89].mxu1 }
0x1d6c   : > { %v3077_v53 = vpop.f32.mrb[90].mxu1 }
0x1d6d   : > { %v3083_v55 = vmul.f32 0.044715, %v3075_v57  ;;  %v3078_v29 = vadd.f32 %v3497_v54, %v3077_v53  ;;  %v3939_v30 = vpop.f32.mrb[91].mxu1  ;;  %v3081_v44 = vmul.f32 0.5, %v3075_v57 }
0x1d6f   : > { %v3085_v31 = vmul.f32 %v3083_v55, %v3075_v57  ;;  %v3084_v32 = vmul.f32 0.044715, %v3078_v29  ;;  %v3082_v45 = vmul.f32 0.5, %v3078_v29 }
0x1d71   : > { %v3087_v33 = vmul.f32 %v3085_v31, %v3075_v57  ;;  %v3086_v35 = vmul.f32 %v3084_v32, %v3078_v29 }
0x1d73   : > { %v3089_v36 = vadd.f32 %v3087_v33, %v3075_v57  ;;  %v3088_v37 = vmul.f32 %v3086_v35, %v3078_v29 }
0x1d75   : > { %v3091_v38 = vmul.f32 0.7978846, %v3089_v36  ;;  %v3090_v15 = vadd.f32 %v3088_v37, %v3078_v29 }
0x1d77   : > { %4141 = vtanh.f32 %v3091_v38  ;;  %v3092_v39 = vmul.f32 0.7978846, %v3090_v15 }
0x1d79   : > { %4143 = vtanh.f32 %v3092_v39 }
0x1d81   : > { %v4142_v40 = vpop.eup %4141 }
0x1d82   : > { %v3095_v41 = vadd.f32 1.0, %v4142_v40 }
0x1d83   : > { %v4144_v42 = vpop.eup %4143 }
0x1d84   : > { %v3096_v46 = vadd.f32 1.0, %v4144_v42  ;;  %v3097_v48 = vmul.f32 %v3095_v41, %v3081_v44 }
0x1d86   : > { %v3098_v49 = vmul.f32 %v3096_v46, %v3082_v45 }
0x1d88   : > { %v3099_v50 = vpack.c.bf16 %v3098_v49, %v3097_v48 }
0x1d8a   : > { %3957 = vmatmul.mubr.bf16.vlgmr.msra.gmra.mrb[76].mxu0 %v3099_v50 }
0x1e5d   : > { %v3205_v58 = vpop.f32.mrb[76].mxu0 }
0x1e5e   : > { %v3206_v59 = vadd.f32 %v3501_v52, %v3205_v58  ;;  %v3958_v61 = vpop.f32.mrb[77].mxu0 }
0x1e5f   : > { %v3208_v0 = vpop.f32.mrb[78].mxu0 }
0x1e60   : > { %v3214_v1 = vmul.f32 0.044715, %v3206_v59  ;;  %v3209_v2 = vadd.f32 %v3501_v52, %v3208_v0  ;;  %v3959_v3 = vpop.f32.mrb[79].mxu0  ;;  %v3212_v17 = vmul.f32 0.5, %v3206_v59 }
0x1e62   : > { %v3216_v4 = vmul.f32 %v3214_v1, %v3206_v59  ;;  %v3215_v6 = vmul.f32 0.044715, %v3209_v2  ;;  %v3213_v24 = vmul.f32 0.5, %v3209_v2 }
0x1e64   : > { %v3218_v9 = vmul.f32 %v3216_v4, %v3206_v59  ;;  %v3217_v34 = vmul.f32 %v3215_v6, %v3209_v2 }
0x1e66   : > { %v3220_v10 = vadd.f32 %v3218_v9, %v3206_v59  ;;  %v3219_v11 = vmul.f32 %v3217_v34, %v3209_v2 }
0x1e68   : > { %v3222_v12 = vmul.f32 0.7978846, %v3220_v10  ;;  %v3221_v13 = vadd.f32 %v3219_v11, %v3209_v2 }
0x1e6a   : > { %4145 = vtanh.f32 %v3222_v12  ;;  %v3223_v14 = vmul.f32 0.7978846, %v3221_v13 }
0x1e6c   : > { %4147 = vtanh.f32 %v3223_v14 }
0x1e74   : > { %v4146_v16 = vpop.eup %4145 }
0x1e75   : > { %v3226_v19 = vadd.f32 1.0, %v4146_v16 }
0x1e76   : > { %v4148_v22 = vpop.eup %4147 }
0x1e77   : > { %v3228_v23 = vmul.f32 %v3226_v19, %v3212_v17  ;;  %v3227_v25 = vadd.f32 1.0, %v4148_v22 }
0x1e79   : > { %v3229_v26 = vmul.f32 %v3227_v25, %v3213_v24  ;;  %v3230_v27 = vadd.f32 %v3228_v23, %v4830_v43 }
0x1e7b   : > { %v3231_v28 = vadd.f32 %v3229_v26, %v4833_v47  ;;  %3232 = vst.msk [vmem:[%s460_s25] sm:$0xff] %vm471_vm0, %v3230_v27 }
0x1e7d   : > { %3233 = vst.msk [vmem:[%s460_s25 + $0x8] sm:$0xff] %vm471_vm0, %v3231_v28 }
0x1e7e   : > { %4164 = shalt.err (!%p4161_p3)
}
0x1e7f   : > { %s4165_s18 = scalar_lea.hbm %s4900_s20, 256  ;;  %s4169_s27 = scalar_lea.hbm %s4963_s14, 512 }
0x1e80   : > { %p4166_p4 = scmp.ne.s32.totalorder %s4900_s20, %s4165_s18  ;;  %p4170_p9 = scmp.lt.u32.totalorder %s4900_s20, %s4963_s14 }
0x1e81   : > { %p4171_p10 = scmp.lt.u32.totalorder %s4169_s27, %s4165_s18  ;;  %p4173_p12 = scmp.lt.u32.totalorder %s4165_s18, %s4900_s20 }
0x1e82   : > { %p4167_p7 = pnand %p4166_p4, %p4339_p5 }
0x1e83   : > { %p4172_p11 = por %p4171_p10, %p4170_p9 }
0x1e84   : > { %p4168_p8 = pneg %p4167_p7 }
0x1e85   : > { %p4174_p13 = por %p4173_p12, %p4172_p11 }
0x1e87   : > { %p4175_p0 = pnand %p4174_p13, %p4168_p8 }
0x1e89   : > { %4178 = shalt.err (!%p4175_p0)
}
0x1e8a   : > { %s4225_s21 = smov 128   ;;  %s4973_s28 = smov 8  }
0x1e8b   : > { %3960 = dma.vmem_to_hbm [thread:$0]  (%p4339_p5), %s4904_s26, 256, %s4900_s20, %s4907_s17, %s4225_s21, %s4225_s21, %s4973_s28  }
0x1e8c PF: > { %p3966_p1 = scmp.ge.s32.totalorder %s4213_s16, 2  ;;  %s3263_s1 = sand.u32 1, %s4201_s29  }
0x1e8d   : > { %s3264_s2 = scalar_lea.sflag [#allocation4], %s3263_s1 }
0x1e8e   : > { %p3963_p2 = pnand %p3966_p1, %p4343_p6 }
0x1e90   : > { %4196 = dma.done.wait (!%p3963_p2), %s3264_s2, 256  }
0x1e91   : > { %4198 = vsyncadd (!%p3963_p2), %s3264_s2, 4294967040  ;;  %p24_p3 = scmp.ge.s32.totalorder %s4326_s19, 4   ;;  %s4974_s29 = smov %s4205_s30 }
0x1e92   : > { %s4975_s30 = smov %s4209_s15  ;;  %s4976_s15 = smov %s4337_s22 }
0x1e93   : > { %s4977_s16 = smov %s4326_s19  ;;  %26 = sbr.rel (!%p24_p3) target bundleno = 7 (0x7), region = 132 }
0x1e9a   :  { %3269 = vsyncpa [#allocation4], 1 }
0x1e9b   :  { %3271 = vsyncpa [#allocation4 + $0x1], 1 }

// kernel: tpu_custom_call.1
= control target key start
LH: loop header
LB: loop body
LE: loop exit
PB: predicated region body
PF: predicated region fallthrough
CT: control target
= control target key end

     0   :  { %s4949_s0 = inlined_call_operand.vmem [shape: f32[2,16,32], index: 0, kind: input, shape index: {}]   ;;  %s4950_s1 = inlined_call_operand.vmem [shape: f32[1,32], index: 1, kind: input, shape index: {}]   ;;  %s4951_s2 = inlined_call_operand.vmem [shape: f32[1,32], index: 2, kind: input, shape index: {}]   ;;  %s4952_s3 = inlined_call_operand.vmem [shape: bf16[8,32,4], index: 3, kind: input, shape index: {}]   ;;  %s4953_s4 = inlined_call_operand.vmem [shape: bf16[8,32,4], index: 4, kind: input, shape index: {}]   ;;  %s4954_s5 = inlined_call_operand.vmem [shape: bf16[8,32,4], index: 5, kind: input, shape index: {}]   ;;  %s4955_s6 = inlined_call_operand.vmem [shape: bf16[32,32], index: 6, kind: input, shape index: {}]   ;;  %s4956_s7 = inlined_call_operand.vmem [shape: f32[1,32], index: 7, kind: input, shape index: {}]   ;;  %s4957_s8 = inlined_call_operand.vmem [shape: f32[1,32], index: 8, kind: input, shape index: {}]   ;;  %s4958_s9 = inlined_call_operand.vmem [shape: f32[1,32], index: 9, kind: input, shape index: {}]   ;;  %s4959_s10 = inlined_call_operand.vmem [shape: bf16[32,128], index: 10, kind: input, shape index: {}]   ;;  %s4960_s11 = inlined_call_operand.vmem [shape: f32[1,128], index: 11, kind: input, shape index: {}]   ;;  %s4961_s12 = inlined_call_operand.vmem [shape: bf16[128,32], index: 12, kind: input, shape index: {}]   ;;  %s4962_s13 = inlined_call_operand.vmem [shape: f32[1,32], index: 13, kind: input, shape index: {}]   ;;  %s4963_s14 = inlined_call_operand.hbm [shape: f32[2,16,32], index: 14, kind: output, shape index: {}]  }
   0x1   :  { %4965 = sst [smem:[#allocation6_spill]] %s4949_s0 }
   0x2   :  { %4966 = sst [smem:[#allocation7_spill]] %s4950_s1 }
   0x3   :  { %4967 = sst [smem:[#allocation8_spill]] %s4951_s2 }
   0x4   :  { %19 = vsyncpa [#allocation4], 0 }
   0x5   :  { %21 = vsyncpa [#allocation4 + $0x1], 0  ;;  %s4301_s29 = smov 0   ;;  %s4303_s30 = smov 0  }
   0x6   :  { %s4305_s15 = smov 0   ;;  %s4307_s16 = smov 0  }
   0x7 LB: > { %s4322_s17 = sadd.s32 4294967295, %s4213_s16   ;;  %s3310_s18 = sadd.s32 4294967294, %s4213_s16   ;;  %s4213_s16 = sphi %s4307_s16, %s4977_s16   ;;  %s4209_s15 = sphi %s4305_s15, %s4976_s15   ;;  %s4205_s30 = sphi %s4303_s30, %s4975_s30   ;;  %s4201_s29 = sphi %s4301_s29, %s4974_s29  }
   0x8   : > { %s4326_s19 = sadd.s32 1, %s4213_s16   ;;  %s333_s20 = sadd.s32 1, %s4209_s15 }
   0x9   : > { %s330_s21 = ssub.s32 %s4213_s16, %s4326_s19  ;;  %p343_p0 = scmp.ne.s32.totalorder %s4209_s15, %s4205_s30 }
   0xa   : > { %p331_p1 = scmp.eq.s32.totalorder %s330_s21, 0  ;;  %p344_p2 = scmp.eq.s32.totalorder %s4322_s17, 1 }
   0xb   : > { %p349_p3 = scmp.ne.s32.totalorder %s4205_s30, %s4201_s29  ;;  %p350_p4 = scmp.eq.s32.totalorder %s3310_s18, 1 }
   0xc   : > { %s4337_s22 = scalar_select %p331_p1, %s4209_s15, %s333_s20  }
   0xd   : > { %p4339_p5 = por %p344_p2, %p343_p0  ;;  %p4343_p6 = por %p350_p4, %p349_p3 }
   0xe   : > { %p3313_p7 = scmp.ge.s32.totalorder %s4213_s16, 1  ;;  %p415_p8 = scmp.lt.s32.totalorder %s4213_s16, 3 }
  0x10   : > { %p416_p9 = pnand %p3313_p7, %p415_p8 }
  0x11   : > { %p461_p10 = scmp.lt.s32.totalorder (!%p416_p9), %s4322_s17, 1  ;;  %vm471_vm0 = vcmask (!%p416_p9), 261120   ;;  %s4970_s0 = sld [smem:[#allocation6_spill]] (!%p416_p9)  ;;  %v4009_v14 = vld [vmem:[%s4952_s3] sm:$0xff] (!%p416_p9)   ;;  %v4215_v15 = vmov (!%p416_p9), 0.0   ;;  %v4010_v16 = vld [vmem:[%s4952_s3 + $0x8] sm:$0xff] (!%p416_p9)  }
  0x12   : > { %419 = sbr.rel (%p416_p9) target bundleno = 7820 (0x1e8c), region = 76  ;;  %3636 = vmatprep.subr.bf16.mxu1 (!%p416_p9), %v4215_v15  ;;  %3666 = vmatprep.subr.bf16.mxu0 (!%p416_p9), %v4215_v15  ;;  %vm4216_vm1 = vmmov (!%p416_p9), 0   ;;  %s4971_s1 = sld [smem:[#allocation7_spill]] (!%p416_p9)  ;;  %v4011_v33 = vld [vmem:[%s4953_s4] sm:$0xff] (!%p416_p9)   ;;  %v4012_v35 = vld [vmem:[%s4953_s4 + $0x8] sm:$0xff] (!%p416_p9)   ;;  %vm692_vm2 = vcmask (!%p416_p9), 31744  }
  0x13   : > { %3637 = vmatpush3.bf16.msra.mxu1 (!%p416_p9), %v4009_v14  ;;  %3640 = vmatprep.mubr.msk.bf16.mxu1 (!%p416_p9), %vm4216_vm1, %v4215_v15  ;;  %s4972_s2 = sld [smem:[#allocation8_spill]] (!%p416_p9)  ;;  %v4013_v36 = vld [vmem:[%s4954_s5] sm:$0xff] (!%p416_p9)   ;;  %v4014_v37 = vld [vmem:[%s4954_s5 + $0x8] sm:$0xff] (!%p416_p9)   ;;  %v4015_v52 = vld [vmem:[%s4952_s3 + $0x10] sm:$0xff] (!%p416_p9)   ;;  %vm740_vm3 = vcmask (!%p416_p9), 130048   ;;  %s4964_s27 = smov (!%p416_p9), 8  }
  0x14   : > { %3638 = vmatprep.subr.bf16.mxu1 (!%p416_p9), %v4215_v15  ;;  %3668 = vmatprep.mubr.msk.bf16.mxu0 (!%p416_p9), %vm4216_vm1, %v4215_v15  ;;  %v4016_v55 = vld [vmem:[%s4952_s3 + $0x18] sm:$0xff] (!%p416_p9)   ;;  %v4017_v56 = vld [vmem:[%s4954_s5 + $0x10] sm:$0xff] (!%p416_p9)   ;;  %s4218_s28 = smov (!%p416_p9), 4   ;;  %s4219_s20 = smov (!%p416_p9), 12   ;;  %vm1107_vm4 = vcmask (!%p416_p9), 64544   ;;  %vm1405_vm5 = vcmask (!%p416_p9), 97344  }
  0x15   : > { %v4018_v57 = vld [vmem:[%s4954_s5 + $0x18] sm:$0xff] (!%p416_p9)   ;;  %s4220_s21 = smov (!%p416_p9), 20   ;;  %vm1703_vm6 = vcmask (!%p416_p9), 130144   ;;  %vm2001_vm7 = vcmask (!%p416_p9), 162944   ;;  %vm2299_vm8 = vcmask (!%p416_p9), 195744   ;;  %vm2597_vm9 = vcmask (!%p416_p9), 228544  }
  0x16   : > { %vm2895_vm10 = vcmask (!%p416_p9), 261344  }
  0x17   : > { %3639 = vmatpush3.bf16.msra.mxu1 (!%p416_p9), %v4010_v16 }
  0x18   : > { %3644 = vmatprep.subr.bf16.mxu1 (!%p416_p9), %v4215_v15  ;;  %v3317_v25 = vld [vmem:[%s4971_s1] ss:$0 sm:$0xff] (!%p416_p9) }
  0x19   : > { %s462_s25 = scalar_select %p461_p10, %s4322_s17, 1  ;;  %v3318_v29 = vld [vmem:[%s4972_s2] ss:$0 sm:$0xff] }
  0x1b   : > { %s3515_s26 = sshll.u32 %s462_s25, 4  ;;  %s4221_s25 = smov 16  }
  0x1c   : > { %s4354_s18 = scalar_lea.vmem %s4970_s0, %s3515_s26  ;;  %s4222_s26 = smov 24  }
  0x1d   : > { %v467_v0 = vld [vmem:[%s4354_s18] sm:$0xff]  ;;  %v468_v1 = vld [vmem:[%s4354_s18 + $0x8] sm:$0xff] }
  0x1e   : > { %v472_v2 = vsel %vm471_vm0, %v467_v0, 0.0  ;;  %v475_v3 = vsel %vm471_vm0, %v468_v1, 0.0 }
  0x1f   : > { %473 = vadd.xlane.f32.xlu0 %v472_v2 }
  0x23   : > { %476 = vadd.xlane.f32.xlu0 %v475_v3 }
  0xac   : > { %v474_v4 = vpop.xlane.xlu0 %473 }
  0xad   : > { %v479_v5 = vmul.f32 0.03125, %v474_v4 }
  0xaf   : > { %v481_v6 = vsub.f32 %v467_v0, %v479_v5 }
  0xb0   : > { %v477_v7 = vpop.xlane.xlu0 %476 }
  0xb1   : > { %v480_v8 = vmul.f32 0.03125, %v477_v7  ;;  %v483_v9 = vmul.f32 %v481_v6, %v481_v6 }
  0xb3   : > { %v482_v10 = vsub.f32 %v468_v1, %v480_v8  ;;  %v485_v11 = vsel %vm471_vm0, %v483_v9, 0.0 }
  0xb4   : > { %486 = vadd.xlane.f32.xlu1 %v485_v11 }
  0xb5   : > { %v484_v12 = vmul.f32 %v482_v10, %v482_v10 }
  0xb7   : > { %v488_v13 = vsel %vm471_vm0, %v484_v12, 0.0 }
  0xb8   : > { %489 = vadd.xlane.f32.xlu1 %v488_v13 }
 0x141   : > { %v487_v17 = vpop.xlane.xlu1 %486 }
 0x142   : > { %v491_v18 = vmul.f32 0.03125, %v487_v17 }
 0x144   : > { %v493_v19 = vadd.f32 1e-05, %v491_v18 }
 0x145   : > { %v490_v20 = vpop.xlane.xlu1 %489 }
 0x146   : > { %4069 = vrsqrt.f32 %v493_v19  ;;  %v492_v21 = vmul.f32 0.03125, %v490_v20 }
 0x148   : > { %v494_v22 = vadd.f32 1e-05, %v492_v21 }
 0x14a   : > { %4071 = vrsqrt.f32 %v494_v22 }
 0x150   : > { %v4070_v23 = vpop.eup %4069 }
 0x151   : > { %v497_v24 = vmul.f32 %v4070_v23, %v481_v6 }
 0x153   : > { %v505_v27 = vmul.f32 %v3317_v25, %v497_v24 }
 0x154   : > { %v4072_v26 = vpop.eup %4071 }
 0x155   : > { %v498_v28 = vmul.f32 %v4072_v26, %v482_v10  ;;  %v513_v31 = vadd.f32 %v3318_v29, %v505_v27  ;;  %v4019_v27 = vld [vmem:[%s4953_s4 + $0x10] sm:$0xff]  }
 0x157   : > { %v506_v30 = vmul.f32 %v3317_v25, %v498_v28 }
 0x159   : > { %v514_v32 = vadd.f32 %v3318_v29, %v506_v30  ;;  %v4020_v29 = vld [vmem:[%s4953_s4 + $0x18] sm:$0xff]  }
 0x15b   : > { %v4385_v34 = vpack.c.bf16 %v514_v32, %v513_v31 }
 0x15d   : > { %3641 = vmatmul.mubr.msk.bf16.vlgmr.msra.gmra.mrb[0].mxu1 %vm471_vm0, %v4385_v34 }
 0x15e   : > { %3645 = vmatpush3.bf16.msra.mxu1 %v4011_v33  ;;  %3648 = vmatprep.mubr.msk.bf16.mxu1 %vm4216_vm1, %v4215_v15 }
 0x15f   : > { %3646 = vmatprep.subr.bf16.mxu1 %v4215_v15 }
 0x162   : > { %3647 = vmatpush3.bf16.msra.mxu1 %v4012_v35 }
 0x163   : > { %3652 = vmatprep.subr.bf16.mxu1 %v4215_v15 }
 0x165   : > { %3649 = vmatmul.mubr.msk.bf16.vlgmr.msra.gmra.mrb[4].mxu1 %vm471_vm0, %v4385_v34 }
 0x166   : > { %3653 = vmatpush3.bf16.msra.mxu1 %v4013_v36  ;;  %3656 = vmatprep.mubr.msk.bf16.mxu1 %vm4216_vm1, %v4215_v15 }
 0x167   : > { %3654 = vmatprep.subr.bf16.mxu1 %v4215_v15 }
 0x16a   : > { %3655 = vmatpush3.bf16.msra.mxu1 %v4014_v37 }
 0x16b   : > { %3660 = vmatprep.subr.bf16.mxu1 %v4215_v15 }
 0x16d   : > { %3657 = vmatmul.mubr.msk.bf16.vlgmr.msra.gmra.mrb[8].mxu1 %vm471_vm0, %v4385_v34 }
 0x16e   : > { %3662 = vmatprep.mubr.msk.bf16.mxu1 %vm4216_vm1, %v4215_v15 }
 0x230   : > { %v569_v38 = vpop.f32.mrb[0].mxu1 }
 0x231   : > { %v3642_v39 = vpop.f32.mrb[1].mxu1 }
 0x232   : > { %v572_v40 = vpop.f32.mrb[2].mxu1 }
 0x233   : > { %v690_v41 = vpack.c.bf16 %v572_v40, %v569_v38  ;;  %v3643_v42 = vpop.f32.mrb[3].mxu1 }
 0x234   : > { %v4021_v42 = vld [vmem:[%s4952_s3 + $0x20] sm:$0xff]  }
 0x238   : > { %v626_v43 = vpop.f32.mrb[4].mxu1 }
 0x239   : > { %v3650_v44 = vpop.f32.mrb[5].mxu1 }
 0x23a   : > { %v629_v45 = vpop.f32.mrb[6].mxu1  ;;  %v4023_v44 = vld [vmem:[%s4954_s5 + $0x20] sm:$0xff]  }
 0x23b   : > { %v691_v46 = vpack.c.bf16 %v629_v45, %v626_v43  ;;  %v3651_v47 = vpop.f32.mrb[7].mxu1  ;;  %v4022_v43 = vld [vmem:[%s4952_s3 + $0x28] sm:$0xff]  }
 0x23c   : > { %v4024_v45 = vld [vmem:[%s4954_s5 + $0x28] sm:$0xff]  }
 0x23d   : > { %v697_v48 = vsel %vm692_vm2, %v691_v46, 0 }
 0x23e   : > { %3661 = vmatpush3.bf16.xpose.msra.mxu1 %v697_v48 }
 0x23f   : > { %3672 = vmatprep.subr.bf16.mxu1 %v4215_v15 }
 0x240   : > { %v683_v49 = vpop.f32.mrb[8].mxu1 }
 0x241   : > { %v3658_v50 = vpop.f32.mrb[9].mxu1 }
 0x242   : > { %v686_v51 = vpop.f32.mrb[10].mxu1 }
 0x243   : > { %v764_v53 = vpack.c.bf16 %v686_v51, %v683_v49  ;;  %v3659_v54 = vpop.f32.mrb[11].mxu1 }
 0x245   : > { %3663 = vmatmul.mubr.msk.bf16.vlgmr.msra.gmra.mrb[12].mxu1 %vm692_vm2, %v690_v41  ;;  %3667 = vmatpush3.bf16.msra.mxu0 %v764_v53 }
 0x246   : > { %3673 = vmatpush3.bf16.msra.mxu1 %v4015_v52  ;;  %3676 = vmatprep.mubr.msk.bf16.mxu1 %vm4216_vm1, %v4215_v15 }
 0x247   : > { %3674 = vmatprep.subr.bf16.mxu1 %v4215_v15  ;;  %3680 = vmatprep.subr.bf16.mxu0 %v4215_v15 }
 0x24a   : > { %3675 = vmatpush3.bf16.msra.mxu1 %v4016_v55 }
 0x24b   : > { %3688 = vmatprep.subr.bf16.mxu1 %v4215_v15 }
 0x24d   : > { %3677 = vmatmul.mubr.msk.bf16.vlgmr.msra.gmra.mrb[16].mxu1 %vm471_vm0, %v4385_v34 }
 0x24e   : > { %3689 = vmatpush3.bf16.msra.mxu1 %v4017_v56  ;;  %3692 = vmatprep.mubr.msk.bf16.mxu1 %vm4216_vm1, %v4215_v15 }
 0x24f   : > { %3690 = vmatprep.subr.bf16.mxu1 %v4215_v15 }
 0x252   : > { %3691 = vmatpush3.bf16.msra.mxu1 %v4018_v57 }
 0x253   : > { %3702 = vmatprep.subr.bf16.mxu1 %v4215_v15 }
 0x255   : > { %3693 = vmatmul.mubr.msk.bf16.vlgmr.msra.gmra.mrb[20].mxu1 %vm471_vm0, %v4385_v34 }
 0x256   : > { %3704 = vmatprep.mubr.msk.bf16.mxu1 %vm4216_vm1, %v4215_v15 }
 0x318   : > { %v733_v58 = vpop.f32.mrb[12].mxu1 }
 0x319   : > { %v3664_v59 = vpop.f32.mrb[13].mxu1  ;;  %v741_v60 = vsel %vm740_vm3, %v733_v58, -inf }
 0x31a   : > { %742 = vmax.xlane.f32.xlu0 %v741_v60  ;;  %v736_v61 = vpop.f32.mrb[14].mxu1 }
 0x31b   : > { %v3665_v62 = vpop.f32.mrb[15].mxu1  ;;  %v744_v63 = vsel %vm740_vm3, %v736_v61, -inf }
 0x31c   : > { %745 = vmax.xlane.f32.xlu1 %v744_v63 }
 0x320   : > { %v862_v0 = vpop.f32.mrb[16].mxu1 }
 0x321   : > { %v3678_v1 = vpop.f32.mrb[17].mxu1 }
 0x322   : > { %v865_v2 = vpop.f32.mrb[18].mxu1 }
 0x323   : > { %v985_v3 = vpack.c.bf16 %v865_v2, %v862_v0  ;;  %v3679_v4 = vpop.f32.mrb[19].mxu1 }
 0x328   : > { %v978_v5 = vpop.f32.mrb[20].mxu1 }
 0x329   : > { %v3694_v6 = vpop.f32.mrb[21].mxu1 }
 0x32a   : > { %v981_v7 = vpop.f32.mrb[22].mxu1 }
 0x32b   : > { %v1057_v8 = vpack.c.bf16 %v981_v7, %v978_v5  ;;  %v3695_v9 = vpop.f32.mrb[23].mxu1 }
 0x32d   : > { %3703 = vmatpush3.bf16.msra.mxu1 %v1057_v8 }
 0x32e   : > { %3716 = vmatprep.subr.bf16.mxu1 %v4215_v15 }
 0x3a7   : > { %v743_v10 = vpop.xlane.xlu0 %742 }
 0x3a8   : > { %v747_v11 = vsub.f32 %v733_v58, %v743_v10 }
 0x3a9   : > { %v746_v12 = vpop.xlane.xlu1 %745 }
 0x3aa   : > { %v749_v13 = vmul.f32 1.442695, %v747_v11  ;;  %v748_v14 = vsub.f32 %v736_v61, %v746_v12 }
 0x3ac   : > { %4073 = vpow2.f32 %v749_v13  ;;  %v751_v16 = vmul.f32 1.442695, %v748_v14  ;;  %v4025_v14 = vld [vmem:[%s4953_s4 + $0x20] sm:$0xff]  }
 0x3ae   : > { %4075 = vpow2.f32 %v751_v16 }
 0x3b6   : > { %v4074_v17 = vpop.eup %4073 }
 0x3b7   : > { %v753_v18 = vsel %vm740_vm3, %v4074_v17, 0.0 }
 0x3b8   : > { %v4076_v19 = vpop.eup %4075  ;;  %754 = vadd.xlane.f32.xlu0 %v753_v18 }
 0x3b9   : > { %v756_v20 = vsel %vm740_vm3, %v4076_v19, 0.0 }
 0x3ba   : > { %757 = vadd.xlane.f32.xlu1 %v756_v20 }
 0x445   : > { %v755_v21 = vpop.xlane.xlu0 %754 }
 0x446   : > { %4077 = vrcp.f32 %v755_v21 }
 0x447   : > { %v758_v22 = vpop.xlane.xlu1 %757 }
 0x448   : > { %4079 = vrcp.f32 %v758_v22 }
 0x450   : > { %v4078_v23 = vpop.eup %4077 }
 0x451   : > { %v761_v25 = vmul.f32 %v4078_v23, %v4074_v17  ;;  %v4026_v17 = vld [vmem:[%s4953_s4 + $0x28] sm:$0xff]  }
 0x452   : > { %v4080_v24 = vpop.eup %4079 }
 0x453   : > { %v762_v26 = vmul.f32 %v4080_v24, %v4076_v19 }
 0x455   : > { %v763_v28 = vpack.c.bf16 %v762_v26, %v761_v25 }
 0x457   : > { %3669 = vmatmul.mubr.msk.bf16.vlgmr.msra.gmra.mrb[0].mxu0 %vm740_vm3, %v763_v28 }
 0x458   : > { %3681 = vmatpush3.bf16.msra.mxu0 %v4019_v27  ;;  %3684 = vmatprep.mubr.msk.bf16.mxu0 %vm4216_vm1, %v4215_v15 }
 0x459   : > { %3682 = vmatprep.subr.bf16.mxu0 %v4215_v15 }
 0x45c   : > { %3683 = vmatpush3.bf16.msra.mxu0 %v4020_v29  ;;  %v4027_v29 = vld [vmem:[%s4952_s3 + $0x30] sm:$0xff]  }
 0x45d   : > { %3696 = vmatprep.subr.bf16.mxu0 %v4215_v15 }
 0x45f   : > { %3685 = vmatmul.mubr.msk.bf16.vlgmr.msra.gmra.mrb[4].mxu0 %vm471_vm0, %v4385_v34 }
 0x460   : > { %3698 = vmatprep.mubr.msk.bf16.mxu0 %vm4216_vm1, %v4215_v15 }
 0x52a   : > { %v802_v30 = vpop.f32.mrb[0].mxu0 }
 0x52b   : > { %v3670_v31 = vpop.f32.mrb[1].mxu0 }
 0x52c   : > { %v805_v32 = vpop.f32.mrb[2].mxu0  ;;  %v4029_v31 = vld [vmem:[%s4954_s5 + $0x30] sm:$0xff]  }
 0x52d   : > { %v809_v33 = vpack.c.bf16 %v805_v32, %v802_v30  ;;  %v3671_v35 = vpop.f32.mrb[3].mxu0  ;;  %v4028_v30 = vld [vmem:[%s4952_s3 + $0x38] sm:$0xff]  }
 0x52e   : > { %v4030_v32 = vld [vmem:[%s4954_s5 + $0x38] sm:$0xff]  }
 0x52f   : > { %810 = vst.msk [vmem:[#allocation2] sm:$0xff] %vm692_vm2, %v809_v33 }
 0x532   : > { %v920_v36 = vpop.f32.mrb[4].mxu0 }
 0x533   : > { %v3686_v37 = vpop.f32.mrb[5].mxu0 }
 0x534   : > { %v923_v38 = vpop.f32.mrb[6].mxu0 }
 0x535   : > { %v986_v39 = vpack.c.bf16 %v923_v38, %v920_v36  ;;  %v3687_v40 = vpop.f32.mrb[7].mxu0 }
 0x537   : > { %v991_v41 = vsel %vm692_vm2, %v986_v39, 0 }
 0x538   : > { %3697 = vmatpush3.bf16.xpose.msra.mxu0 %v991_v41 }
 0x539   : > { %3708 = vmatprep.subr.bf16.mxu0 %v4215_v15 }
 0x53f   : > { %3699 = vmatmul.mubr.msk.bf16.vlgmr.msra.gmra.mrb[8].mxu0 %vm692_vm2, %v985_v3 }
 0x540   : > { %3709 = vmatpush3.bf16.msra.mxu0 %v4021_v42  ;;  %3712 = vmatprep.mubr.msk.bf16.mxu0 %vm4216_vm1, %v4215_v15 }
 0x541   : > { %3710 = vmatprep.subr.bf16.mxu0 %v4215_v15 }
 0x544   : > { %3711 = vmatpush3.bf16.msra.mxu0 %v4022_v43 }
 0x545   : > { %3724 = vmatprep.subr.bf16.mxu0 %v4215_v15 }
 0x547   : > { %3713 = vmatmul.mubr.msk.bf16.vlgmr.msra.gmra.mrb[12].mxu0 %vm471_vm0, %v4385_v34 }
 0x548   : > { %3725 = vmatpush3.bf16.msra.mxu0 %v4023_v44  ;;  %3728 = vmatprep.mubr.msk.bf16.mxu0 %vm4216_vm1, %v4215_v15 }
 0x549   : > { %3726 = vmatprep.subr.bf16.mxu0 %v4215_v15 }
 0x54c   : > { %3727 = vmatpush3.bf16.msra.mxu0 %v4024_v45 }
 0x54d   : > { %3738 = vmatprep.subr.bf16.mxu0 %v4215_v15 }
 0x54f   : > { %3729 = vmatmul.mubr.msk.bf16.vlgmr.msra.gmra.mrb[16].mxu0 %vm471_vm0, %v4385_v34 }
 0x550   : > { %3740 = vmatprep.mubr.msk.bf16.mxu0 %vm4216_vm1, %v4215_v15 }
 0x612   : > { %v1027_v46 = vpop.f32.mrb[8].mxu0 }
 0x613   : > { %v3700_v47 = vpop.f32.mrb[9].mxu0  ;;  %v1034_v48 = vsel %vm740_vm3, %v1027_v46, -inf }
 0x614   : > { %1035 = vmax.xlane.f32.xlu0 %v1034_v48  ;;  %v1030_v49 = vpop.f32.mrb[10].mxu0 }
 0x615   : > { %v3701_v50 = vpop.f32.mrb[11].mxu0  ;;  %v1037_v51 = vsel %vm740_vm3, %v1030_v49, -inf }
 0x616   : > { %1038 = vmax.xlane.f32.xlu1 %v1037_v51 }
 0x61a   : > { %v1160_v52 = vpop.f32.mrb[12].mxu0 }
 0x61b   : > { %v3714_v53 = vpop.f32.mrb[13].mxu0 }
 0x61c   : > { %v1163_v54 = vpop.f32.mrb[14].mxu0 }
 0x61d   : > { %v1283_v55 = vpack.c.bf16 %v1163_v54, %v1160_v52  ;;  %v3715_v56 = vpop.f32.mrb[15].mxu0 }
 0x622   : > { %v1276_v57 = vpop.f32.mrb[16].mxu0 }
 0x623   : > { %v3730_v58 = vpop.f32.mrb[17].mxu0 }
 0x624   : > { %v1279_v59 = vpop.f32.mrb[18].mxu0 }
 0x625   : > { %v1355_v60 = vpack.c.bf16 %v1279_v59, %v1276_v57  ;;  %v3731_v61 = vpop.f32.mrb[19].mxu0 }
 0x627   : > { %3739 = vmatpush3.bf16.msra.mxu0 %v1355_v60 }
 0x628   : > { %3752 = vmatprep.subr.bf16.mxu0 %v4215_v15 }
 0x6a1   : > { %v1036_v62 = vpop.xlane.xlu0 %1035 }
 0x6a2   : > { %v1040_v63 = vsub.f32 %v1027_v46, %v1036_v62 }
 0x6a3   : > { %v1039_v0 = vpop.xlane.xlu1 %1038 }
 0x6a4   : > { %v1042_v1 = vmul.f32 1.442695, %v1040_v63  ;;  %v1041_v2 = vsub.f32 %v1030_v49, %v1039_v0 }
 0x6a6   : > { %4081 = vpow2.f32 %v1042_v1  ;;  %v1044_v3 = vmul.f32 1.442695, %v1041_v2  ;;  %v4031_v2 = vld [vmem:[%s4953_s4 + $0x30] sm:$0xff]  }
 0x6a8   : > { %4083 = vpow2.f32 %v1044_v3 }
 0x6b0   : > { %v4082_v4 = vpop.eup %4081 }
 0x6b1   : > { %v1046_v5 = vsel %vm740_vm3, %v4082_v4, 0.0 }
 0x6b2   : > { %v4084_v6 = vpop.eup %4083  ;;  %1047 = vadd.xlane.f32.xlu0 %v1046_v5 }
 0x6b3   : > { %v1049_v7 = vsel %vm740_vm3, %v4084_v6, 0.0 }
 0x6b4   : > { %1050 = vadd.xlane.f32.xlu1 %v1049_v7 }
 0x73f   : > { %v1048_v8 = vpop.xlane.xlu0 %1047 }
 0x740   : > { %4085 = vrcp.f32 %v1048_v8 }
 0x741   : > { %v1051_v9 = vpop.xlane.xlu1 %1050 }
 0x742   : > { %4087 = vrcp.f32 %v1051_v9 }
 0x74a   : > { %v4086_v10 = vpop.eup %4085 }
 0x74b   : > { %v1054_v12 = vmul.f32 %v4086_v10, %v4082_v4  ;;  %v4032_v4 = vld [vmem:[%s4953_s4 + $0x38] sm:$0xff]  }
 0x74c   : > { %v4088_v11 = vpop.eup %4087 }
 0x74d   : > { %v1055_v13 = vmul.f32 %v4088_v11, %v4084_v6 }
 0x74f   : > { %v1056_v16 = vpack.c.bf16 %v1055_v13, %v1054_v12 }
 0x751   : > { %3705 = vmatmul.mubr.msk.bf16.vlgmr.msra.gmra.mrb[24].mxu1 %vm740_vm3, %v1056_v16 }
 0x752   : > { %3717 = vmatpush3.bf16.msra.mxu1 %v4025_v14  ;;  %3720 = vmatprep.mubr.msk.bf16.mxu1 %vm4216_vm1, %v4215_v15 }
 0x753   : > { %3718 = vmatprep.subr.bf16.mxu1 %v4215_v15 }
 0x756   : > { %3719 = vmatpush3.bf16.msra.mxu1 %v4026_v17  ;;  %v4033_v17 = vld [vmem:[%s4952_s3 + $0x40] sm:$0xff]  }
 0x757   : > { %3732 = vmatprep.subr.bf16.mxu1 %v4215_v15 }
 0x759   : > { %3721 = vmatmul.mubr.msk.bf16.vlgmr.msra.gmra.mrb[28].mxu1 %vm471_vm0, %v4385_v34 }
 0x75a   : > { %3734 = vmatprep.mubr.msk.bf16.mxu1 %vm4216_vm1, %v4215_v15 }
 0x824   : > { %v4512_v18 = vpop.f32.mrb[24].mxu1 }
 0x825   : > { %v3706_v19 = vpop.f32.mrb[25].mxu1 }
 0x826   : > { %v4514_v20 = vpop.f32.mrb[26].mxu1  ;;  %v4034_v19 = vld [vmem:[%s4952_s3 + $0x48] sm:$0xff]  }
 0x827   : > { %v1102_v21 = vpack.c.bf16 %v4514_v20, %v4512_v18  ;;  %v3707_v22 = vpop.f32.mrb[27].mxu1 }
 0x828   : > { %v4035_v22 = vld [vmem:[%s4954_s5 + $0x40] sm:$0xff]  }
 0x82c   : > { %v1218_v23 = vpop.f32.mrb[28].mxu1 }
 0x82d   : > { %v3722_v24 = vpop.f32.mrb[29].mxu1 }
 0x82e   : > { %v1221_v25 = vpop.f32.mrb[30].mxu1 }
 0x82f   : > { %v1284_v26 = vpack.c.bf16 %v1221_v25, %v1218_v23  ;;  %v3723_v27 = vpop.f32.mrb[31].mxu1  ;;  %v4036_v23 = vld [vmem:[%s4954_s5 + $0x48] sm:$0xff]  }
 0x831   : > { %v1289_v28 = vsel %vm692_vm2, %v1284_v26, 0 }
 0x832   : > { %3733 = vmatpush3.bf16.xpose.msra.mxu1 %v1289_v28 }
 0x833   : > { %3744 = vmatprep.subr.bf16.mxu1 %v4215_v15 }
 0x839   : > { %3735 = vmatmul.mubr.msk.bf16.vlgmr.msra.gmra.mrb[32].mxu1 %vm692_vm2, %v1283_v55 }
 0x83a   : > { %3745 = vmatpush3.bf16.msra.mxu1 %v4027_v29  ;;  %3748 = vmatprep.mubr.msk.bf16.mxu1 %vm4216_vm1, %v4215_v15 }
 0x83b   : > { %3746 = vmatprep.subr.bf16.mxu1 %v4215_v15 }
 0x83e   : > { %3747 = vmatpush3.bf16.msra.mxu1 %v4028_v30 }
 0x83f   : > { %3760 = vmatprep.subr.bf16.mxu1 %v4215_v15 }
 0x841   : > { %3749 = vmatmul.mubr.msk.bf16.vlgmr.msra.gmra.mrb[36].mxu1 %vm471_vm0, %v4385_v34 }
 0x842   : > { %3761 = vmatpush3.bf16.msra.mxu1 %v4029_v31  ;;  %3764 = vmatprep.mubr.msk.bf16.mxu1 %vm4216_vm1, %v4215_v15 }
 0x843   : > { %3762 = vmatprep.subr.bf16.mxu1 %v4215_v15 }
 0x846   : > { %3763 = vmatpush3.bf16.msra.mxu1 %v4030_v32 }
 0x847   : > { %3774 = vmatprep.subr.bf16.mxu1 %v4215_v15 }
 0x849   : > { %3765 = vmatmul.mubr.msk.bf16.vlgmr.msra.gmra.mrb[40].mxu1 %vm471_vm0, %v4385_v34 }
 0x84a   : > { %3776 = vmatprep.mubr.msk.bf16.mxu1 %vm4216_vm1, %v4215_v15 }
 0x90c   : > { %v1325_v33 = vpop.f32.mrb[32].mxu1 }
 0x90d   : > { %v3736_v35 = vpop.f32.mrb[33].mxu1  ;;  %v1332_v36 = vsel %vm740_vm3, %v1325_v33, -inf }
 0x90e   : > { %1333 = vmax.xlane.f32.xlu0 %v1332_v36  ;;  %v1328_v37 = vpop.f32.mrb[34].mxu1 }
 0x90f   : > { %v3737_v38 = vpop.f32.mrb[35].mxu1  ;;  %v1335_v39 = vsel %vm740_vm3, %v1328_v37, -inf }
 0x910   : > { %1336 = vmax.xlane.f32.xlu1 %v1335_v39 }
 0x914   : > { %v1458_v40 = vpop.f32.mrb[36].mxu1 }
 0x915   : > { %v3750_v41 = vpop.f32.mrb[37].mxu1 }
 0x916   : > { %v1461_v42 = vpop.f32.mrb[38].mxu1 }
 0x917   : > { %v1581_v43 = vpack.c.bf16 %v1461_v42, %v1458_v40  ;;  %v3751_v44 = vpop.f32.mrb[39].mxu1 }
 0x91c   : > { %v1574_v45 = vpop.f32.mrb[40].mxu1 }
 0x91d   : > { %v3766_v46 = vpop.f32.mrb[41].mxu1 }
 0x91e   : > { %v1577_v47 = vpop.f32.mrb[42].mxu1 }
 0x91f   : > { %v1653_v48 = vpack.c.bf16 %v1577_v47, %v1574_v45  ;;  %v3767_v49 = vpop.f32.mrb[43].mxu1 }
 0x921   : > { %3775 = vmatpush3.bf16.msra.mxu1 %v1653_v48 }
 0x922   : > { %3788 = vmatprep.subr.bf16.mxu1 %v4215_v15 }
 0x99b   : > { %v1334_v50 = vpop.xlane.xlu0 %1333 }
 0x99c   : > { %v1338_v51 = vsub.f32 %v1325_v33, %v1334_v50 }
 0x99d   : > { %v1337_v52 = vpop.xlane.xlu1 %1336 }
 0x99e   : > { %v1340_v53 = vmul.f32 1.442695, %v1338_v51  ;;  %v1339_v54 = vsub.f32 %v1328_v37, %v1337_v52 }
 0x9a0   : > { %4089 = vpow2.f32 %v1340_v53  ;;  %v1342_v55 = vmul.f32 1.442695, %v1339_v54 }
 0x9a2   : > { %4091 = vpow2.f32 %v1342_v55 }
 0x9aa   : > { %v4090_v56 = vpop.eup %4089 }
 0x9ab   : > { %v1344_v57 = vsel %vm740_vm3, %v4090_v56, 0.0 }
 0x9ac   : > { %v4092_v58 = vpop.eup %4091  ;;  %1345 = vadd.xlane.f32.xlu0 %v1344_v57  ;;  %v4037_v57 = vld [vmem:[%s4953_s4 + $0x40] sm:$0xff]  }
 0x9ad   : > { %v1347_v59 = vsel %vm740_vm3, %v4092_v58, 0.0 }
 0x9ae   : > { %1348 = vadd.xlane.f32.xlu1 %v1347_v59  ;;  %v4038_v59 = vld [vmem:[%s4953_s4 + $0x48] sm:$0xff]  }
 0xa39   : > { %v1346_v60 = vpop.xlane.xlu0 %1345 }
 0xa3a   : > { %4093 = vrcp.f32 %v1346_v60 }
 0xa3b   : > { %v1349_v61 = vpop.xlane.xlu1 %1348 }
 0xa3c   : > { %4095 = vrcp.f32 %v1349_v61 }
 0xa44   : > { %v4094_v62 = vpop.eup %4093 }
 0xa45   : > { %v1352_v0 = vmul.f32 %v4094_v62, %v4090_v56 }
 0xa46   : > { %v4096_v63 = vpop.eup %4095 }
 0xa47   : > { %v1353_v1 = vmul.f32 %v4096_v63, %v4092_v58 }
 0xa49   : > { %v1354_v3 = vpack.c.bf16 %v1353_v1, %v1352_v0 }
 0xa4b   : > { %3741 = vmatmul.mubr.msk.bf16.vlgmr.msra.gmra.mrb[20].mxu0 %vm740_vm3, %v1354_v3 }
 0xa4c   : > { %3753 = vmatpush3.bf16.msra.mxu0 %v4031_v2  ;;  %3756 = vmatprep.mubr.msk.bf16.mxu0 %vm4216_vm1, %v4215_v15 }
 0xa4d   : > { %3754 = vmatprep.subr.bf16.mxu0 %v4215_v15 }
 0xa50   : > { %3755 = vmatpush3.bf16.msra.mxu0 %v4032_v4 }
 0xa51   : > { %3768 = vmatprep.subr.bf16.mxu0 %v4215_v15 }
 0xa53   : > { %3757 = vmatmul.mubr.msk.bf16.vlgmr.msra.gmra.mrb[24].mxu0 %vm471_vm0, %v4385_v34 }
 0xa54   : > { %3770 = vmatprep.mubr.msk.bf16.mxu0 %vm4216_vm1, %v4215_v15 }
 0xb1e   : > { %v4567_v5 = vpop.f32.mrb[20].mxu0 }
 0xb1f   : > { %v3742_v6 = vpop.f32.mrb[21].mxu0 }
 0xb20   : > { %v4569_v7 = vpop.f32.mrb[22].mxu0 }
 0xb21   : > { %v1400_v8 = vpack.c.bf16 %v4569_v7, %v4567_v5  ;;  %v3743_v9 = vpop.f32.mrb[23].mxu0 }
 0xb26   : > { %v1516_v10 = vpop.f32.mrb[24].mxu0 }
 0xb27   : > { %v3758_v11 = vpop.f32.mrb[25].mxu0 }
 0xb28   : > { %v1519_v12 = vpop.f32.mrb[26].mxu0  ;;  %v4040_v11 = vld [vmem:[%s4952_s3 + $0x58] sm:$0xff]  }
 0xb29   : > { %v1582_v13 = vpack.c.bf16 %v1519_v12, %v1516_v10  ;;  %v3759_v14 = vpop.f32.mrb[27].mxu0  ;;  %v4039_v10 = vld [vmem:[%s4952_s3 + $0x50] sm:$0xff]  }
 0xb2a   : > { %v4041_v12 = vld [vmem:[%s4954_s5 + $0x50] sm:$0xff]  }
 0xb2b   : > { %v1587_v16 = vsel %vm692_vm2, %v1582_v13, 0  ;;  %v4042_v13 = vld [vmem:[%s4954_s5 + $0x58] sm:$0xff]  }
 0xb2c   : > { %3769 = vmatpush3.bf16.xpose.msra.mxu0 %v1587_v16 }
 0xb2d   : > { %3780 = vmatprep.subr.bf16.mxu0 %v4215_v15 }
 0xb33   : > { %3771 = vmatmul.mubr.msk.bf16.vlgmr.msra.gmra.mrb[28].mxu0 %vm692_vm2, %v1581_v43 }
 0xb34   : > { %3781 = vmatpush3.bf16.msra.mxu0 %v4033_v17  ;;  %3784 = vmatprep.mubr.msk.bf16.mxu0 %vm4216_vm1, %v4215_v15 }
 0xb35   : > { %3782 = vmatprep.subr.bf16.mxu0 %v4215_v15 }
 0xb38   : > { %3783 = vmatpush3.bf16.msra.mxu0 %v4034_v19 }
 0xb39   : > { %3796 = vmatprep.subr.bf16.mxu0 %v4215_v15 }
 0xb3b   : > { %3785 = vmatmul.mubr.msk.bf16.vlgmr.msra.gmra.mrb[32].mxu0 %vm471_vm0, %v4385_v34 }
 0xb3c   : > { %3797 = vmatpush3.bf16.msra.mxu0 %v4035_v22  ;;  %3800 = vmatprep.mubr.msk.bf16.mxu0 %vm4216_vm1, %v4215_v15 }
 0xb3d   : > { %3798 = vmatprep.subr.bf16.mxu0 %v4215_v15 }
 0xb40   : > { %3799 = vmatpush3.bf16.msra.mxu0 %v4036_v23 }
 0xb41   : > { %3810 = vmatprep.subr.bf16.mxu0 %v4215_v15 }
 0xb43   : > { %3801 = vmatmul.mubr.msk.bf16.vlgmr.msra.gmra.mrb[36].mxu0 %vm471_vm0, %v4385_v34 }
 0xb44   : > { %3812 = vmatprep.mubr.msk.bf16.mxu0 %vm4216_vm1, %v4215_v15 }
 0xc06   : > { %v1623_v24 = vpop.f32.mrb[28].mxu0 }
 0xc07   : > { %v3772_v25 = vpop.f32.mrb[29].mxu0  ;;  %v1630_v26 = vsel %vm740_vm3, %v1623_v24, -inf }
 0xc08   : > { %1631 = vmax.xlane.f32.xlu0 %v1630_v26  ;;  %v1626_v27 = vpop.f32.mrb[30].mxu0 }
 0xc09   : > { %v3773_v28 = vpop.f32.mrb[31].mxu0  ;;  %v1633_v29 = vsel %vm740_vm3, %v1626_v27, -inf }
 0xc0a   : > { %1634 = vmax.xlane.f32.xlu1 %v1633_v29 }
 0xc0e   : > { %v1756_v30 = vpop.f32.mrb[32].mxu0 }
 0xc0f   : > { %v3786_v31 = vpop.f32.mrb[33].mxu0 }
 0xc10   : > { %v1759_v32 = vpop.f32.mrb[34].mxu0 }
 0xc11   : > { %v1879_v33 = vpack.c.bf16 %v1759_v32, %v1756_v30  ;;  %v3787_v35 = vpop.f32.mrb[35].mxu0 }
 0xc16   : > { %v1872_v36 = vpop.f32.mrb[36].mxu0 }
 0xc17   : > { %v3802_v37 = vpop.f32.mrb[37].mxu0 }
 0xc18   : > { %v1875_v38 = vpop.f32.mrb[38].mxu0 }
 0xc19   : > { %v1951_v39 = vpack.c.bf16 %v1875_v38, %v1872_v36  ;;  %v3803_v40 = vpop.f32.mrb[39].mxu0 }
 0xc1b   : > { %3811 = vmatpush3.bf16.msra.mxu0 %v1951_v39 }
 0xc1c   : > { %3824 = vmatprep.subr.bf16.mxu0 %v4215_v15 }
 0xc95   : > { %v1632_v41 = vpop.xlane.xlu0 %1631 }
 0xc96   : > { %v1636_v42 = vsub.f32 %v1623_v24, %v1632_v41 }
 0xc97   : > { %v1635_v43 = vpop.xlane.xlu1 %1634 }
 0xc98   : > { %v1638_v44 = vmul.f32 1.442695, %v1636_v42  ;;  %v1637_v45 = vsub.f32 %v1626_v27, %v1635_v43 }
 0xc9a   : > { %4097 = vpow2.f32 %v1638_v44  ;;  %v1640_v46 = vmul.f32 1.442695, %v1637_v45 }
 0xc9c   : > { %4099 = vpow2.f32 %v1640_v46 }
 0xca4   : > { %v4098_v47 = vpop.eup %4097 }
 0xca5   : > { %v1642_v48 = vsel %vm740_vm3, %v4098_v47, 0.0 }
 0xca6   : > { %v4100_v49 = vpop.eup %4099  ;;  %1643 = vadd.xlane.f32.xlu0 %v1642_v48 }
 0xca7   : > { %v1645_v50 = vsel %vm740_vm3, %v4100_v49, 0.0 }
 0xca8   : > { %1646 = vadd.xlane.f32.xlu1 %v1645_v50 }
 0xd33   : > { %v1644_v51 = vpop.xlane.xlu0 %1643 }
 0xd34   : > { %4101 = vrcp.f32 %v1644_v51  ;;  %v4043_v51 = vld [vmem:[%s4953_s4 + $0x50] sm:$0xff]  }
 0xd35   : > { %v1647_v52 = vpop.xlane.xlu1 %1646 }
 0xd36   : > { %4103 = vrcp.f32 %v1647_v52 }
 0xd3e   : > { %v4102_v53 = vpop.eup %4101 }
 0xd3f   : > { %v1650_v55 = vmul.f32 %v4102_v53, %v4098_v47  ;;  %v4044_v53 = vld [vmem:[%s4953_s4 + $0x58] sm:$0xff]  }
 0xd40   : > { %v4104_v54 = vpop.eup %4103 }
 0xd41   : > { %v1651_v56 = vmul.f32 %v4104_v54, %v4100_v49 }
 0xd43   : > { %v1652_v58 = vpack.c.bf16 %v1651_v56, %v1650_v55 }
 0xd45   : > { %3777 = vmatmul.mubr.msk.bf16.vlgmr.msra.gmra.mrb[44].mxu1 %vm740_vm3, %v1652_v58 }
 0xd46   : > { %3789 = vmatpush3.bf16.msra.mxu1 %v4037_v57  ;;  %3792 = vmatprep.mubr.msk.bf16.mxu1 %vm4216_vm1, %v4215_v15 }
 0xd47   : > { %3790 = vmatprep.subr.bf16.mxu1 %v4215_v15 }
 0xd4a   : > { %3791 = vmatpush3.bf16.msra.mxu1 %v4038_v59 }
 0xd4b   : > { %3804 = vmatprep.subr.bf16.mxu1 %v4215_v15 }
 0xd4d   : > { %3793 = vmatmul.mubr.msk.bf16.vlgmr.msra.gmra.mrb[48].mxu1 %vm471_vm0, %v4385_v34 }
 0xd4e   : > { %3806 = vmatprep.mubr.msk.bf16.mxu1 %vm4216_vm1, %v4215_v15 }
 0xe18   : > { %v4622_v60 = vpop.f32.mrb[44].mxu1 }
 0xe19   : > { %v3778_v61 = vpop.f32.mrb[45].mxu1 }
 0xe1a   : > { %v4624_v62 = vpop.f32.mrb[46].mxu1 }
 0xe1b   : > { %v1698_v63 = vpack.c.bf16 %v4624_v62, %v4622_v60  ;;  %v3779_v0 = vpop.f32.mrb[47].mxu1 }
 0xe20   : > { %v1814_v1 = vpop.f32.mrb[48].mxu1 }
 0xe21   : > { %v3794_v2 = vpop.f32.mrb[49].mxu1 }
 0xe22   : > { %v1817_v3 = vpop.f32.mrb[50].mxu1 }
 0xe23   : > { %v1880_v4 = vpack.c.bf16 %v1817_v3, %v1814_v1  ;;  %v3795_v6 = vpop.f32.mrb[51].mxu1 }
 0xe24   : > { %v4046_v6 = vld [vmem:[%s4952_s3 + $0x68] sm:$0xff]  }
 0xe25   : > { %v1885_v9 = vsel %vm692_vm2, %v1880_v4, 0  ;;  %v4045_v4 = vld [vmem:[%s4952_s3 + $0x60] sm:$0xff]  }
 0xe26   : > { %3805 = vmatpush3.bf16.xpose.msra.mxu1 %v1885_v9  ;;  %v4047_v9 = vld [vmem:[%s4954_s5 + $0x60] sm:$0xff]  }
 0xe27   : > { %3816 = vmatprep.subr.bf16.mxu1 %v4215_v15 }
 0xe2d   : > { %3807 = vmatmul.mubr.msk.bf16.vlgmr.msra.gmra.mrb[52].mxu1 %vm692_vm2, %v1879_v33 }
 0xe2e   : > { %3817 = vmatpush3.bf16.msra.mxu1 %v4039_v10  ;;  %3820 = vmatprep.mubr.msk.bf16.mxu1 %vm4216_vm1, %v4215_v15  ;;  %v4048_v10 = vld [vmem:[%s4954_s5 + $0x68] sm:$0xff]  }
 0xe2f   : > { %3818 = vmatprep.subr.bf16.mxu1 %v4215_v15 }
 0xe32   : > { %3819 = vmatpush3.bf16.msra.mxu1 %v4040_v11 }
 0xe33   : > { %3832 = vmatprep.subr.bf16.mxu1 %v4215_v15 }
 0xe35   : > { %3821 = vmatmul.mubr.msk.bf16.vlgmr.msra.gmra.mrb[56].mxu1 %vm471_vm0, %v4385_v34 }
 0xe36   : > { %3833 = vmatpush3.bf16.msra.mxu1 %v4041_v12  ;;  %3836 = vmatprep.mubr.msk.bf16.mxu1 %vm4216_vm1, %v4215_v15 }
 0xe37   : > { %3834 = vmatprep.subr.bf16.mxu1 %v4215_v15 }
 0xe3a   : > { %3835 = vmatpush3.bf16.msra.mxu1 %v4042_v13 }
 0xe3b   : > { %3846 = vmatprep.subr.bf16.mxu1 %v4215_v15 }
 0xe3d   : > { %3837 = vmatmul.mubr.msk.bf16.vlgmr.msra.gmra.mrb[60].mxu1 %vm471_vm0, %v4385_v34 }
 0xe3e   : > { %3848 = vmatprep.mubr.msk.bf16.mxu1 %vm4216_vm1, %v4215_v15 }
 0xf00   : > { %v1921_v14 = vpop.f32.mrb[52].mxu1 }
 0xf01   : > { %v3808_v16 = vpop.f32.mrb[53].mxu1  ;;  %v1928_v17 = vsel %vm740_vm3, %v1921_v14, -inf }
 0xf02   : > { %1929 = vmax.xlane.f32.xlu0 %v1928_v17  ;;  %v1924_v19 = vpop.f32.mrb[54].mxu1 }
 0xf03   : > { %v3809_v22 = vpop.f32.mrb[55].mxu1  ;;  %v1931_v23 = vsel %vm740_vm3, %v1924_v19, -inf }
 0xf04   : > { %1932 = vmax.xlane.f32.xlu1 %v1931_v23 }
 0xf08   : > { %v2054_v24 = vpop.f32.mrb[56].mxu1 }
 0xf09   : > { %v3822_v25 = vpop.f32.mrb[57].mxu1 }
 0xf0a   : > { %v2057_v26 = vpop.f32.mrb[58].mxu1 }
 0xf0b   : > { %v2177_v27 = vpack.c.bf16 %v2057_v26, %v2054_v24  ;;  %v3823_v28 = vpop.f32.mrb[59].mxu1 }
 0xf10   : > { %v2170_v29 = vpop.f32.mrb[60].mxu1 }
 0xf11   : > { %v3838_v30 = vpop.f32.mrb[61].mxu1 }
 0xf12   : > { %v2173_v31 = vpop.f32.mrb[62].mxu1 }
 0xf13   : > { %v2249_v32 = vpack.c.bf16 %v2173_v31, %v2170_v29  ;;  %v3839_v33 = vpop.f32.mrb[63].mxu1 }
 0xf15   : > { %3847 = vmatpush3.bf16.msra.mxu1 %v2249_v32 }
 0xf16   : > { %3860 = vmatprep.subr.bf16.mxu1 %v4215_v15 }
 0xf8f   : > { %v1930_v35 = vpop.xlane.xlu0 %1929 }
 0xf90   : > { %v1934_v36 = vsub.f32 %v1921_v14, %v1930_v35 }
 0xf91   : > { %v1933_v37 = vpop.xlane.xlu1 %1932 }
 0xf92   : > { %v1936_v38 = vmul.f32 1.442695, %v1934_v36  ;;  %v1935_v39 = vsub.f32 %v1924_v19, %v1933_v37 }
 0xf94   : > { %4105 = vpow2.f32 %v1936_v38  ;;  %v1938_v40 = vmul.f32 1.442695, %v1935_v39 }
 0xf96   : > { %4107 = vpow2.f32 %v1938_v40 }
 0xf9e   : > { %v4106_v41 = vpop.eup %4105 }
 0xf9f   : > { %v1940_v42 = vsel %vm740_vm3, %v4106_v41, 0.0 }
 0xfa0   : > { %v4108_v43 = vpop.eup %4107  ;;  %1941 = vadd.xlane.f32.xlu0 %v1940_v42 }
 0xfa1   : > { %v1943_v44 = vsel %vm740_vm3, %v4108_v43, 0.0 }
 0xfa2   : > { %1944 = vadd.xlane.f32.xlu1 %v1943_v44 }
0x102d   : > { %v1942_v45 = vpop.xlane.xlu0 %1941 }
0x102e   : > { %4109 = vrcp.f32 %v1942_v45 }
0x102f   : > { %v1945_v46 = vpop.xlane.xlu1 %1944 }
0x1030   : > { %4111 = vrcp.f32 %v1945_v46 }
0x1038   : > { %v4110_v47 = vpop.eup %4109 }
0x1039   : > { %v1948_v49 = vmul.f32 %v4110_v47, %v4106_v41 }
0x103a   : > { %v4112_v48 = vpop.eup %4111 }
0x103b   : > { %v1949_v50 = vmul.f32 %v4112_v48, %v4108_v43  ;;  %v4049_v48 = vld [vmem:[%s4953_s4 + $0x60] sm:$0xff]  }
0x103d   : > { %v1950_v52 = vpack.c.bf16 %v1949_v50, %v1948_v49  ;;  %v4050_v50 = vld [vmem:[%s4953_s4 + $0x68] sm:$0xff]  }
0x103f   : > { %3813 = vmatmul.mubr.msk.bf16.vlgmr.msra.gmra.mrb[40].mxu0 %vm740_vm3, %v1950_v52 }
0x1040   : > { %3825 = vmatpush3.bf16.msra.mxu0 %v4043_v51  ;;  %3828 = vmatprep.mubr.msk.bf16.mxu0 %vm4216_vm1, %v4215_v15 }
0x1041   : > { %3826 = vmatprep.subr.bf16.mxu0 %v4215_v15 }
0x1044   : > { %3827 = vmatpush3.bf16.msra.mxu0 %v4044_v53 }
0x1045   : > { %3840 = vmatprep.subr.bf16.mxu0 %v4215_v15 }
0x1047   : > { %3829 = vmatmul.mubr.msk.bf16.vlgmr.msra.gmra.mrb[44].mxu0 %vm471_vm0, %v4385_v34 }
0x1048   : > { %3842 = vmatprep.mubr.msk.bf16.mxu0 %vm4216_vm1, %v4215_v15 }
0x1112   : > { %v4677_v54 = vpop.f32.mrb[40].mxu0 }
0x1113   : > { %v3814_v55 = vpop.f32.mrb[41].mxu0 }
0x1114   : > { %v4679_v56 = vpop.f32.mrb[42].mxu0 }
0x1115   : > { %v1996_v57 = vpack.c.bf16 %v4679_v56, %v4677_v54  ;;  %v3815_v58 = vpop.f32.mrb[43].mxu0 }
0x111a   : > { %v2112_v59 = vpop.f32.mrb[44].mxu0 }
0x111b   : > { %v3830_v61 = vpop.f32.mrb[45].mxu0 }
0x111c   : > { %v2115_v0 = vpop.f32.mrb[46].mxu0 }
0x111d   : > { %v2178_v1 = vpack.c.bf16 %v2115_v0, %v2112_v59  ;;  %v3831_v2 = vpop.f32.mrb[47].mxu0 }
0x111f   : > { %v2183_v3 = vsel %vm692_vm2, %v2178_v1, 0 }
0x1120   : > { %3841 = vmatpush3.bf16.xpose.msra.mxu0 %v2183_v3 }
0x1121   : > { %3852 = vmatprep.subr.bf16.mxu0 %v4215_v15 }
0x1127   : > { %3843 = vmatmul.mubr.msk.bf16.vlgmr.msra.gmra.mrb[48].mxu0 %vm692_vm2, %v2177_v27 }
0x1128   : > { %3853 = vmatpush3.bf16.msra.mxu0 %v4045_v4  ;;  %3856 = vmatprep.mubr.msk.bf16.mxu0 %vm4216_vm1, %v4215_v15  ;;  %v4051_v4 = vld [vmem:[%s4952_s3 + $0x70] sm:$0xff]  }
0x1129   : > { %3854 = vmatprep.subr.bf16.mxu0 %v4215_v15 }
0x112c   : > { %3855 = vmatpush3.bf16.msra.mxu0 %v4046_v6  ;;  %v4052_v6 = vld [vmem:[%s4952_s3 + $0x78] sm:$0xff]  }
0x112d   : > { %3868 = vmatprep.subr.bf16.mxu0 %v4215_v15 }
0x112f   : > { %3857 = vmatmul.mubr.msk.bf16.vlgmr.msra.gmra.mrb[52].mxu0 %vm471_vm0, %v4385_v34 }
0x1130   : > { %3869 = vmatpush3.bf16.msra.mxu0 %v4047_v9  ;;  %3872 = vmatprep.mubr.msk.bf16.mxu0 %vm4216_vm1, %v4215_v15  ;;  %v4053_v9 = vld [vmem:[%s4954_s5 + $0x70] sm:$0xff]  }
0x1131   : > { %3870 = vmatprep.subr.bf16.mxu0 %v4215_v15 }
0x1134   : > { %3871 = vmatpush3.bf16.msra.mxu0 %v4048_v10  ;;  %v4054_v10 = vld [vmem:[%s4954_s5 + $0x78] sm:$0xff]  }
0x1135   : > { %3882 = vmatprep.subr.bf16.mxu0 %v4215_v15 }
0x1137   : > { %3873 = vmatmul.mubr.msk.bf16.vlgmr.msra.gmra.mrb[56].mxu0 %vm471_vm0, %v4385_v34 }
0x1138   : > { %3884 = vmatprep.mubr.msk.bf16.mxu0 %vm4216_vm1, %v4215_v15 }
0x11fa   : > { %v2219_v11 = vpop.f32.mrb[48].mxu0 }
0x11fb   : > { %v3844_v12 = vpop.f32.mrb[49].mxu0  ;;  %v2226_v13 = vsel %vm740_vm3, %v2219_v11, -inf }
0x11fc   : > { %2227 = vmax.xlane.f32.xlu0 %v2226_v13  ;;  %v2222_v14 = vpop.f32.mrb[50].mxu0 }
0x11fd   : > { %v3845_v16 = vpop.f32.mrb[51].mxu0  ;;  %v2229_v17 = vsel %vm740_vm3, %v2222_v14, -inf }
0x11fe   : > { %2230 = vmax.xlane.f32.xlu1 %v2229_v17 }
0x1202   : > { %v2352_v19 = vpop.f32.mrb[52].mxu0 }
0x1203   : > { %v3858_v22 = vpop.f32.mrb[53].mxu0 }
0x1204   : > { %v2355_v23 = vpop.f32.mrb[54].mxu0 }
0x1205   : > { %v2475_v24 = vpack.c.bf16 %v2355_v23, %v2352_v19  ;;  %v3859_v25 = vpop.f32.mrb[55].mxu0 }
0x120a   : > { %v2468_v26 = vpop.f32.mrb[56].mxu0 }
0x120b   : > { %v3874_v27 = vpop.f32.mrb[57].mxu0 }
0x120c   : > { %v2471_v28 = vpop.f32.mrb[58].mxu0 }
0x120d   : > { %v2547_v29 = vpack.c.bf16 %v2471_v28, %v2468_v26  ;;  %v3875_v30 = vpop.f32.mrb[59].mxu0 }
0x120f   : > { %3883 = vmatpush3.bf16.msra.mxu0 %v2547_v29 }
0x1210   : > { %3896 = vmatprep.subr.bf16.mxu0 %v4215_v15 }
0x1289   : > { %v2228_v31 = vpop.xlane.xlu0 %2227 }
0x128a   : > { %v2232_v32 = vsub.f32 %v2219_v11, %v2228_v31 }
0x128b   : > { %v2231_v33 = vpop.xlane.xlu1 %2230 }
0x128c   : > { %v2234_v35 = vmul.f32 1.442695, %v2232_v32  ;;  %v2233_v36 = vsub.f32 %v2222_v14, %v2231_v33 }
0x128e   : > { %4113 = vpow2.f32 %v2234_v35  ;;  %v2236_v37 = vmul.f32 1.442695, %v2233_v36 }
0x1290   : > { %4115 = vpow2.f32 %v2236_v37 }
0x1298   : > { %v4114_v38 = vpop.eup %4113 }
0x1299   : > { %v2238_v39 = vsel %vm740_vm3, %v4114_v38, 0.0 }
0x129a   : > { %v4116_v40 = vpop.eup %4115  ;;  %2239 = vadd.xlane.f32.xlu0 %v2238_v39 }
0x129b   : > { %v2241_v41 = vsel %vm740_vm3, %v4116_v40, 0.0 }
0x129c   : > { %2242 = vadd.xlane.f32.xlu1 %v2241_v41 }
0x1327   : > { %v2240_v42 = vpop.xlane.xlu0 %2239 }
0x1328   : > { %4117 = vrcp.f32 %v2240_v42 }
0x1329   : > { %v2243_v43 = vpop.xlane.xlu1 %2242 }
0x132a   : > { %4119 = vrcp.f32 %v2243_v43 }
0x1332   : > { %v4118_v44 = vpop.eup %4117 }
0x1333   : > { %v2246_v46 = vmul.f32 %v4118_v44, %v4114_v38 }
0x1334   : > { %v4120_v45 = vpop.eup %4119 }
0x1335   : > { %v2247_v47 = vmul.f32 %v4120_v45, %v4116_v40 }
0x1337   : > { %v2248_v49 = vpack.c.bf16 %v2247_v47, %v2246_v46 }
0x1339   : > { %3849 = vmatmul.mubr.msk.bf16.vlgmr.msra.gmra.mrb[64].mxu1 %vm740_vm3, %v2248_v49 }
0x133a   : > { %3861 = vmatpush3.bf16.msra.mxu1 %v4049_v48  ;;  %3864 = vmatprep.mubr.msk.bf16.mxu1 %vm4216_vm1, %v4215_v15  ;;  %v4055_v48 = vld [vmem:[%s4953_s4 + $0x70] sm:$0xff]  }
0x133b   : > { %3862 = vmatprep.subr.bf16.mxu1 %v4215_v15 }
0x133e   : > { %3863 = vmatpush3.bf16.msra.mxu1 %v4050_v50  ;;  %v4056_v50 = vld [vmem:[%s4953_s4 + $0x78] sm:$0xff]  }
0x133f   : > { %3876 = vmatprep.subr.bf16.mxu1 %v4215_v15 }
0x1341   : > { %3865 = vmatmul.mubr.msk.bf16.vlgmr.msra.gmra.mrb[68].mxu1 %vm471_vm0, %v4385_v34 }
0x1342   : > { %3878 = vmatprep.mubr.msk.bf16.mxu1 %vm4216_vm1, %v4215_v15 }
0x140c   : > { %v4732_v51 = vpop.f32.mrb[64].mxu1 }
0x140d   : > { %v3850_v52 = vpop.f32.mrb[65].mxu1 }
0x140e   : > { %v4734_v53 = vpop.f32.mrb[66].mxu1 }
0x140f   : > { %v2294_v55 = vpack.c.bf16 %v4734_v53, %v4732_v51  ;;  %v3851_v58 = vpop.f32.mrb[67].mxu1  ;;  %v4057_v53 = vld [vmem:[%s4955_s6] sm:$0xff]  }
0x1414   : > { %v2410_v59 = vpop.f32.mrb[68].mxu1 }
0x1415   : > { %v3866_v61 = vpop.f32.mrb[69].mxu1 }
0x1416   : > { %v2413_v0 = vpop.f32.mrb[70].mxu1 }
0x1417   : > { %v2476_v1 = vpack.c.bf16 %v2413_v0, %v2410_v59  ;;  %v3867_v2 = vpop.f32.mrb[71].mxu1 }
0x1419   : > { %v2481_v3 = vsel %vm692_vm2, %v2476_v1, 0 }
0x141a   : > { %3877 = vmatpush3.bf16.xpose.msra.mxu1 %v2481_v3 }
0x141b   : > { %3888 = vmatprep.subr.bf16.mxu1 %v4215_v15 }
0x1421   : > { %3879 = vmatmul.mubr.msk.bf16.vlgmr.msra.gmra.mrb[72].mxu1 %vm692_vm2, %v2475_v24 }
0x1422   : > { %3889 = vmatpush3.bf16.msra.mxu1 %v4051_v4  ;;  %3892 = vmatprep.mubr.msk.bf16.mxu1 %vm4216_vm1, %v4215_v15 }
0x1423   : > { %3890 = vmatprep.subr.bf16.mxu1 %v4215_v15 }
0x1426   : > { %3891 = vmatpush3.bf16.msra.mxu1 %v4052_v6 }
0x1427   : > { %3904 = vmatprep.subr.bf16.mxu1 %v4215_v15 }
0x1429   : > { %3893 = vmatmul.mubr.msk.bf16.vlgmr.msra.gmra.mrb[76].mxu1 %vm471_vm0, %v4385_v34 }
0x142a   : > { %3905 = vmatpush3.bf16.msra.mxu1 %v4053_v9  ;;  %3908 = vmatprep.mubr.msk.bf16.mxu1 %vm4216_vm1, %v4215_v15 }
0x142b   : > { %3906 = vmatprep.subr.bf16.mxu1 %v4215_v15 }
0x142e   : > { %3907 = vmatpush3.bf16.msra.mxu1 %v4054_v10 }
0x142f   : > { %3918 = vmatprep.subr.bf16.mxu1 %v4215_v15 }
0x1431   : > { %3909 = vmatmul.mubr.msk.bf16.vlgmr.msra.gmra.mrb[80].mxu1 %vm471_vm0, %v4385_v34 }
0x1432   : > { %3920 = vmatprep.mubr.msk.bf16.mxu1 %vm4216_vm1, %v4215_v15 }
0x14f4   : > { %v2517_v11 = vpop.f32.mrb[72].mxu1 }
0x14f5   : > { %v3880_v12 = vpop.f32.mrb[73].mxu1  ;;  %v2524_v13 = vsel %vm740_vm3, %v2517_v11, -inf }
0x14f6   : > { %2525 = vmax.xlane.f32.xlu0 %v2524_v13  ;;  %v2520_v14 = vpop.f32.mrb[74].mxu1 }
0x14f7   : > { %v3881_v16 = vpop.f32.mrb[75].mxu1  ;;  %v2527_v17 = vsel %vm740_vm3, %v2520_v14, -inf }
0x14f8   : > { %2528 = vmax.xlane.f32.xlu1 %v2527_v17 }
0x14fc   : > { %v2650_v19 = vpop.f32.mrb[76].mxu1 }
0x14fd   : > { %v3894_v22 = vpop.f32.mrb[77].mxu1 }
0x14fe   : > { %v2653_v23 = vpop.f32.mrb[78].mxu1 }
0x14ff   : > { %v2773_v24 = vpack.c.bf16 %v2653_v23, %v2650_v19  ;;  %v3895_v25 = vpop.f32.mrb[79].mxu1 }
0x1504   : > { %v2766_v26 = vpop.f32.mrb[80].mxu1 }
0x1505   : > { %v3910_v27 = vpop.f32.mrb[81].mxu1 }
0x1506   : > { %v2769_v28 = vpop.f32.mrb[82].mxu1 }
0x1507   : > { %v2845_v29 = vpack.c.bf16 %v2769_v28, %v2766_v26  ;;  %v3911_v30 = vpop.f32.mrb[83].mxu1 }
0x1509   : > { %3919 = vmatpush3.bf16.msra.mxu1 %v2845_v29 }
0x150a   : > { %3932 = vmatprep.subr.bf16.mxu1 %v4215_v15 }
0x1583   : > { %v2526_v31 = vpop.xlane.xlu0 %2525 }
0x1584   : > { %v2530_v32 = vsub.f32 %v2517_v11, %v2526_v31 }
0x1585   : > { %v2529_v33 = vpop.xlane.xlu1 %2528 }
0x1586   : > { %v2532_v35 = vmul.f32 1.442695, %v2530_v32  ;;  %v2531_v36 = vsub.f32 %v2520_v14, %v2529_v33 }
0x1588   : > { %4121 = vpow2.f32 %v2532_v35  ;;  %v2534_v37 = vmul.f32 1.442695, %v2531_v36 }
0x158a   : > { %4123 = vpow2.f32 %v2534_v37 }
0x1592   : > { %v4122_v38 = vpop.eup %4121 }
0x1593   : > { %v2536_v39 = vsel %vm740_vm3, %v4122_v38, 0.0 }
0x1594   : > { %v4124_v40 = vpop.eup %4123  ;;  %2537 = vadd.xlane.f32.xlu0 %v2536_v39  ;;  %v4149_v39 = vld [vmem:[%s4354_s18] sm:$0xff] }
0x1595   : > { %v2539_v41 = vsel %vm740_vm3, %v4124_v40, 0.0 }
0x1596   : > { %2540 = vadd.xlane.f32.xlu1 %v2539_v41 }
0x1621   : > { %v2538_v42 = vpop.xlane.xlu0 %2537 }
0x1622   : > { %4125 = vrcp.f32 %v2538_v42 }
0x1623   : > { %v2541_v43 = vpop.xlane.xlu1 %2540 }
0x1624   : > { %4127 = vrcp.f32 %v2541_v43 }
0x162c   : > { %v4126_v44 = vpop.eup %4125 }
0x162d   : > { %v2544_v46 = vmul.f32 %v4126_v44, %v4122_v38  ;;  %v3494_v38 = vld [vmem:[%s4956_s7] ss:$0 sm:$0xff]  ;;  %v4150_v44 = vld [vmem:[%s4354_s18 + $0x8] sm:$0xff]  ;;  %s458_s18 = sand.u32 1, %s4205_s30  }
0x162e   : > { %v4128_v45 = vpop.eup %4127 }
0x162f   : > { %v2545_v47 = vmul.f32 %v4128_v45, %v4124_v40 }
0x1631   : > { %v2546_v49 = vpack.c.bf16 %v2545_v47, %v2544_v46 }
0x1633   : > { %3885 = vmatmul.mubr.msk.bf16.vlgmr.msra.gmra.mrb[60].mxu0 %vm740_vm3, %v2546_v49 }
0x1634   : > { %3897 = vmatpush3.bf16.msra.mxu0 %v4055_v48  ;;  %3900 = vmatprep.mubr.msk.bf16.mxu0 %vm4216_vm1, %v4215_v15 }
0x1635   : > { %3898 = vmatprep.subr.bf16.mxu0 %v4215_v15 }
0x1638   : > { %3899 = vmatpush3.bf16.msra.mxu0 %v4056_v50 }
0x1639   : > { %3912 = vmatprep.subr.bf16.mxu0 %v4215_v15 }
0x163b   : > { %3901 = vmatmul.mubr.msk.bf16.vlgmr.msra.gmra.mrb[64].mxu0 %vm471_vm0, %v4385_v34 }
0x163c   : > { %3914 = vmatprep.mubr.msk.bf16.mxu0 %vm4216_vm1, %v4215_v15 }
0x1706   : > { %v2585_v52 = vpop.f32.mrb[60].mxu0 }
0x1707   : > { %v3886_v58 = vpop.f32.mrb[61].mxu0 }
0x1708   : > { %v2588_v59 = vpop.f32.mrb[62].mxu0 }
0x1709   : > { %v2592_v61 = vpack.c.bf16 %v2588_v59, %v2585_v52  ;;  %v3887_v0 = vpop.f32.mrb[63].mxu0 }
0x170e   : > { %v2708_v1 = vpop.f32.mrb[64].mxu0 }
0x170f   : > { %v3902_v2 = vpop.f32.mrb[65].mxu0 }
0x1710   : > { %v2711_v3 = vpop.f32.mrb[66].mxu0 }
0x1711   : > { %v2774_v4 = vpack.c.bf16 %v2711_v3, %v2708_v1  ;;  %v3903_v6 = vpop.f32.mrb[67].mxu0 }
0x1712   : > { %v4059_v6 = vld [vmem:[%s4959_s10] sm:$0xff]  }
0x1713   : > { %v2779_v9 = vsel %vm692_vm2, %v2774_v4, 0 }
0x1714   : > { %3913 = vmatpush3.bf16.xpose.msra.mxu0 %v2779_v9  ;;  %v4060_v9 = vld [vmem:[%s4959_s10 + $0x8] sm:$0xff]  }
0x1715   : > { %3924 = vmatprep.subr.bf16.mxu0 %v4215_v15 }
0x171b   : > { %3915 = vmatmul.mubr.msk.bf16.vlgmr.msra.gmra.mrb[68].mxu0 %vm692_vm2, %v2773_v24 }
0x171c   : > { %3928 = vmatprep.mubr.msk.bf16.mxu0 %vm4216_vm1, %v4215_v15  ;;  %3925 = vmatpush3.bf16.msra.mxu0 %v4057_v53 }
0x171d   : > { %3926 = vmatprep.subr.bf16.mxu0 %v4215_v15 }
0x17ee   : > { %v2815_v34 = vpop.f32.mrb[68].mxu0 }
0x17ef   : > { %v3916_v10 = vpop.f32.mrb[69].mxu0  ;;  %v2822_v11 = vsel %vm740_vm3, %v2815_v34, -inf }
0x17f0   : > { %2823 = vmax.xlane.f32.xlu0 %v2822_v11  ;;  %v2818_v12 = vpop.f32.mrb[70].mxu0 }
0x17f1   : > { %v3917_v13 = vpop.f32.mrb[71].mxu0  ;;  %v2825_v14 = vsel %vm740_vm3, %v2818_v12, -inf }
0x17f2   : > { %2826 = vmax.xlane.f32.xlu1 %v2825_v14 }
0x187d   : > { %v2824_v16 = vpop.xlane.xlu0 %2823 }
0x187e   : > { %v2828_v17 = vsub.f32 %v2815_v34, %v2824_v16 }
0x187f   : > { %v2827_v19 = vpop.xlane.xlu1 %2826 }
0x1880   : > { %v2830_v22 = vmul.f32 1.442695, %v2828_v17  ;;  %v2829_v23 = vsub.f32 %v2818_v12, %v2827_v19  ;;  %v3495_v19 = vld [vmem:[%s4957_s8] ss:$0 sm:$0xff] }
0x1882   : > { %4129 = vpow2.f32 %v2830_v22  ;;  %v2832_v24 = vmul.f32 1.442695, %v2829_v23 }
0x1884   : > { %4131 = vpow2.f32 %v2832_v24 }
0x188c   : > { %v4130_v25 = vpop.eup %4129 }
0x188d   : > { %v2834_v26 = vsel %vm740_vm3, %v4130_v25, 0.0 }
0x188e   : > { %v4132_v27 = vpop.eup %4131  ;;  %2835 = vadd.xlane.f32.xlu0 %v2834_v26 }
0x188f   : > { %v2837_v28 = vsel %vm740_vm3, %v4132_v27, 0.0 }
0x1890   : > { %2838 = vadd.xlane.f32.xlu1 %v2837_v28 }
0x18a1   : > { %1402 = vrot.lane.b32.xlu1 %v1400_v8, %s4964_s27  ;;  %s3516_s27 = sshll.u32 %s4322_s17, 8  ;;  %s4907_s17 = scalar_lea.sflag [#allocation4], %s458_s18 }
0x18a4   : > { %1104 = vrot.lane.b32.xlu0 %v1102_v21, %s4218_s28 }
0x18a5   : > { %1700 = vrot.lane.b32.xlu1 %v1698_v63, %s4219_s20  ;;  %s4900_s20 = scalar_lea.hbm %s4963_s14, %s3516_s27  ;;  %s4224_s27 = smov [#allocation3]  }
0x18a6   : > { %s4155_s0 = sshll.u32 %s4224_s27, 4  ;;  %s4156_s0 = int_to_ptr.vmem [resolvable:$false] %s4155_s0 }
0x18a7   : > { %s4157_s28 = scalar_lea.vmem %s4156_s0, 512 }
0x18a8   : > { %2296 = vrot.lane.b32.xlu0 %v2294_v55, %s4220_s21  ;;  %v4058_v55 = vld [vmem:[%s4955_s6 + $0x8] sm:$0xff]   ;;  %s3314_s21 = sshll.u32 %s458_s18, 4 }
0x18a9   : > { %1998 = vrot.lane.b32.xlu1 %v1996_v57, %s4221_s25  ;;  %3927 = vmatpush3.bf16.msra.mxu0 %v4058_v55  ;;  %s460_s25 = scalar_lea.vmem [#allocation3], %s3314_s21 }
0x18aa   : > { %3940 = vmatprep.subr.bf16.mxu0 %v4215_v15 }
0x18ad   : > { %2594 = vrot.lane.b32.xlu1 %v2592_v61, %s4222_s26  ;;  %s4223_s26 = smov 28  }
0x191b   : > { %v2836_v5 = vpop.xlane.xlu0 %2835 }
0x191c   : > { %4133 = vrcp.f32 %v2836_v5 }
0x191d   : > { %v2839_v18 = vpop.xlane.xlu1 %2838 }
0x191e   : > { %4135 = vrcp.f32 %v2839_v18  ;;  %v4061_v18 = vld [vmem:[%s4961_s12] sm:$0xff]  }
0x191f   : > { %v1105_v20 = vpop.permute.xlu0 %1104 }
0x1920   : > { %1108 = vst.msk [vmem:[#allocation2] sm:$0xff] %vm1107_vm4, %v1105_v20  ;;  %v4062_v20 = vld [vmem:[%s4961_s12 + $0x8] sm:$0xff]  }
0x1921   : > { %v1403_v21 = vpop.permute.xlu1 %1402 }
0x1922   : > { %1406 = vst.msk [vmem:[#allocation2] sm:$0xff] %vm1405_vm5, %v1403_v21  ;;  %v4063_v21 = vld [vmem:[%s4961_s12 + $0x10] sm:$0xff]  }
0x1923   : > { %v2297_v56 = vpop.permute.xlu0 %2296 }
0x1925   : > { %v1701_v7 = vpop.permute.xlu1 %1700 }
0x1926   : > { %v4134_v8 = vpop.eup %4133  ;;  %1704 = vst.msk [vmem:[#allocation2] sm:$0xff] %vm1703_vm6, %v1701_v7  ;;  %v4064_v7 = vld [vmem:[%s4961_s12 + $0x18] sm:$0xff]  }
0x1927   : > { %v2842_v62 = vmul.f32 %v4134_v8, %v4130_v25  ;;  %v3496_v25 = vld [vmem:[%s4958_s9] ss:$0 sm:$0xff] }
0x1928   : > { %v4136_v60 = vpop.eup %4135  ;;  %v4065_v8 = vld [vmem:[%s4961_s12 + $0x20] sm:$0xff]  }
0x1929   : > { %v2843_v63 = vmul.f32 %v4136_v60, %v4132_v27  ;;  %v1999_v54 = vpop.permute.xlu1 %1998  ;;  %v4066_v60 = vld [vmem:[%s4961_s12 + $0x28] sm:$0xff]  }
0x192a   : > { %2002 = vst.msk [vmem:[#allocation2] sm:$0xff] %vm2001_vm7, %v1999_v54  ;;  %v3497_v54 = vld [vmem:[%s4960_s11] ss:$0 sm:$0xff] }
0x192b   : > { %2300 = vst.msk [vmem:[#allocation2] sm:$0xff] %vm2299_vm8, %v2297_v56  ;;  %v2844_v57 = vpack.c.bf16 %v2843_v63, %v2842_v62  ;;  %v4067_v62 = vld [vmem:[%s4961_s12 + $0x30] sm:$0xff]   ;;  %v4068_v63 = vld [vmem:[%s4961_s12 + $0x38] sm:$0xff]  }
0x192d   : > { %v2595_v51 = vpop.permute.xlu1 %2594  ;;  %3921 = vmatmul.mubr.msk.bf16.vlgmr.msra.gmra.mrb[84].mxu1 %vm740_vm3, %v2844_v57 }
0x192e   : > { %2598 = vst.msk [vmem:[#allocation2] sm:$0xff] %vm2597_vm9, %v2595_v51  ;;  %3936 = vmatprep.mubr.msk.bf16.mxu1 %vm4216_vm1, %v4215_v15  ;;  %3933 = vmatpush3.bf16.msra.mxu1 %v4059_v6 }
0x192f   : > { %3934 = vmatprep.subr.bf16.mxu1 %v4215_v15 }
0x1932   : > { %3935 = vmatpush3.bf16.msra.mxu1 %v4060_v9 }
0x1a00   : > { %v2883_v29 = vpop.f32.mrb[84].mxu1 }
0x1a01   : > { %v3922_v30 = vpop.f32.mrb[85].mxu1 }
0x1a02   : > { %v2886_v31 = vpop.f32.mrb[86].mxu1 }
0x1a03   : > { %v2890_v32 = vpack.c.bf16 %v2886_v31, %v2883_v29  ;;  %v3923_v33 = vpop.f32.mrb[87].mxu1 }
0x1a05   : > { %2892 = vrot.lane.b32.xlu0 %v2890_v32, %s4223_s26  ;;  %s3248_s26 = sshll.u32 %s460_s25, 4  ;;  %s4904_s26 = int_to_ptr.vmem [resolvable:$true] %s3248_s26 }
0x1a06   : > { %s4151_s21 = scalar_lea.vmem %s4904_s26, 256  ;;  %p4158_p0 = scmp.lt.s32.totalorder %s4904_s26, %s4156_s0 }
0x1a07   : > { %p4152_p11 = scmp.ne.s32.totalorder %s4904_s26, %s4151_s21  ;;  %p4159_p1 = scmp.lt.s32.totalorder %s4157_s28, %s4151_s21 }
0x1a09   : > { %p4153_p12 = pnand %p4152_p11, %p4339_p5  ;;  %p4160_p2 = por %p4159_p1, %p4158_p0 }
0x1a0b   : > { %p4154_p13 = pneg %p4153_p12 }
0x1a0d   : > { %p4161_p3 = pnand %p4160_p2, %p4154_p13 }
0x1a77   : > { %v2893_v35 = vpop.permute.xlu0 %2892 }
0x1a78   : > { %2896 = vst.msk [vmem:[#allocation2] sm:$0xff] %vm2895_vm10, %v2893_v35 }
0x1a7f   : > { %v2897_v36 = vld [vmem:[#allocation2] sm:$0xff] }
0x1a80   : > { %3929 = vmatmul.mubr.msk.bf16.vlgmr.msra.gmra.mrb[72].mxu0 %vm471_vm0, %v2897_v36 }
0x1a81   : > { %3956 = vmatprep.mubr.msk.bf16.mxu0 %vm4216_vm1, %v4215_v15  ;;  %3941 = vmatpush3.bf16.msra.mxu0 %v4061_v18 }
0x1a82   : > { %3942 = vmatprep.subr.bf16.mxu0 %v4215_v15 }
0x1a85   : > { %3943 = vmatpush3.bf16.msra.mxu0 %v4062_v20 }
0x1a86   : > { %3944 = vmatprep.subr.bf16.mxu0 %v4215_v15 }
0x1a89   : > { %3945 = vmatpush3.bf16.msra.mxu0 %v4063_v21 }
0x1a8a   : > { %3946 = vmatprep.subr.bf16.mxu0 %v4215_v15 }
0x1a8d   : > { %3947 = vmatpush3.bf16.msra.mxu0 %v4064_v7 }
0x1a8e   : > { %3948 = vmatprep.subr.bf16.mxu0 %v4215_v15 }
0x1a91   : > { %3949 = vmatpush3.bf16.msra.mxu0 %v4065_v8 }
0x1a92   : > { %3950 = vmatprep.subr.bf16.mxu0 %v4215_v15 }
0x1a95   : > { %3951 = vmatpush3.bf16.msra.mxu0 %v4066_v60 }
0x1a96   : > { %3952 = vmatprep.subr.bf16.mxu0 %v4215_v15 }
0x1a99   : > { %3953 = vmatpush3.bf16.msra.mxu0 %v4067_v62 }
0x1a9a   : > { %3954 = vmatprep.subr.bf16.mxu0 %v4215_v15 }
0x1a9d   : > { %3955 = vmatpush3.bf16.msra.mxu0 %v4068_v63 }
0x1b53   : > { %v2951_v37 = vpop.f32.mrb[72].mxu0 }
0x1b54   : > { %v2958_v40 = vadd.f32 %v4149_v39, %v2951_v37  ;;  %v3930_v41 = vpop.f32.mrb[73].mxu0 }
0x1b55   : > { %v2954_v42 = vpop.f32.mrb[74].mxu0 }
0x1b56   : > { %v4830_v43 = vadd.f32 %v3494_v38, %v2958_v40  ;;  %v2959_v45 = vadd.f32 %v4150_v44, %v2954_v42  ;;  %v3931_v46 = vpop.f32.mrb[75].mxu0 }
0x1b58   : > { %v4833_v47 = vadd.f32 %v3494_v38, %v2959_v45  ;;  %v2971_v48 = vsel %vm471_vm0, %v4830_v43, 0.0 }
0x1b59   : > { %2972 = vadd.xlane.f32.xlu1 %v2971_v48 }
0x1b5a   : > { %v2974_v49 = vsel %vm471_vm0, %v4833_v47, 0.0 }
0x1b5b   : > { %2975 = vadd.xlane.f32.xlu0 %v2974_v49 }
0x1be6   : > { %v2973_v50 = vpop.xlane.xlu1 %2972 }
0x1be7   : > { %v2977_v52 = vmul.f32 0.03125, %v2973_v50 }
0x1be8   : > { %v2976_v58 = vpop.xlane.xlu0 %2975 }
0x1be9   : > { %v2979_v59 = vsub.f32 %v4830_v43, %v2977_v52  ;;  %v2978_v61 = vmul.f32 0.03125, %v2976_v58  ;;  %v3501_v52 = vld [vmem:[%s4962_s13] ss:$0 sm:$0xff] }
0x1beb   : > { %v2980_v0 = vsub.f32 %v4833_v47, %v2978_v61  ;;  %v2981_v1 = vmul.f32 %v2979_v59, %v2979_v59 }
0x1bed   : > { %v2983_v2 = vsel %vm471_vm0, %v2981_v1, 0.0  ;;  %v2982_v3 = vmul.f32 %v2980_v0, %v2980_v0 }
0x1bee   : > { %2984 = vadd.xlane.f32.xlu0 %v2983_v2 }
0x1bef   : > { %v2986_v4 = vsel %vm471_vm0, %v2982_v3, 0.0 }
0x1bf2   : > { %2987 = vadd.xlane.f32.xlu0 %v2986_v4 }
0x1c7b   : > { %v2985_v34 = vpop.xlane.xlu0 %2984 }
0x1c7c   : > { %v2989_v10 = vmul.f32 0.03125, %v2985_v34 }
0x1c7e   : > { %v2991_v11 = vadd.f32 1e-05, %v2989_v10 }
0x1c7f   : > { %v2988_v12 = vpop.xlane.xlu0 %2987 }
0x1c80   : > { %4137 = vrsqrt.f32 %v2991_v11  ;;  %v2990_v13 = vmul.f32 0.03125, %v2988_v12 }
0x1c82   : > { %v2992_v14 = vadd.f32 1e-05, %v2990_v13 }
0x1c84   : > { %4139 = vrsqrt.f32 %v2992_v14 }
0x1c8a   : > { %v4138_v16 = vpop.eup %4137 }
0x1c8b   : > { %v2995_v17 = vmul.f32 %v4138_v16, %v2979_v59 }
0x1c8d   : > { %v3003_v23 = vmul.f32 %v3495_v19, %v2995_v17 }
0x1c8e   : > { %v4140_v22 = vpop.eup %4139 }
0x1c8f   : > { %v2996_v24 = vmul.f32 %v4140_v22, %v2980_v0  ;;  %v3011_v27 = vadd.f32 %v3496_v25, %v3003_v23 }
0x1c91   : > { %v3004_v26 = vmul.f32 %v3495_v19, %v2996_v24 }
0x1c93   : > { %v3012_v28 = vadd.f32 %v3496_v25, %v3004_v26 }
0x1c95   : > { %v3013_v5 = vpack.c.bf16 %v3012_v28, %v3011_v27 }
0x1c97   : > { %3937 = vmatmul.mubr.msk.bf16.vlgmr.msra.gmra.mrb[88].mxu1 %vm471_vm0, %v3013_v5 }
0x1d6a   : > { %v3074_v56 = vpop.f32.mrb[88].mxu1 }
0x1d6b   : > { %v3075_v57 = vadd.f32 %v3497_v54, %v3074_v56  ;;  %v3938_v51 = vpop.f32.mrb[89].mxu1 }
0x1d6c   : > { %v3077_v53 = vpop.f32.mrb[90].mxu1 }
0x1d6d   : > { %v3083_v55 = vmul.f32 0.044715, %v3075_v57  ;;  %v3078_v29 = vadd.f32 %v3497_v54, %v3077_v53  ;;  %v3939_v30 = vpop.f32.mrb[91].mxu1  ;;  %v3081_v44 = vmul.f32 0.5, %v3075_v57 }
0x1d6f   : > { %v3085_v31 = vmul.f32 %v3083_v55, %v3075_v57  ;;  %v3084_v32 = vmul.f32 0.044715, %v3078_v29  ;;  %v3082_v45 = vmul.f32 0.5, %v3078_v29 }
0x1d71   : > { %v3087_v33 = vmul.f32 %v3085_v31, %v3075_v57  ;;  %v3086_v35 = vmul.f32 %v3084_v32, %v3078_v29 }
0x1d73   : > { %v3089_v36 = vadd.f32 %v3087_v33, %v3075_v57  ;;  %v3088_v37 = vmul.f32 %v3086_v35, %v3078_v29 }
0x1d75   : > { %v3091_v38 = vmul.f32 0.7978846, %v3089_v36  ;;  %v3090_v15 = vadd.f32 %v3088_v37, %v3078_v29 }
0x1d77   : > { %4141 = vtanh.f32 %v3091_v38  ;;  %v3092_v39 = vmul.f32 0.7978846, %v3090_v15 }
0x1d79   : > { %4143 = vtanh.f32 %v3092_v39 }
0x1d81   : > { %v4142_v40 = vpop.eup %4141 }
0x1d82   : > { %v3095_v41 = vadd.f32 1.0, %v4142_v40 }
0x1d83   : > { %v4144_v42 = vpop.eup %4143 }
0x1d84   : > { %v3096_v46 = vadd.f32 1.0, %v4144_v42  ;;  %v3097_v48 = vmul.f32 %v3095_v41, %v3081_v44 }
0x1d86   : > { %v3098_v49 = vmul.f32 %v3096_v46, %v3082_v45 }
0x1d88   : > { %v3099_v50 = vpack.c.bf16 %v3098_v49, %v3097_v48 }
0x1d8a   : > { %3957 = vmatmul.mubr.bf16.vlgmr.msra.gmra.mrb[76].mxu0 %v3099_v50 }
0x1e5d   : > { %v3205_v58 = vpop.f32.mrb[76].mxu0 }
0x1e5e   : > { %v3206_v59 = vadd.f32 %v3501_v52, %v3205_v58  ;;  %v3958_v61 = vpop.f32.mrb[77].mxu0 }
0x1e5f   : > { %v3208_v0 = vpop.f32.mrb[78].mxu0 }
0x1e60   : > { %v3214_v1 = vmul.f32 0.044715, %v3206_v59  ;;  %v3209_v2 = vadd.f32 %v3501_v52, %v3208_v0  ;;  %v3959_v3 = vpop.f32.mrb[79].mxu0  ;;  %v3212_v17 = vmul.f32 0.5, %v3206_v59 }
0x1e62   : > { %v3216_v4 = vmul.f32 %v3214_v1, %v3206_v59  ;;  %v3215_v6 = vmul.f32 0.044715, %v3209_v2  ;;  %v3213_v24 = vmul.f32 0.5, %v3209_v2 }
0x1e64   : > { %v3218_v9 = vmul.f32 %v3216_v4, %v3206_v59  ;;  %v3217_v34 = vmul.f32 %v3215_v6, %v3209_v2 }
0x1e66   : > { %v3220_v10 = vadd.f32 %v3218_v9, %v3206_v59  ;;  %v3219_v11 = vmul.f32 %v3217_v34, %v3209_v2 }
0x1e68   : > { %v3222_v12 = vmul.f32 0.7978846, %v3220_v10  ;;  %v3221_v13 = vadd.f32 %v3219_v11, %v3209_v2 }
0x1e6a   : > { %4145 = vtanh.f32 %v3222_v12  ;;  %v3223_v14 = vmul.f32 0.7978846, %v3221_v13 }
0x1e6c   : > { %4147 = vtanh.f32 %v3223_v14 }
0x1e74   : > { %v4146_v16 = vpop.eup %4145 }
0x1e75   : > { %v3226_v19 = vadd.f32 1.0, %v4146_v16 }
0x1e76   : > { %v4148_v22 = vpop.eup %4147 }
0x1e77   : > { %v3228_v23 = vmul.f32 %v3226_v19, %v3212_v17  ;;  %v3227_v25 = vadd.f32 1.0, %v4148_v22 }
0x1e79   : > { %v3229_v26 = vmul.f32 %v3227_v25, %v3213_v24  ;;  %v3230_v27 = vadd.f32 %v3228_v23, %v4830_v43 }
0x1e7b   : > { %v3231_v28 = vadd.f32 %v3229_v26, %v4833_v47  ;;  %3232 = vst.msk [vmem:[%s460_s25] sm:$0xff] %vm471_vm0, %v3230_v27 }
0x1e7d   : > { %3233 = vst.msk [vmem:[%s460_s25 + $0x8] sm:$0xff] %vm471_vm0, %v3231_v28 }
0x1e7e   : > { %4164 = shalt.err (!%p4161_p3)
}
0x1e7f   : > { %s4165_s18 = scalar_lea.hbm %s4900_s20, 256  ;;  %s4169_s27 = scalar_lea.hbm %s4963_s14, 512 }
0x1e80   : > { %p4166_p4 = scmp.ne.s32.totalorder %s4900_s20, %s4165_s18  ;;  %p4170_p9 = scmp.lt.u32.totalorder %s4900_s20, %s4963_s14 }
0x1e81   : > { %p4171_p10 = scmp.lt.u32.totalorder %s4169_s27, %s4165_s18  ;;  %p4173_p12 = scmp.lt.u32.totalorder %s4165_s18, %s4900_s20 }
0x1e82   : > { %p4167_p7 = pnand %p4166_p4, %p4339_p5 }
0x1e83   : > { %p4172_p11 = por %p4171_p10, %p4170_p9 }
0x1e84   : > { %p4168_p8 = pneg %p4167_p7 }
0x1e85   : > { %p4174_p13 = por %p4173_p12, %p4172_p11 }
0x1e87   : > { %p4175_p0 = pnand %p4174_p13, %p4168_p8 }
0x1e89   : > { %4178 = shalt.err (!%p4175_p0)
}
0x1e8a   : > { %s4225_s21 = smov 128   ;;  %s4973_s28 = smov 8  }
0x1e8b   : > { %3960 = dma.vmem_to_hbm [thread:$0]  (%p4339_p5), %s4904_s26, 256, %s4900_s20, %s4907_s17, %s4225_s21, %s4225_s21, %s4973_s28  }
0x1e8c PF: > { %p3966_p1 = scmp.ge.s32.totalorder %s4213_s16, 2  ;;  %s3263_s1 = sand.u32 1, %s4201_s29  }
0x1e8d   : > { %s3264_s2 = scalar_lea.sflag [#allocation4], %s3263_s1 }
0x1e8e   : > { %p3963_p2 = pnand %p3966_p1, %p4343_p6 }
0x1e90   : > { %4196 = dma.done.wait (!%p3963_p2), %s3264_s2, 256  }
0x1e91   : > { %4198 = vsyncadd (!%p3963_p2), %s3264_s2, 4294967040  ;;  %p24_p3 = scmp.ge.s32.totalorder %s4326_s19, 4   ;;  %s4974_s29 = smov %s4205_s30 }
0x1e92   : > { %s4975_s30 = smov %s4209_s15  ;;  %s4976_s15 = smov %s4337_s22 }
0x1e93   : > { %s4977_s16 = smov %s4326_s19  ;;  %26 = sbr.rel (!%p24_p3) target bundleno = 7 (0x7), region = 132 }
0x1e9a   :  { %3269 = vsyncpa [#allocation4], 1 }
0x1e9b   :  { %3271 = vsyncpa [#allocation4 + $0x1], 1 }

</bundles_post_ra>
